<compile_context>
chip_gen: v7x
topology: tpu7x:2x2x1
jax: 0.10.0
libtpu: 0.0.40
codegen_flags: <defaults>
</compile_context>

<pallas_src>
import jax
import jax.numpy as jnp
import numpy as np
from jax import lax
from jax.experimental import pallas as pl
from jax.experimental.pallas import tpu as pltpu


# ------------------------------ Pallas kernel -------------------------------

def _lenet_kernel(x_ref, band1_ref, b1row_ref, selv1_ref, selh1_ref,
                  band2_ref, b2row_ref, selv2_ref, selh2_ref,
                  w1b_ref, b1fc_ref, w2fc_ref, b2fc_ref, w3fc_ref, b3fc_ref,
                  o_ref, feats_ref):
    """Fully fused LeNet forward for one batch tile of `tb` images.

    x_ref    : (tb, 32, 32)   input images
    band1_ref: (3, 32, 180)   conv1 banded weights, one (32,180) per kernel row
    b1row_ref: (1, 180)       conv1 bias, each value repeated 30x (per oc block)
    selv1_ref: (2, 15, 30)    pool1 vertical even/odd row selectors
    selh1_ref: (2, 180, 90)   pool1 horizontal even/odd column selectors
    band2_ref: (3, 90, 208)   conv2 banded weights, one (90,208) per kernel row
    b2row_ref: (1, 208)       conv2 bias, each value repeated 13x
    selv2_ref: (2, 6, 12)     pool2 vertical selectors (rows 0..11 only)
    selh2_ref: (2, 208, 96)   pool2 horizontal selectors (cols 0..11 per group)
    w1b_ref  : (6, 96, 128)   fc1 weights blocked by pooled row h (lane-padded)
    b1fc/b2fc/b3fc : (1, 128) fc biases (lane-padded)
    w2fc/w3fc: (128, 128)     fc2/fc3 weights (lane-padded)
    o_ref    : (tb, 128)      logits (cols 10..127 are zero padding)
    feats_ref: (6, tb, 96)    VMEM scratch: pooled conv2 features per h block
    """
    f32, bf16 = jnp.float32, jnp.bfloat16
    tb = x_ref.shape[0]

    sev1, sov1 = selv1_ref[0], selv1_ref[1]
    ceh1, coh1 = selh1_ref[0], selh1_ref[1]
    sev2, sov2 = selv2_ref[0], selv2_ref[1]
    ceh2, coh2 = selh2_ref[0], selh2_ref[1]
    b1row = b1row_ref[...]
    b2row = b2row_ref[...]

    for t in range(tb):
        x = x_ref[t].astype(bf16)                                  # (32, 32)

        # conv1 (1->6): one banded MXU matmul per kernel row, summed with a
        # vertical shift.  Columns are grouped [oc*30 + w].
        z0 = jnp.dot(x, band1_ref[0], preferred_element_type=f32)  # (32, 180)
        z1 = jnp.dot(x, band1_ref[1], preferred_element_type=f32)
        z2 = jnp.dot(x, band1_ref[2], preferred_element_type=f32)
        y1 = z0[0:30, :] + z1[1:31, :] + z2[2:32, :]               # (30, 180)
        a1 = jnp.maximum(y1 + b1row, 0.0).astype(bf16)             # ReLU

        # 2x2 max-pool via exact 0/1 selector matmuls (vertical then horiz).
        v1 = jnp.maximum(jnp.dot(sev1, a1, preferred_element_type=f32),
                         jnp.dot(sov1, a1, preferred_element_type=f32))
        v1 = v1.astype(bf16)                                       # (15, 180)
        p1 = jnp.maximum(jnp.dot(v1, ceh1, preferred_element_type=f32),
                         jnp.dot(v1, coh1, preferred_element_type=f32))
        # p1: (15, 90) f32, columns grouped [ic*15 + w]

        # conv2 (6->16): 3 banded MXU matmuls; only the 12 rows the floor
        # pool consumes are computed.  Columns grouped [oc*13 + w].
        y2 = jnp.dot(p1[0:12, :].astype(bf16), band2_ref[0],
                     preferred_element_type=f32)                   # (12, 208)
        y2 = y2 + jnp.dot(p1[1:13, :].astype(bf16), band2_ref[1],
                          preferred_element_type=f32)
        y2 = y2 + jnp.dot(p1[2:14, :].astype(bf16), band2_ref[2],
                          preferred_element_type=f32)
        a2 = jnp.maximum(y2 + b2row, 0.0).astype(bf16)             # ReLU

        v2 = jnp.maximum(jnp.dot(sev2, a2, preferred_element_type=f32),
                         jnp.dot(sov2, a2, preferred_element_type=f32))
        v2 = v2.astype(bf16)                                       # (6, 208)
        p2 = jnp.maximum(jnp.dot(v2, ceh2, preferred_element_type=f32),
                         jnp.dot(v2, coh2, preferred_element_type=f32))
        # p2: (6, 96) f32, rows = pooled h, columns grouped [oc*6 + w]

        for h in range(6):
            feats_ref[h, t, :] = p2[h, :]

    # fc1 + ReLU, contraction blocked over the 6 pooled rows, batched over tb.
    acc = jnp.dot(feats_ref[0].astype(bf16), w1b_ref[0],
                  preferred_element_type=f32)                      # (tb, 128)
    for h in range(1, 6):
        acc = acc + jnp.dot(feats_ref[h].astype(bf16), w1b_ref[h],
                            preferred_element_type=f32)
    h1 = jnp.maximum(acc + b1fc_ref[...], 0.0).astype(bf16)

    # fc2 + ReLU, fc3 — all lane-padded to 128.
    h2 = jnp.maximum(jnp.dot(h1, w2fc_ref[...], preferred_element_type=f32)
                     + b2fc_ref[...], 0.0).astype(bf16)
    o_ref[...] = (jnp.dot(h2, w3fc_ref[...], preferred_element_type=f32)
                  + b3fc_ref[...])


# --------------------------------- wrapper -----------------------------------

def lenet_forward_block(packed, x, *, tb=8):
    """x: (B, 1, 32, 32) float32 -> logits (B, 10)."""
    B = x.shape[0]
    tb = max(1, min(tb, B))
    bp = ((B + tb - 1) // tb) * tb
    x3 = x.reshape(B, 32, 32)
    if bp != B:
        x3 = jnp.pad(x3, ((0, bp - B), (0, 0), (0, 0)))

    def cspec(shape):
        n = len(shape)
        return pl.BlockSpec(shape, lambda b, n=n: (0,) * n)

    out = pl.pallas_call(
        _lenet_kernel,
        out_shape=jax.ShapeDtypeStruct((bp, 128), jnp.float32),
        grid_spec=pltpu.PrefetchScalarGridSpec(
            num_scalar_prefetch=0,
            grid=(bp // tb,),
            in_specs=[
                pl.BlockSpec((tb, 32, 32), lambda b: (b, 0, 0)),
                cspec((3, 32, 180)), cspec((1, 180)),
                cspec((2, 15, 30)), cspec((2, 180, 90)),
                cspec((3, 90, 208)), cspec((1, 208)),
                cspec((2, 6, 12)), cspec((2, 208, 96)),
                cspec((6, 96, 128)), cspec((1, 128)),
                cspec((128, 128)), cspec((1, 128)),
                cspec((128, 128)), cspec((1, 128)),
            ],
            out_specs=pl.BlockSpec((tb, 128), lambda b: (b, 0)),
            scratch_shapes=[pltpu.VMEM((6, tb, 96), jnp.float32)],
        ),
        # Batch-tile axis is embarrassingly parallel (v7x megacore splits it
        # when the grid has >= 2 steps).
        compiler_params=pltpu.CompilerParams(
            dimension_semantics=("parallel",)),
    )(x3, packed["band1"], packed["b1row"], packed["selv1"], packed["selh1"],
      packed["band2"], packed["b2row"], packed["selv2"], packed["selh2"],
      packed["w1b"], packed["b1fc"], packed["w2fc"], packed["b2fc"],
      packed["w3fc"], packed["b3fc"])
    return out[:B, :10]


# ------------------------------- parameters ----------------------------------

def _uniform(key, shape, fan_in):
    bound = 1.0 / np.sqrt(fan_in)
    return jax.random.uniform(key, shape, jnp.float32, -bound, bound)


def init_params(key):
    """PyTorch-layout parameters (Conv2d OIHW weights, Linear as (in, out))."""
    ks = jax.random.split(key, 10)
    return {
        "conv1_w": _uniform(ks[0], (6, 1, 3, 3), 1 * 9),
        "conv1_b": _uniform(ks[1], (6,), 1 * 9),
        "conv2_w": _uniform(ks[2], (16, 6, 3, 3), 6 * 9),
        "conv2_b": _uniform(ks[3], (16,), 6 * 9),
        "fc1_w": _uniform(ks[4], (16 * 6 * 6, 120), 16 * 6 * 6),
        "fc1_b": _uniform(ks[5], (120,), 16 * 6 * 6),
        "fc2_w": _uniform(ks[6], (120, 84), 120),
        "fc2_b": _uniform(ks[7], (84,), 120),
        "fc3_w": _uniform(ks[8], (84, 10), 84),
        "fc3_b": _uniform(ks[9], (10,), 84),
    }


def pack_params(p):
    """One-time repack: banded conv matrices, pool selectors, padded fc weights."""
    f32 = np.float32
    w1 = np.asarray(p["conv1_w"], f32)                 # (6, 1, 3, 3)
    w2 = np.asarray(p["conv2_w"], f32)                 # (16, 6, 3, 3)

    # conv1 banded weights: band1[di][c_out+dj, oc*30+c_out] = w1[oc,0,di,dj]
    band1 = np.zeros((3, 32, 6 * 30), f32)
    c30 = np.arange(30)
    for di in range(3):
        for dj in range(3):
            for oc in range(6):
                band1[di, c30 + dj, oc * 30 + c30] = w1[oc, 0, di, dj]

    # conv2 banded weights: band2[di][ic*15+c+dj, oc*13+c] = w2[oc,ic,di,dj]
    band2 = np.zeros((3, 6 * 15, 16 * 13), f32)
    c13 = np.arange(13)
    for di in range(3):
        for dj in range(3):
            for oc in range(16):
                for ic in range(6):
                    band2[di, ic * 15 + c13 + dj, oc * 13 + c13] = w2[oc, ic, di, dj]

    # 2x2 max-pool 0/1 selectors.
    selv1 = np.zeros((2, 15, 30), f32)
    i15 = np.arange(15)
    selv1[0, i15, 2 * i15] = 1.0
    selv1[1, i15, 2 * i15 + 1] = 1.0

    selh1 = np.zeros((2, 6 * 30, 6 * 15), f32)
    for oc in range(6):
        selh1[0, oc * 30 + 2 * i15, oc * 15 + i15] = 1.0
        selh1[1, oc * 30 + 2 * i15 + 1, oc * 15 + i15] = 1.0

    selv2 = np.zeros((2, 6, 12), f32)
    i6 = np.arange(6)
    selv2[0, i6, 2 * i6] = 1.0
    selv2[1, i6, 2 * i6 + 1] = 1.0

    selh2 = np.zeros((2, 16 * 13, 16 * 6), f32)
    for oc in range(16):
        selh2[0, oc * 13 + 2 * i6, oc * 6 + i6] = 1.0
        selh2[1, oc * 13 + 2 * i6 + 1, oc * 6 + i6] = 1.0

    b1row = np.repeat(np.asarray(p["conv1_b"], f32), 30)[None, :]   # (1, 180)
    b2row = np.repeat(np.asarray(p["conv2_b"], f32), 13)[None, :]   # (1, 208)

    # fc1 blocked by pooled row h: w1b[h][oc*6+w, n] = fc1_w[oc*36+h*6+w, n]
    # (matches PyTorch's NCHW .view(-1, 576) flatten order).
    f1 = np.asarray(p["fc1_w"], f32).reshape(16, 6, 6, 120)
    f1 = np.transpose(f1, (1, 0, 2, 3)).reshape(6, 96, 120)
    w1b = np.zeros((6, 96, 128), f32)
    w1b[:, :, :120] = f1

    def pad_mat(a, rows, cols):
        out = np.zeros((rows, cols), f32)
        a = np.asarray(a, f32)
        out[:a.shape[0], :a.shape[1]] = a
        return out

    def pad_row(a, cols):
        out = np.zeros((1, cols), f32)
        a = np.asarray(a, f32)
        out[0, :a.shape[0]] = a
        return out

    bf16 = jnp.bfloat16
    return {
        "band1": jnp.asarray(band1, bf16),
        "b1row": jnp.asarray(b1row),
        "selv1": jnp.asarray(selv1, bf16),
        "selh1": jnp.asarray(selh1, bf16),
        "band2": jnp.asarray(band2, bf16),
        "b2row": jnp.asarray(b2row),
        "selv2": jnp.asarray(selv2, bf16),
        "selh2": jnp.asarray(selh2, bf16),
        "w1b": jnp.asarray(w1b, bf16),
        "b1fc": jnp.asarray(pad_row(p["fc1_b"], 128)),
        "w2fc": jnp.asarray(pad_mat(p["fc2_w"], 128, 128), bf16),
        "b2fc": jnp.asarray(pad_row(p["fc2_b"], 128)),
        "w3fc": jnp.asarray(pad_mat(p["fc3_w"], 128, 128), bf16),
        "b3fc": jnp.asarray(pad_row(p["fc3_b"], 128)),
    }


# --------------------------------- forward -----------------------------------

@jax.jit
def net_forward(packed, x):
    """Pallas forward: single fused conv/pool/fc kernel, gridded over batch."""
    return lenet_forward_block(packed, x)


# -------------------------------- reference ----------------------------------

@jax.jit
def net_forward_ref(params, x):
    hp = lax.Precision.HIGHEST

    def conv(x, w, b):
        y = lax.conv_general_dilated(
            x, w, window_strides=(1, 1), padding="VALID",
            dimension_numbers=("NCHW", "OIHW", "NCHW"), precision=hp)
        return jnp.maximum(y + b[None, :, None, None], 0.0)

    def pool(x):
        return lax.reduce_window(x, -jnp.inf, lax.max,
                                 (1, 1, 2, 2), (1, 1, 2, 2), "VALID")

    x = pool(conv(x, params["conv1_w"], params["conv1_b"]))
    x = pool(conv(x, params["conv2_w"], params["conv2_b"]))
    x = x.reshape(x.shape[0], -1)
    x = jnp.maximum(jnp.dot(x, params["fc1_w"], precision=hp) + params["fc1_b"], 0.0)
    x = jnp.maximum(jnp.dot(x, params["fc2_w"], precision=hp) + params["fc2_b"], 0.0)
    return jnp.dot(x, params["fc3_w"], precision=hp) + params["fc3_b"]


if __name__ == "__main__":
    key = jax.random.PRNGKey(0)
    pkey, xkey = jax.random.split(key)
    params = init_params(pkey)
    packed = pack_params(params)

    # LeNet geometry requires a 32x32 input so the flatten is 16*6*6.
    x = jax.random.normal(xkey, (2, 1, 32, 32), jnp.float32)

    out = jax.block_until_ready(net_forward(packed, x))
    ref = jax.block_until_ready(net_forward_ref(params, x))

    # Tolerance covers bf16 MXU operands (f32 accumulation) vs. the f32
    # HIGHEST-precision reference.
    np.testing.assert_allclose(np.asarray(out), np.asarray(ref),
                               rtol=2e-2, atol=2e-2)
    assert out.shape == (2, 10)
    print("KERNEL_OK")
</pallas_src>

<mosaic_0001>
module attributes {stable_mosaic.version = 11 : i64} {
  func.func @_lenet_kernel(%arg0: i32, %arg1: memref<2x32x32xf32, #tpu.memory_space<vmem>>, %arg2: memref<3x32x180xbf16, #tpu.memory_space<vmem>>, %arg3: memref<1x180xf32, #tpu.memory_space<vmem>>, %arg4: memref<2x15x30xbf16, #tpu.memory_space<vmem>>, %arg5: memref<2x180x90xbf16, #tpu.memory_space<vmem>>, %arg6: memref<3x90x208xbf16, #tpu.memory_space<vmem>>, %arg7: memref<1x208xf32, #tpu.memory_space<vmem>>, %arg8: memref<2x6x12xbf16, #tpu.memory_space<vmem>>, %arg9: memref<2x208x96xbf16, #tpu.memory_space<vmem>>, %arg10: memref<6x96x128xbf16, #tpu.memory_space<vmem>>, %arg11: memref<1x128xf32, #tpu.memory_space<vmem>>, %arg12: memref<128x128xbf16, #tpu.memory_space<vmem>>, %arg13: memref<1x128xf32, #tpu.memory_space<vmem>>, %arg14: memref<128x128xbf16, #tpu.memory_space<vmem>>, %arg15: memref<1x128xf32, #tpu.memory_space<vmem>>, %arg16: memref<2x128xf32, #tpu.memory_space<vmem>>, %arg17: memref<6x2x96xf32, #tpu.memory_space<vmem>>) attributes {dimension_semantics = [#tpu.dimension_semantics<parallel>], iteration_bounds = array<i64: 1>, scalar_prefetch = 0 : i64, scratch_operands = 1 : i64, tpu.core_type = #tpu.core_type<tc>, window_params = [{transform_indices = @transform_0, window_bounds = array<i64: 2, 32, 32>}, {pipeline_mode = #tpu.pipeline_mode<synchronous>, transform_indices = @transform_1, window_bounds = array<i64: 3, 32, 180>}, {pipeline_mode = #tpu.pipeline_mode<synchronous>, transform_indices = @transform_2, window_bounds = array<i64: 1, 180>}, {pipeline_mode = #tpu.pipeline_mode<synchronous>, transform_indices = @transform_3, window_bounds = array<i64: 2, 15, 30>}, {pipeline_mode = #tpu.pipeline_mode<synchronous>, transform_indices = @transform_4, window_bounds = array<i64: 2, 180, 90>}, {pipeline_mode = #tpu.pipeline_mode<synchronous>, transform_indices = @transform_5, window_bounds = array<i64: 3, 90, 208>}, {pipeline_mode = #tpu.pipeline_mode<synchronous>, transform_indices = @transform_6, window_bounds = array<i64: 1, 208>}, {pipeline_mode = #tpu.pipeline_mode<synchronous>, transform_indices = @transform_7, window_bounds = array<i64: 2, 6, 12>}, {pipeline_mode = #tpu.pipeline_mode<synchronous>, transform_indices = @transform_8, window_bounds = array<i64: 2, 208, 96>}, {pipeline_mode = #tpu.pipeline_mode<synchronous>, transform_indices = @transform_9, window_bounds = array<i64: 6, 96, 128>}, {pipeline_mode = #tpu.pipeline_mode<synchronous>, transform_indices = @transform_10, window_bounds = array<i64: 1, 128>}, {pipeline_mode = #tpu.pipeline_mode<synchronous>, transform_indices = @transform_11, window_bounds = array<i64: 128, 128>}, {pipeline_mode = #tpu.pipeline_mode<synchronous>, transform_indices = @transform_12, window_bounds = array<i64: 1, 128>}, {pipeline_mode = #tpu.pipeline_mode<synchronous>, transform_indices = @transform_13, window_bounds = array<i64: 128, 128>}, {pipeline_mode = #tpu.pipeline_mode<synchronous>, transform_indices = @transform_14, window_bounds = array<i64: 1, 128>}, {transform_indices = @transform_15, window_bounds = array<i64: 2, 128>}]} {
    %c0 = arith.constant 0 : index
    %c0_0 = arith.constant 0 : index
    %c0_1 = arith.constant 0 : index
    %0 = vector.load %arg4[%c0, %c0_0, %c0_1] : memref<2x15x30xbf16, #tpu.memory_space<vmem>>, vector<1x15x30xbf16>
    %1 = vector.shape_cast %0 : vector<1x15x30xbf16> to vector<15x30xbf16>
    %c1 = arith.constant 1 : index
    %c0_2 = arith.constant 0 : index
    %c0_3 = arith.constant 0 : index
    %2 = vector.load %arg4[%c1, %c0_2, %c0_3] : memref<2x15x30xbf16, #tpu.memory_space<vmem>>, vector<1x15x30xbf16>
    %3 = vector.shape_cast %2 : vector<1x15x30xbf16> to vector<15x30xbf16>
    %c0_4 = arith.constant 0 : index
    %c0_5 = arith.constant 0 : index
    %c0_6 = arith.constant 0 : index
    %4 = vector.load %arg5[%c0_4, %c0_5, %c0_6] : memref<2x180x90xbf16, #tpu.memory_space<vmem>>, vector<1x180x90xbf16>
    %5 = vector.shape_cast %4 : vector<1x180x90xbf16> to vector<180x90xbf16>
    %c1_7 = arith.constant 1 : index
    %c0_8 = arith.constant 0 : index
    %c0_9 = arith.constant 0 : index
    %6 = vector.load %arg5[%c1_7, %c0_8, %c0_9] : memref<2x180x90xbf16, #tpu.memory_space<vmem>>, vector<1x180x90xbf16>
    %7 = vector.shape_cast %6 : vector<1x180x90xbf16> to vector<180x90xbf16>
    %c0_10 = arith.constant 0 : index
    %c0_11 = arith.constant 0 : index
    %c0_12 = arith.constant 0 : index
    %8 = vector.load %arg8[%c0_10, %c0_11, %c0_12] : memref<2x6x12xbf16, #tpu.memory_space<vmem>>, vector<1x6x12xbf16>
    %9 = vector.shape_cast %8 : vector<1x6x12xbf16> to vector<6x12xbf16>
    %c1_13 = arith.constant 1 : index
    %c0_14 = arith.constant 0 : index
    %c0_15 = arith.constant 0 : index
    %10 = vector.load %arg8[%c1_13, %c0_14, %c0_15] : memref<2x6x12xbf16, #tpu.memory_space<vmem>>, vector<1x6x12xbf16>
    %11 = vector.shape_cast %10 : vector<1x6x12xbf16> to vector<6x12xbf16>
    %c0_16 = arith.constant 0 : index
    %c0_17 = arith.constant 0 : index
    %c0_18 = arith.constant 0 : index
    %12 = vector.load %arg9[%c0_16, %c0_17, %c0_18] : memref<2x208x96xbf16, #tpu.memory_space<vmem>>, vector<1x208x96xbf16>
    %13 = vector.shape_cast %12 : vector<1x208x96xbf16> to vector<208x96xbf16>
    %c1_19 = arith.constant 1 : index
    %c0_20 = arith.constant 0 : index
    %c0_21 = arith.constant 0 : index
    %14 = vector.load %arg9[%c1_19, %c0_20, %c0_21] : memref<2x208x96xbf16, #tpu.memory_space<vmem>>, vector<1x208x96xbf16>
    %15 = vector.shape_cast %14 : vector<1x208x96xbf16> to vector<208x96xbf16>
    %c0_22 = arith.constant 0 : index
    %c0_23 = arith.constant 0 : index
    %16 = vector.load %arg3[%c0_22, %c0_23] : memref<1x180xf32, #tpu.memory_space<vmem>>, vector<1x180xf32>
    %c0_24 = arith.constant 0 : index
    %c0_25 = arith.constant 0 : index
    %17 = vector.load %arg7[%c0_24, %c0_25] : memref<1x208xf32, #tpu.memory_space<vmem>>, vector<1x208xf32>
    %c0_26 = arith.constant 0 : index
    %c0_27 = arith.constant 0 : index
    %c0_28 = arith.constant 0 : index
    %18 = vector.load %arg1[%c0_26, %c0_27, %c0_28] : memref<2x32x32xf32, #tpu.memory_space<vmem>>, vector<1x32x32xf32>
    %19 = vector.shape_cast %18 : vector<1x32x32xf32> to vector<32x32xf32>
    %20 = arith.truncf %19 : vector<32x32xf32> to vector<32x32xbf16>
    %c0_29 = arith.constant 0 : index
    %c0_30 = arith.constant 0 : index
    %c0_31 = arith.constant 0 : index
    %21 = vector.load %arg2[%c0_29, %c0_30, %c0_31] : memref<3x32x180xbf16, #tpu.memory_space<vmem>>, vector<1x32x180xbf16>
    %22 = vector.shape_cast %21 : vector<1x32x180xbf16> to vector<32x180xbf16>
    %cst = arith.constant dense<0.000000e+00> : vector<32x180xf32>
    %23 = tpu.matmul %20, %22, %cst {dimension_numbers = #tpu.dot_dimension_numbers<[1], [0], [0], [1], [0, 0, 1, 1], [], []>} : vector<32x32xbf16>, vector<32x180xbf16>, vector<32x180xf32> -> vector<32x180xf32>
    %c1_32 = arith.constant 1 : index
    %c0_33 = arith.constant 0 : index
    %c0_34 = arith.constant 0 : index
    %24 = vector.load %arg2[%c1_32, %c0_33, %c0_34] : memref<3x32x180xbf16, #tpu.memory_space<vmem>>, vector<1x32x180xbf16>
    %25 = vector.shape_cast %24 : vector<1x32x180xbf16> to vector<32x180xbf16>
    %cst_35 = arith.constant dense<0.000000e+00> : vector<32x180xf32>
    %26 = tpu.matmul %20, %25, %cst_35 {dimension_numbers = #tpu.dot_dimension_numbers<[1], [0], [0], [1], [0, 0, 1, 1], [], []>} : vector<32x32xbf16>, vector<32x180xbf16>, vector<32x180xf32> -> vector<32x180xf32>
    %c2 = arith.constant 2 : index
    %c0_36 = arith.constant 0 : index
    %c0_37 = arith.constant 0 : index
    %27 = vector.load %arg2[%c2, %c0_36, %c0_37] : memref<3x32x180xbf16, #tpu.memory_space<vmem>>, vector<1x32x180xbf16>
    %28 = vector.shape_cast %27 : vector<1x32x180xbf16> to vector<32x180xbf16>
    %cst_38 = arith.constant dense<0.000000e+00> : vector<32x180xf32>
    %29 = tpu.matmul %20, %28, %cst_38 {dimension_numbers = #tpu.dot_dimension_numbers<[1], [0], [0], [1], [0, 0, 1, 1], [], []>} : vector<32x32xbf16>, vector<32x180xbf16>, vector<32x180xf32> -> vector<32x180xf32>
    %30 = vector.extract_strided_slice %23 {offsets = [0, 0], sizes = [30, 180], strides = [1, 1]} : vector<32x180xf32> to vector<30x180xf32>
    %31 = vector.extract_strided_slice %26 {offsets = [1, 0], sizes = [30, 180], strides = [1, 1]} : vector<32x180xf32> to vector<30x180xf32>
    %32 = arith.addf %30, %31 : vector<30x180xf32>
    %33 = vector.extract_strided_slice %29 {offsets = [2, 0], sizes = [30, 180], strides = [1, 1]} : vector<32x180xf32> to vector<30x180xf32>
    %34 = arith.addf %32, %33 : vector<30x180xf32>
    %35 = vector.broadcast %16 : vector<1x180xf32> to vector<30x180xf32>
    %36 = arith.addf %34, %35 : vector<30x180xf32>
    %cst_39 = arith.constant 0.000000e+00 : f32
    %37 = vector.broadcast %cst_39 : f32 to vector<30x180xf32>
    %38 = arith.maximumf %36, %37 : vector<30x180xf32>
    %39 = arith.truncf %38 : vector<30x180xf32> to vector<30x180xbf16>
    %cst_40 = arith.constant dense<0.000000e+00> : vector<15x180xf32>
    %40 = tpu.matmul %1, %39, %cst_40 {dimension_numbers = #tpu.dot_dimension_numbers<[1], [0], [0], [1], [0, 0, 1, 1], [], []>} : vector<15x30xbf16>, vector<30x180xbf16>, vector<15x180xf32> -> vector<15x180xf32>
    %cst_41 = arith.constant dense<0.000000e+00> : vector<15x180xf32>
    %41 = tpu.matmul %3, %39, %cst_41 {dimension_numbers = #tpu.dot_dimension_numbers<[1], [0], [0], [1], [0, 0, 1, 1], [], []>} : vector<15x30xbf16>, vector<30x180xbf16>, vector<15x180xf32> -> vector<15x180xf32>
    %42 = arith.maximumf %40, %41 : vector<15x180xf32>
    %43 = arith.truncf %42 : vector<15x180xf32> to vector<15x180xbf16>
    %cst_42 = arith.constant dense<0.000000e+00> : vector<15x90xf32>
    %44 = tpu.matmul %43, %5, %cst_42 {dimension_numbers = #tpu.dot_dimension_numbers<[1], [0], [0], [1], [0, 0, 1, 1], [], []>} : vector<15x180xbf16>, vector<180x90xbf16>, vector<15x90xf32> -> vector<15x90xf32>
    %cst_43 = arith.constant dense<0.000000e+00> : vector<15x90xf32>
    %45 = tpu.matmul %43, %7, %cst_43 {dimension_numbers = #tpu.dot_dimension_numbers<[1], [0], [0], [1], [0, 0, 1, 1], [], []>} : vector<15x180xbf16>, vector<180x90xbf16>, vector<15x90xf32> -> vector<15x90xf32>
    %46 = arith.maximumf %44, %45 : vector<15x90xf32>
    %47 = vector.extract_strided_slice %46 {offsets = [0, 0], sizes = [12, 90], strides = [1, 1]} : vector<15x90xf32> to vector<12x90xf32>
    %48 = arith.truncf %47 : vector<12x90xf32> to vector<12x90xbf16>
    %c0_44 = arith.constant 0 : index
    %c0_45 = arith.constant 0 : index
    %c0_46 = arith.constant 0 : index
    %49 = vector.load %arg6[%c0_44, %c0_45, %c0_46] : memref<3x90x208xbf16, #tpu.memory_space<vmem>>, vector<1x90x208xbf16>
    %50 = vector.shape_cast %49 : vector<1x90x208xbf16> to vector<90x208xbf16>
    %cst_47 = arith.constant dense<0.000000e+00> : vector<12x208xf32>
    %51 = tpu.matmul %48, %50, %cst_47 {dimension_numbers = #tpu.dot_dimension_numbers<[1], [0], [0], [1], [0, 0, 1, 1], [], []>} : vector<12x90xbf16>, vector<90x208xbf16>, vector<12x208xf32> -> vector<12x208xf32>
    %52 = vector.extract_strided_slice %46 {offsets = [1, 0], sizes = [12, 90], strides = [1, 1]} : vector<15x90xf32> to vector<12x90xf32>
    %53 = arith.truncf %52 : vector<12x90xf32> to vector<12x90xbf16>
    %c1_48 = arith.constant 1 : index
    %c0_49 = arith.constant 0 : index
    %c0_50 = arith.constant 0 : index
    %54 = vector.load %arg6[%c1_48, %c0_49, %c0_50] : memref<3x90x208xbf16, #tpu.memory_space<vmem>>, vector<1x90x208xbf16>
    %55 = vector.shape_cast %54 : vector<1x90x208xbf16> to vector<90x208xbf16>
    %cst_51 = arith.constant dense<0.000000e+00> : vector<12x208xf32>
    %56 = tpu.matmul %53, %55, %cst_51 {dimension_numbers = #tpu.dot_dimension_numbers<[1], [0], [0], [1], [0, 0, 1, 1], [], []>} : vector<12x90xbf16>, vector<90x208xbf16>, vector<12x208xf32> -> vector<12x208xf32>
    %57 = arith.addf %51, %56 : vector<12x208xf32>
    %58 = vector.extract_strided_slice %46 {offsets = [2, 0], sizes = [12, 90], strides = [1, 1]} : vector<15x90xf32> to vector<12x90xf32>
    %59 = arith.truncf %58 : vector<12x90xf32> to vector<12x90xbf16>
    %c2_52 = arith.constant 2 : index
    %c0_53 = arith.constant 0 : index
    %c0_54 = arith.constant 0 : index
    %60 = vector.load %arg6[%c2_52, %c0_53, %c0_54] : memref<3x90x208xbf16, #tpu.memory_space<vmem>>, vector<1x90x208xbf16>
    %61 = vector.shape_cast %60 : vector<1x90x208xbf16> to vector<90x208xbf16>
    %cst_55 = arith.constant dense<0.000000e+00> : vector<12x208xf32>
    %62 = tpu.matmul %59, %61, %cst_55 {dimension_numbers = #tpu.dot_dimension_numbers<[1], [0], [0], [1], [0, 0, 1, 1], [], []>} : vector<12x90xbf16>, vector<90x208xbf16>, vector<12x208xf32> -> vector<12x208xf32>
    %63 = arith.addf %57, %62 : vector<12x208xf32>
    %64 = vector.broadcast %17 : vector<1x208xf32> to vector<12x208xf32>
    %65 = arith.addf %63, %64 : vector<12x208xf32>
    %cst_56 = arith.constant 0.000000e+00 : f32
    %66 = vector.broadcast %cst_56 : f32 to vector<12x208xf32>
    %67 = arith.maximumf %65, %66 : vector<12x208xf32>
    %68 = arith.truncf %67 : vector<12x208xf32> to vector<12x208xbf16>
    %cst_57 = arith.constant dense<0.000000e+00> : vector<6x208xf32>
    %69 = tpu.matmul %9, %68, %cst_57 {dimension_numbers = #tpu.dot_dimension_numbers<[1], [0], [0], [1], [0, 0, 1, 1], [], []>} : vector<6x12xbf16>, vector<12x208xbf16>, vector<6x208xf32> -> vector<6x208xf32>
    %cst_58 = arith.constant dense<0.000000e+00> : vector<6x208xf32>
    %70 = tpu.matmul %11, %68, %cst_58 {dimension_numbers = #tpu.dot_dimension_numbers<[1], [0], [0], [1], [0, 0, 1, 1], [], []>} : vector<6x12xbf16>, vector<12x208xbf16>, vector<6x208xf32> -> vector<6x208xf32>
    %71 = arith.maximumf %69, %70 : vector<6x208xf32>
    %72 = arith.truncf %71 : vector<6x208xf32> to vector<6x208xbf16>
    %cst_59 = arith.constant dense<0.000000e+00> : vector<6x96xf32>
    %73 = tpu.matmul %72, %13, %cst_59 {dimension_numbers = #tpu.dot_dimension_numbers<[1], [0], [0], [1], [0, 0, 1, 1], [], []>} : vector<6x208xbf16>, vector<208x96xbf16>, vector<6x96xf32> -> vector<6x96xf32>
    %cst_60 = arith.constant dense<0.000000e+00> : vector<6x96xf32>
    %74 = tpu.matmul %72, %15, %cst_60 {dimension_numbers = #tpu.dot_dimension_numbers<[1], [0], [0], [1], [0, 0, 1, 1], [], []>} : vector<6x208xbf16>, vector<208x96xbf16>, vector<6x96xf32> -> vector<6x96xf32>
    %75 = arith.maximumf %73, %74 : vector<6x96xf32>
    %76 = vector.extract_strided_slice %75 {offsets = [0, 0], sizes = [1, 96], strides = [1, 1]} : vector<6x96xf32> to vector<1x96xf32>
    %77 = vector.shape_cast %76 : vector<1x96xf32> to vector<96xf32>
    %c0_61 = arith.constant 0 : index
    %c0_62 = arith.constant 0 : index
    %c0_63 = arith.constant 0 : index
    %78 = vector.load %arg17[%c0_61, %c0_62, %c0_63] : memref<6x2x96xf32, #tpu.memory_space<vmem>>, vector<1x1x96xf32>
    %79 = vector.shape_cast %78 : vector<1x1x96xf32> to vector<96xf32>
    %80 = vector.shape_cast %77 : vector<96xf32> to vector<1x1x96xf32>
    tpu.vector_store %arg17[%c0_61, %c0_62, %c0_63], %80 {strides = array<i32>} : memref<6x2x96xf32, #tpu.memory_space<vmem>>, vector<1x1x96xf32>,
    %81 = vector.extract_strided_slice %75 {offsets = [1, 0], sizes = [1, 96], strides = [1, 1]} : vector<6x96xf32> to vector<1x96xf32>
    %82 = vector.shape_cast %81 : vector<1x96xf32> to vector<96xf32>
    %c1_64 = arith.constant 1 : index
    %c0_65 = arith.constant 0 : index
    %c0_66 = arith.constant 0 : index
    %83 = vector.load %arg17[%c1_64, %c0_65, %c0_66] : memref<6x2x96xf32, #tpu.memory_space<vmem>>, vector<1x1x96xf32>
    %84 = vector.shape_cast %83 : vector<1x1x96xf32> to vector<96xf32>
    %85 = vector.shape_cast %82 : vector<96xf32> to vector<1x1x96xf32>
    tpu.vector_store %arg17[%c1_64, %c0_65, %c0_66], %85 {strides = array<i32>} : memref<6x2x96xf32, #tpu.memory_space<vmem>>, vector<1x1x96xf32>,
    %86 = vector.extract_strided_slice %75 {offsets = [2, 0], sizes = [1, 96], strides = [1, 1]} : vector<6x96xf32> to vector<1x96xf32>
    %87 = vector.shape_cast %86 : vector<1x96xf32> to vector<96xf32>
    %c2_67 = arith.constant 2 : index
    %c0_68 = arith.constant 0 : index
    %c0_69 = arith.constant 0 : index
    %88 = vector.load %arg17[%c2_67, %c0_68, %c0_69] : memref<6x2x96xf32, #tpu.memory_space<vmem>>, vector<1x1x96xf32>
    %89 = vector.shape_cast %88 : vector<1x1x96xf32> to vector<96xf32>
    %90 = vector.shape_cast %87 : vector<96xf32> to vector<1x1x96xf32>
    tpu.vector_store %arg17[%c2_67, %c0_68, %c0_69], %90 {strides = array<i32>} : memref<6x2x96xf32, #tpu.memory_space<vmem>>, vector<1x1x96xf32>,
    %91 = vector.extract_strided_slice %75 {offsets = [3, 0], sizes = [1, 96], strides = [1, 1]} : vector<6x96xf32> to vector<1x96xf32>
    %92 = vector.shape_cast %91 : vector<1x96xf32> to vector<96xf32>
    %c3 = arith.constant 3 : index
    %c0_70 = arith.constant 0 : index
    %c0_71 = arith.constant 0 : index
    %93 = vector.load %arg17[%c3, %c0_70, %c0_71] : memref<6x2x96xf32, #tpu.memory_space<vmem>>, vector<1x1x96xf32>
    %94 = vector.shape_cast %93 : vector<1x1x96xf32> to vector<96xf32>
    %95 = vector.shape_cast %92 : vector<96xf32> to vector<1x1x96xf32>
    tpu.vector_store %arg17[%c3, %c0_70, %c0_71], %95 {strides = array<i32>} : memref<6x2x96xf32, #tpu.memory_space<vmem>>, vector<1x1x96xf32>,
    %96 = vector.extract_strided_slice %75 {offsets = [4, 0], sizes = [1, 96], strides = [1, 1]} : vector<6x96xf32> to vector<1x96xf32>
    %97 = vector.shape_cast %96 : vector<1x96xf32> to vector<96xf32>
    %c4 = arith.constant 4 : index
    %c0_72 = arith.constant 0 : index
    %c0_73 = arith.constant 0 : index
    %98 = vector.load %arg17[%c4, %c0_72, %c0_73] : memref<6x2x96xf32, #tpu.memory_space<vmem>>, vector<1x1x96xf32>
    %99 = vector.shape_cast %98 : vector<1x1x96xf32> to vector<96xf32>
    %100 = vector.shape_cast %97 : vector<96xf32> to vector<1x1x96xf32>
    tpu.vector_store %arg17[%c4, %c0_72, %c0_73], %100 {strides = array<i32>} : memref<6x2x96xf32, #tpu.memory_space<vmem>>, vector<1x1x96xf32>,
    %101 = vector.extract_strided_slice %75 {offsets = [5, 0], sizes = [1, 96], strides = [1, 1]} : vector<6x96xf32> to vector<1x96xf32>
    %102 = vector.shape_cast %101 : vector<1x96xf32> to vector<96xf32>
    %c5 = arith.constant 5 : index
    %c0_74 = arith.constant 0 : index
    %c0_75 = arith.constant 0 : index
    %103 = vector.load %arg17[%c5, %c0_74, %c0_75] : memref<6x2x96xf32, #tpu.memory_space<vmem>>, vector<1x1x96xf32>
    %104 = vector.shape_cast %103 : vector<1x1x96xf32> to vector<96xf32>
    %105 = vector.shape_cast %102 : vector<96xf32> to vector<1x1x96xf32>
    tpu.vector_store %arg17[%c5, %c0_74, %c0_75], %105 {strides = array<i32>} : memref<6x2x96xf32, #tpu.memory_space<vmem>>, vector<1x1x96xf32>,
    %c1_76 = arith.constant 1 : index
    %c0_77 = arith.constant 0 : index
    %c0_78 = arith.constant 0 : index
    %106 = vector.load %arg1[%c1_76, %c0_77, %c0_78] : memref<2x32x32xf32, #tpu.memory_space<vmem>>, vector<1x32x32xf32>
    %107 = vector.shape_cast %106 : vector<1x32x32xf32> to vector<32x32xf32>
    %108 = arith.truncf %107 : vector<32x32xf32> to vector<32x32xbf16>
    %c0_79 = arith.constant 0 : index
    %c0_80 = arith.constant 0 : index
    %c0_81 = arith.constant 0 : index
    %109 = vector.load %arg2[%c0_79, %c0_80, %c0_81] : memref<3x32x180xbf16, #tpu.memory_space<vmem>>, vector<1x32x180xbf16>
    %110 = vector.shape_cast %109 : vector<1x32x180xbf16> to vector<32x180xbf16>
    %cst_82 = arith.constant dense<0.000000e+00> : vector<32x180xf32>
    %111 = tpu.matmul %108, %110, %cst_82 {dimension_numbers = #tpu.dot_dimension_numbers<[1], [0], [0], [1], [0, 0, 1, 1], [], []>} : vector<32x32xbf16>, vector<32x180xbf16>, vector<32x180xf32> -> vector<32x180xf32>
    %c1_83 = arith.constant 1 : index
    %c0_84 = arith.constant 0 : index
    %c0_85 = arith.constant 0 : index
    %112 = vector.load %arg2[%c1_83, %c0_84, %c0_85] : memref<3x32x180xbf16, #tpu.memory_space<vmem>>, vector<1x32x180xbf16>
    %113 = vector.shape_cast %112 : vector<1x32x180xbf16> to vector<32x180xbf16>
    %cst_86 = arith.constant dense<0.000000e+00> : vector<32x180xf32>
    %114 = tpu.matmul %108, %113, %cst_86 {dimension_numbers = #tpu.dot_dimension_numbers<[1], [0], [0], [1], [0, 0, 1, 1], [], []>} : vector<32x32xbf16>, vector<32x180xbf16>, vector<32x180xf32> -> vector<32x180xf32>
    %c2_87 = arith.constant 2 : index
    %c0_88 = arith.constant 0 : index
    %c0_89 = arith.constant 0 : index
    %115 = vector.load %arg2[%c2_87, %c0_88, %c0_89] : memref<3x32x180xbf16, #tpu.memory_space<vmem>>, vector<1x32x180xbf16>
    %116 = vector.shape_cast %115 : vector<1x32x180xbf16> to vector<32x180xbf16>
    %cst_90 = arith.constant dense<0.000000e+00> : vector<32x180xf32>
    %117 = tpu.matmul %108, %116, %cst_90 {dimension_numbers = #tpu.dot_dimension_numbers<[1], [0], [0], [1], [0, 0, 1, 1], [], []>} : vector<32x32xbf16>, vector<32x180xbf16>, vector<32x180xf32> -> vector<32x180xf32>
    %118 = vector.extract_strided_slice %111 {offsets = [0, 0], sizes = [30, 180], strides = [1, 1]} : vector<32x180xf32> to vector<30x180xf32>
    %119 = vector.extract_strided_slice %114 {offsets = [1, 0], sizes = [30, 180], strides = [1, 1]} : vector<32x180xf32> to vector<30x180xf32>
    %120 = arith.addf %118, %119 : vector<30x180xf32>
    %121 = vector.extract_strided_slice %117 {offsets = [2, 0], sizes = [30, 180], strides = [1, 1]} : vector<32x180xf32> to vector<30x180xf32>
    %122 = arith.addf %120, %121 : vector<30x180xf32>
    %123 = vector.broadcast %16 : vector<1x180xf32> to vector<30x180xf32>
    %124 = arith.addf %122, %123 : vector<30x180xf32>
    %cst_91 = arith.constant 0.000000e+00 : f32
    %125 = vector.broadcast %cst_91 : f32 to vector<30x180xf32>
    %126 = arith.maximumf %124, %125 : vector<30x180xf32>
    %127 = arith.truncf %126 : vector<30x180xf32> to vector<30x180xbf16>
    %cst_92 = arith.constant dense<0.000000e+00> : vector<15x180xf32>
    %128 = tpu.matmul %1, %127, %cst_92 {dimension_numbers = #tpu.dot_dimension_numbers<[1], [0], [0], [1], [0, 0, 1, 1], [], []>} : vector<15x30xbf16>, vector<30x180xbf16>, vector<15x180xf32> -> vector<15x180xf32>
    %cst_93 = arith.constant dense<0.000000e+00> : vector<15x180xf32>
    %129 = tpu.matmul %3, %127, %cst_93 {dimension_numbers = #tpu.dot_dimension_numbers<[1], [0], [0], [1], [0, 0, 1, 1], [], []>} : vector<15x30xbf16>, vector<30x180xbf16>, vector<15x180xf32> -> vector<15x180xf32>
    %130 = arith.maximumf %128, %129 : vector<15x180xf32>
    %131 = arith.truncf %130 : vector<15x180xf32> to vector<15x180xbf16>
    %cst_94 = arith.constant dense<0.000000e+00> : vector<15x90xf32>
    %132 = tpu.matmul %131, %5, %cst_94 {dimension_numbers = #tpu.dot_dimension_numbers<[1], [0], [0], [1], [0, 0, 1, 1], [], []>} : vector<15x180xbf16>, vector<180x90xbf16>, vector<15x90xf32> -> vector<15x90xf32>
    %cst_95 = arith.constant dense<0.000000e+00> : vector<15x90xf32>
    %133 = tpu.matmul %131, %7, %cst_95 {dimension_numbers = #tpu.dot_dimension_numbers<[1], [0], [0], [1], [0, 0, 1, 1], [], []>} : vector<15x180xbf16>, vector<180x90xbf16>, vector<15x90xf32> -> vector<15x90xf32>
    %134 = arith.maximumf %132, %133 : vector<15x90xf32>
    %135 = vector.extract_strided_slice %134 {offsets = [0, 0], sizes = [12, 90], strides = [1, 1]} : vector<15x90xf32> to vector<12x90xf32>
    %136 = arith.truncf %135 : vector<12x90xf32> to vector<12x90xbf16>
    %c0_96 = arith.constant 0 : index
    %c0_97 = arith.constant 0 : index
    %c0_98 = arith.constant 0 : index
    %137 = vector.load %arg6[%c0_96, %c0_97, %c0_98] : memref<3x90x208xbf16, #tpu.memory_space<vmem>>, vector<1x90x208xbf16>
    %138 = vector.shape_cast %137 : vector<1x90x208xbf16> to vector<90x208xbf16>
    %cst_99 = arith.constant dense<0.000000e+00> : vector<12x208xf32>
    %139 = tpu.matmul %136, %138, %cst_99 {dimension_numbers = #tpu.dot_dimension_numbers<[1], [0], [0], [1], [0, 0, 1, 1], [], []>} : vector<12x90xbf16>, vector<90x208xbf16>, vector<12x208xf32> -> vector<12x208xf32>
    %140 = vector.extract_strided_slice %134 {offsets = [1, 0], sizes = [12, 90], strides = [1, 1]} : vector<15x90xf32> to vector<12x90xf32>
    %141 = arith.truncf %140 : vector<12x90xf32> to vector<12x90xbf16>
    %c1_100 = arith.constant 1 : index
    %c0_101 = arith.constant 0 : index
    %c0_102 = arith.constant 0 : index
    %142 = vector.load %arg6[%c1_100, %c0_101, %c0_102] : memref<3x90x208xbf16, #tpu.memory_space<vmem>>, vector<1x90x208xbf16>
    %143 = vector.shape_cast %142 : vector<1x90x208xbf16> to vector<90x208xbf16>
    %cst_103 = arith.constant dense<0.000000e+00> : vector<12x208xf32>
    %144 = tpu.matmul %141, %143, %cst_103 {dimension_numbers = #tpu.dot_dimension_numbers<[1], [0], [0], [1], [0, 0, 1, 1], [], []>} : vector<12x90xbf16>, vector<90x208xbf16>, vector<12x208xf32> -> vector<12x208xf32>
    %145 = arith.addf %139, %144 : vector<12x208xf32>
    %146 = vector.extract_strided_slice %134 {offsets = [2, 0], sizes = [12, 90], strides = [1, 1]} : vector<15x90xf32> to vector<12x90xf32>
    %147 = arith.truncf %146 : vector<12x90xf32> to vector<12x90xbf16>
    %c2_104 = arith.constant 2 : index
    %c0_105 = arith.constant 0 : index
    %c0_106 = arith.constant 0 : index
    %148 = vector.load %arg6[%c2_104, %c0_105, %c0_106] : memref<3x90x208xbf16, #tpu.memory_space<vmem>>, vector<1x90x208xbf16>
    %149 = vector.shape_cast %148 : vector<1x90x208xbf16> to vector<90x208xbf16>
    %cst_107 = arith.constant dense<0.000000e+00> : vector<12x208xf32>
    %150 = tpu.matmul %147, %149, %cst_107 {dimension_numbers = #tpu.dot_dimension_numbers<[1], [0], [0], [1], [0, 0, 1, 1], [], []>} : vector<12x90xbf16>, vector<90x208xbf16>, vector<12x208xf32> -> vector<12x208xf32>
    %151 = arith.addf %145, %150 : vector<12x208xf32>
    %152 = vector.broadcast %17 : vector<1x208xf32> to vector<12x208xf32>
    %153 = arith.addf %151, %152 : vector<12x208xf32>
    %cst_108 = arith.constant 0.000000e+00 : f32
    %154 = vector.broadcast %cst_108 : f32 to vector<12x208xf32>
    %155 = arith.maximumf %153, %154 : vector<12x208xf32>
    %156 = arith.truncf %155 : vector<12x208xf32> to vector<12x208xbf16>
    %cst_109 = arith.constant dense<0.000000e+00> : vector<6x208xf32>
    %157 = tpu.matmul %9, %156, %cst_109 {dimension_numbers = #tpu.dot_dimension_numbers<[1], [0], [0], [1], [0, 0, 1, 1], [], []>} : vector<6x12xbf16>, vector<12x208xbf16>, vector<6x208xf32> -> vector<6x208xf32>
    %cst_110 = arith.constant dense<0.000000e+00> : vector<6x208xf32>
    %158 = tpu.matmul %11, %156, %cst_110 {dimension_numbers = #tpu.dot_dimension_numbers<[1], [0], [0], [1], [0, 0, 1, 1], [], []>} : vector<6x12xbf16>, vector<12x208xbf16>, vector<6x208xf32> -> vector<6x208xf32>
    %159 = arith.maximumf %157, %158 : vector<6x208xf32>
    %160 = arith.truncf %159 : vector<6x208xf32> to vector<6x208xbf16>
    %cst_111 = arith.constant dense<0.000000e+00> : vector<6x96xf32>
    %161 = tpu.matmul %160, %13, %cst_111 {dimension_numbers = #tpu.dot_dimension_numbers<[1], [0], [0], [1], [0, 0, 1, 1], [], []>} : vector<6x208xbf16>, vector<208x96xbf16>, vector<6x96xf32> -> vector<6x96xf32>
    %cst_112 = arith.constant dense<0.000000e+00> : vector<6x96xf32>
    %162 = tpu.matmul %160, %15, %cst_112 {dimension_numbers = #tpu.dot_dimension_numbers<[1], [0], [0], [1], [0, 0, 1, 1], [], []>} : vector<6x208xbf16>, vector<208x96xbf16>, vector<6x96xf32> -> vector<6x96xf32>
    %163 = arith.maximumf %161, %162 : vector<6x96xf32>
    %164 = vector.extract_strided_slice %163 {offsets = [0, 0], sizes = [1, 96], strides = [1, 1]} : vector<6x96xf32> to vector<1x96xf32>
    %165 = vector.shape_cast %164 : vector<1x96xf32> to vector<96xf32>
    %c0_113 = arith.constant 0 : index
    %c1_114 = arith.constant 1 : index
    %c0_115 = arith.constant 0 : index
    %166 = vector.load %arg17[%c0_113, %c1_114, %c0_115] : memref<6x2x96xf32, #tpu.memory_space<vmem>>, vector<1x1x96xf32>
    %167 = vector.shape_cast %166 : vector<1x1x96xf32> to vector<96xf32>
    %168 = vector.shape_cast %165 : vector<96xf32> to vector<1x1x96xf32>
    tpu.vector_store %arg17[%c0_113, %c1_114, %c0_115], %168 {strides = array<i32>} : memref<6x2x96xf32, #tpu.memory_space<vmem>>, vector<1x1x96xf32>,
    %169 = vector.extract_strided_slice %163 {offsets = [1, 0], sizes = [1, 96], strides = [1, 1]} : vector<6x96xf32> to vector<1x96xf32>
    %170 = vector.shape_cast %169 : vector<1x96xf32> to vector<96xf32>
    %c1_116 = arith.constant 1 : index
    %c1_117 = arith.constant 1 : index
    %c0_118 = arith.constant 0 : index
    %171 = vector.load %arg17[%c1_116, %c1_117, %c0_118] : memref<6x2x96xf32, #tpu.memory_space<vmem>>, vector<1x1x96xf32>
    %172 = vector.shape_cast %171 : vector<1x1x96xf32> to vector<96xf32>
    %173 = vector.shape_cast %170 : vector<96xf32> to vector<1x1x96xf32>
    tpu.vector_store %arg17[%c1_116, %c1_117, %c0_118], %173 {strides = array<i32>} : memref<6x2x96xf32, #tpu.memory_space<vmem>>, vector<1x1x96xf32>,
    %174 = vector.extract_strided_slice %163 {offsets = [2, 0], sizes = [1, 96], strides = [1, 1]} : vector<6x96xf32> to vector<1x96xf32>
    %175 = vector.shape_cast %174 : vector<1x96xf32> to vector<96xf32>
    %c2_119 = arith.constant 2 : index
    %c1_120 = arith.constant 1 : index
    %c0_121 = arith.constant 0 : index
    %176 = vector.load %arg17[%c2_119, %c1_120, %c0_121] : memref<6x2x96xf32, #tpu.memory_space<vmem>>, vector<1x1x96xf32>
    %177 = vector.shape_cast %176 : vector<1x1x96xf32> to vector<96xf32>
    %178 = vector.shape_cast %175 : vector<96xf32> to vector<1x1x96xf32>
    tpu.vector_store %arg17[%c2_119, %c1_120, %c0_121], %178 {strides = array<i32>} : memref<6x2x96xf32, #tpu.memory_space<vmem>>, vector<1x1x96xf32>,
    %179 = vector.extract_strided_slice %163 {offsets = [3, 0], sizes = [1, 96], strides = [1, 1]} : vector<6x96xf32> to vector<1x96xf32>
    %180 = vector.shape_cast %179 : vector<1x96xf32> to vector<96xf32>
    %c3_122 = arith.constant 3 : index
    %c1_123 = arith.constant 1 : index
    %c0_124 = arith.constant 0 : index
    %181 = vector.load %arg17[%c3_122, %c1_123, %c0_124] : memref<6x2x96xf32, #tpu.memory_space<vmem>>, vector<1x1x96xf32>
    %182 = vector.shape_cast %181 : vector<1x1x96xf32> to vector<96xf32>
    %183 = vector.shape_cast %180 : vector<96xf32> to vector<1x1x96xf32>
    tpu.vector_store %arg17[%c3_122, %c1_123, %c0_124], %183 {strides = array<i32>} : memref<6x2x96xf32, #tpu.memory_space<vmem>>, vector<1x1x96xf32>,
    %184 = vector.extract_strided_slice %163 {offsets = [4, 0], sizes = [1, 96], strides = [1, 1]} : vector<6x96xf32> to vector<1x96xf32>
    %185 = vector.shape_cast %184 : vector<1x96xf32> to vector<96xf32>
    %c4_125 = arith.constant 4 : index
    %c1_126 = arith.constant 1 : index
    %c0_127 = arith.constant 0 : index
    %186 = vector.load %arg17[%c4_125, %c1_126, %c0_127] : memref<6x2x96xf32, #tpu.memory_space<vmem>>, vector<1x1x96xf32>
    %187 = vector.shape_cast %186 : vector<1x1x96xf32> to vector<96xf32>
    %188 = vector.shape_cast %185 : vector<96xf32> to vector<1x1x96xf32>
    tpu.vector_store %arg17[%c4_125, %c1_126, %c0_127], %188 {strides = array<i32>} : memref<6x2x96xf32, #tpu.memory_space<vmem>>, vector<1x1x96xf32>,
    %189 = vector.extract_strided_slice %163 {offsets = [5, 0], sizes = [1, 96], strides = [1, 1]} : vector<6x96xf32> to vector<1x96xf32>
    %190 = vector.shape_cast %189 : vector<1x96xf32> to vector<96xf32>
    %c5_128 = arith.constant 5 : index
    %c1_129 = arith.constant 1 : index
    %c0_130 = arith.constant 0 : index
    %191 = vector.load %arg17[%c5_128, %c1_129, %c0_130] : memref<6x2x96xf32, #tpu.memory_space<vmem>>, vector<1x1x96xf32>
    %192 = vector.shape_cast %191 : vector<1x1x96xf32> to vector<96xf32>
    %193 = vector.shape_cast %190 : vector<96xf32> to vector<1x1x96xf32>
    tpu.vector_store %arg17[%c5_128, %c1_129, %c0_130], %193 {strides = array<i32>} : memref<6x2x96xf32, #tpu.memory_space<vmem>>, vector<1x1x96xf32>,
    %c0_131 = arith.constant 0 : index
    %c0_132 = arith.constant 0 : index
    %c0_133 = arith.constant 0 : index
    %194 = vector.load %arg17[%c0_131, %c0_132, %c0_133] : memref<6x2x96xf32, #tpu.memory_space<vmem>>, vector<1x2x96xf32>
    %195 = vector.shape_cast %194 : vector<1x2x96xf32> to vector<2x96xf32>
    %196 = arith.truncf %195 : vector<2x96xf32> to vector<2x96xbf16>
    %c0_134 = arith.constant 0 : index
    %c0_135 = arith.constant 0 : index
    %c0_136 = arith.constant 0 : index
    %197 = vector.load %arg10[%c0_134, %c0_135, %c0_136] : memref<6x96x128xbf16, #tpu.memory_space<vmem>>, vector<1x96x128xbf16>
    %198 = vector.shape_cast %197 : vector<1x96x128xbf16> to vector<96x128xbf16>
    %cst_137 = arith.constant dense<0.000000e+00> : vector<2x128xf32>
    %199 = tpu.matmul %196, %198, %cst_137 {dimension_numbers = #tpu.dot_dimension_numbers<[1], [0], [0], [1], [0, 0, 1, 1], [], []>} : vector<2x96xbf16>, vector<96x128xbf16>, vector<2x128xf32> -> vector<2x128xf32>
    %c1_138 = arith.constant 1 : index
    %c0_139 = arith.constant 0 : index
    %c0_140 = arith.constant 0 : index
    %200 = vector.load %arg17[%c1_138, %c0_139, %c0_140] : memref<6x2x96xf32, #tpu.memory_space<vmem>>, vector<1x2x96xf32>
    %201 = vector.shape_cast %200 : vector<1x2x96xf32> to vector<2x96xf32>
    %202 = arith.truncf %201 : vector<2x96xf32> to vector<2x96xbf16>
    %c1_141 = arith.constant 1 : index
    %c0_142 = arith.constant 0 : index
    %c0_143 = arith.constant 0 : index
    %203 = vector.load %arg10[%c1_141, %c0_142, %c0_143] : memref<6x96x128xbf16, #tpu.memory_space<vmem>>, vector<1x96x128xbf16>
    %204 = vector.shape_cast %203 : vector<1x96x128xbf16> to vector<96x128xbf16>
    %cst_144 = arith.constant dense<0.000000e+00> : vector<2x128xf32>
    %205 = tpu.matmul %202, %204, %cst_144 {dimension_numbers = #tpu.dot_dimension_numbers<[1], [0], [0], [1], [0, 0, 1, 1], [], []>} : vector<2x96xbf16>, vector<96x128xbf16>, vector<2x128xf32> -> vector<2x128xf32>
    %206 = arith.addf %199, %205 : vector<2x128xf32>
    %c2_145 = arith.constant 2 : index
    %c0_146 = arith.constant 0 : index
    %c0_147 = arith.constant 0 : index
    %207 = vector.load %arg17[%c2_145, %c0_146, %c0_147] : memref<6x2x96xf32, #tpu.memory_space<vmem>>, vector<1x2x96xf32>
    %208 = vector.shape_cast %207 : vector<1x2x96xf32> to vector<2x96xf32>
    %209 = arith.truncf %208 : vector<2x96xf32> to vector<2x96xbf16>
    %c2_148 = arith.constant 2 : index
    %c0_149 = arith.constant 0 : index
    %c0_150 = arith.constant 0 : index
    %210 = vector.load %arg10[%c2_148, %c0_149, %c0_150] : memref<6x96x128xbf16, #tpu.memory_space<vmem>>, vector<1x96x128xbf16>
    %211 = vector.shape_cast %210 : vector<1x96x128xbf16> to vector<96x128xbf16>
    %cst_151 = arith.constant dense<0.000000e+00> : vector<2x128xf32>
    %212 = tpu.matmul %209, %211, %cst_151 {dimension_numbers = #tpu.dot_dimension_numbers<[1], [0], [0], [1], [0, 0, 1, 1], [], []>} : vector<2x96xbf16>, vector<96x128xbf16>, vector<2x128xf32> -> vector<2x128xf32>
    %213 = arith.addf %206, %212 : vector<2x128xf32>
    %c3_152 = arith.constant 3 : index
    %c0_153 = arith.constant 0 : index
    %c0_154 = arith.constant 0 : index
    %214 = vector.load %arg17[%c3_152, %c0_153, %c0_154] : memref<6x2x96xf32, #tpu.memory_space<vmem>>, vector<1x2x96xf32>
    %215 = vector.shape_cast %214 : vector<1x2x96xf32> to vector<2x96xf32>
    %216 = arith.truncf %215 : vector<2x96xf32> to vector<2x96xbf16>
    %c3_155 = arith.constant 3 : index
    %c0_156 = arith.constant 0 : index
    %c0_157 = arith.constant 0 : index
    %217 = vector.load %arg10[%c3_155, %c0_156, %c0_157] : memref<6x96x128xbf16, #tpu.memory_space<vmem>>, vector<1x96x128xbf16>
    %218 = vector.shape_cast %217 : vector<1x96x128xbf16> to vector<96x128xbf16>
    %cst_158 = arith.constant dense<0.000000e+00> : vector<2x128xf32>
    %219 = tpu.matmul %216, %218, %cst_158 {dimension_numbers = #tpu.dot_dimension_numbers<[1], [0], [0], [1], [0, 0, 1, 1], [], []>} : vector<2x96xbf16>, vector<96x128xbf16>, vector<2x128xf32> -> vector<2x128xf32>
    %220 = arith.addf %213, %219 : vector<2x128xf32>
    %c4_159 = arith.constant 4 : index
    %c0_160 = arith.constant 0 : index
    %c0_161 = arith.constant 0 : index
    %221 = vector.load %arg17[%c4_159, %c0_160, %c0_161] : memref<6x2x96xf32, #tpu.memory_space<vmem>>, vector<1x2x96xf32>
    %222 = vector.shape_cast %221 : vector<1x2x96xf32> to vector<2x96xf32>
    %223 = arith.truncf %222 : vector<2x96xf32> to vector<2x96xbf16>
    %c4_162 = arith.constant 4 : index
    %c0_163 = arith.constant 0 : index
    %c0_164 = arith.constant 0 : index
    %224 = vector.load %arg10[%c4_162, %c0_163, %c0_164] : memref<6x96x128xbf16, #tpu.memory_space<vmem>>, vector<1x96x128xbf16>
    %225 = vector.shape_cast %224 : vector<1x96x128xbf16> to vector<96x128xbf16>
    %cst_165 = arith.constant dense<0.000000e+00> : vector<2x128xf32>
    %226 = tpu.matmul %223, %225, %cst_165 {dimension_numbers = #tpu.dot_dimension_numbers<[1], [0], [0], [1], [0, 0, 1, 1], [], []>} : vector<2x96xbf16>, vector<96x128xbf16>, vector<2x128xf32> -> vector<2x128xf32>
    %227 = arith.addf %220, %226 : vector<2x128xf32>
    %c5_166 = arith.constant 5 : index
    %c0_167 = arith.constant 0 : index
    %c0_168 = arith.constant 0 : index
    %228 = vector.load %arg17[%c5_166, %c0_167, %c0_168] : memref<6x2x96xf32, #tpu.memory_space<vmem>>, vector<1x2x96xf32>
    %229 = vector.shape_cast %228 : vector<1x2x96xf32> to vector<2x96xf32>
    %230 = arith.truncf %229 : vector<2x96xf32> to vector<2x96xbf16>
    %c5_169 = arith.constant 5 : index
    %c0_170 = arith.constant 0 : index
    %c0_171 = arith.constant 0 : index
    %231 = vector.load %arg10[%c5_169, %c0_170, %c0_171] : memref<6x96x128xbf16, #tpu.memory_space<vmem>>, vector<1x96x128xbf16>
    %232 = vector.shape_cast %231 : vector<1x96x128xbf16> to vector<96x128xbf16>
    %cst_172 = arith.constant dense<0.000000e+00> : vector<2x128xf32>
    %233 = tpu.matmul %230, %232, %cst_172 {dimension_numbers = #tpu.dot_dimension_numbers<[1], [0], [0], [1], [0, 0, 1, 1], [], []>} : vector<2x96xbf16>, vector<96x128xbf16>, vector<2x128xf32> -> vector<2x128xf32>
    %234 = arith.addf %227, %233 : vector<2x128xf32>
    %c0_173 = arith.constant 0 : index
    %c0_174 = arith.constant 0 : index
    %235 = vector.load %arg11[%c0_173, %c0_174] : memref<1x128xf32, #tpu.memory_space<vmem>>, vector<1x128xf32>
    %236 = vector.broadcast %235 : vector<1x128xf32> to vector<2x128xf32>
    %237 = arith.addf %234, %236 : vector<2x128xf32>
    %cst_175 = arith.constant 0.000000e+00 : f32
    %238 = vector.broadcast %cst_175 : f32 to vector<2x128xf32>
    %239 = arith.maximumf %237, %238 : vector<2x128xf32>
    %240 = arith.truncf %239 : vector<2x128xf32> to vector<2x128xbf16>
    %c0_176 = arith.constant 0 : index
    %c0_177 = arith.constant 0 : index
    %241 = vector.load %arg12[%c0_176, %c0_177] : memref<128x128xbf16, #tpu.memory_space<vmem>>, vector<128x128xbf16>
    %cst_178 = arith.constant dense<0.000000e+00> : vector<2x128xf32>
    %242 = tpu.matmul %240, %241, %cst_178 {dimension_numbers = #tpu.dot_dimension_numbers<[1], [0], [0], [1], [0, 0, 1, 1], [], []>} : vector<2x128xbf16>, vector<128x128xbf16>, vector<2x128xf32> -> vector<2x128xf32>
    %c0_179 = arith.constant 0 : index
    %c0_180 = arith.constant 0 : index
    %243 = vector.load %arg13[%c0_179, %c0_180] : memref<1x128xf32, #tpu.memory_space<vmem>>, vector<1x128xf32>
    %244 = vector.broadcast %243 : vector<1x128xf32> to vector<2x128xf32>
    %245 = arith.addf %242, %244 : vector<2x128xf32>
    %cst_181 = arith.constant 0.000000e+00 : f32
    %246 = vector.broadcast %cst_181 : f32 to vector<2x128xf32>
    %247 = arith.maximumf %245, %246 : vector<2x128xf32>
    %248 = arith.truncf %247 : vector<2x128xf32> to vector<2x128xbf16>
    %c0_182 = arith.constant 0 : index
    %c0_183 = arith.constant 0 : index
    %249 = vector.load %arg14[%c0_182, %c0_183] : memref<128x128xbf16, #tpu.memory_space<vmem>>, vector<128x128xbf16>
    %cst_184 = arith.constant dense<0.000000e+00> : vector<2x128xf32>
    %250 = tpu.matmul %248, %249, %cst_184 {dimension_numbers = #tpu.dot_dimension_numbers<[1], [0], [0], [1], [0, 0, 1, 1], [], []>} : vector<2x128xbf16>, vector<128x128xbf16>, vector<2x128xf32> -> vector<2x128xf32>
    %c0_185 = arith.constant 0 : index
    %c0_186 = arith.constant 0 : index
    %251 = vector.load %arg15[%c0_185, %c0_186] : memref<1x128xf32, #tpu.memory_space<vmem>>, vector<1x128xf32>
    %252 = vector.broadcast %251 : vector<1x128xf32> to vector<2x128xf32>
    %253 = arith.addf %250, %252 : vector<2x128xf32>
    %c0_187 = arith.constant 0 : index
    %c0_188 = arith.constant 0 : index
    %254 = vector.load %arg16[%c0_187, %c0_188] : memref<2x128xf32, #tpu.memory_space<vmem>>, vector<2x128xf32>
    tpu.vector_store %arg16[%c0_187, %c0_188], %253 {strides = array<i32>} : memref<2x128xf32, #tpu.memory_space<vmem>>, vector<2x128xf32>,
    return
  }
  func.func @transform_0(%arg0: i32) -> (i32, i32, i32) {
    %c0_i32 = arith.constant 0 : i32
    %c0_i32_0 = arith.constant 0 : i32
    %c0_i32_1 = arith.constant 0 : i32
    return %arg0, %c0_i32, %c0_i32_0 : i32, i32, i32
  }
  func.func @transform_1(%arg0: i32) -> (i32, i32, i32) {
    %c0_i32 = arith.constant 0 : i32
    %c0_i32_0 = arith.constant 0 : i32
    %c0_i32_1 = arith.constant 0 : i32
    %c0_i32_2 = arith.constant 0 : i32
    return %c0_i32, %c0_i32_0, %c0_i32_1 : i32, i32, i32
  }
  func.func @transform_2(%arg0: i32) -> (i32, i32) {
    %c0_i32 = arith.constant 0 : i32
    %c0_i32_0 = arith.constant 0 : i32
    %c0_i32_1 = arith.constant 0 : i32
    return %c0_i32, %c0_i32_0 : i32, i32
  }
  func.func @transform_3(%arg0: i32) -> (i32, i32, i32) {
    %c0_i32 = arith.constant 0 : i32
    %c0_i32_0 = arith.constant 0 : i32
    %c0_i32_1 = arith.constant 0 : i32
    %c0_i32_2 = arith.constant 0 : i32
    return %c0_i32, %c0_i32_0, %c0_i32_1 : i32, i32, i32
  }
  func.func @transform_4(%arg0: i32) -> (i32, i32, i32) {
    %c0_i32 = arith.constant 0 : i32
    %c0_i32_0 = arith.constant 0 : i32
    %c0_i32_1 = arith.constant 0 : i32
    %c0_i32_2 = arith.constant 0 : i32
    return %c0_i32, %c0_i32_0, %c0_i32_1 : i32, i32, i32
  }
  func.func @transform_5(%arg0: i32) -> (i32, i32, i32) {
    %c0_i32 = arith.constant 0 : i32
    %c0_i32_0 = arith.constant 0 : i32
    %c0_i32_1 = arith.constant 0 : i32
    %c0_i32_2 = arith.constant 0 : i32
    return %c0_i32, %c0_i32_0, %c0_i32_1 : i32, i32, i32
  }
  func.func @transform_6(%arg0: i32) -> (i32, i32) {
    %c0_i32 = arith.constant 0 : i32
    %c0_i32_0 = arith.constant 0 : i32
    %c0_i32_1 = arith.constant 0 : i32
    return %c0_i32, %c0_i32_0 : i32, i32
  }
  func.func @transform_7(%arg0: i32) -> (i32, i32, i32) {
    %c0_i32 = arith.constant 0 : i32
    %c0_i32_0 = arith.constant 0 : i32
    %c0_i32_1 = arith.constant 0 : i32
    %c0_i32_2 = arith.constant 0 : i32
    return %c0_i32, %c0_i32_0, %c0_i32_1 : i32, i32, i32
  }
  func.func @transform_8(%arg0: i32) -> (i32, i32, i32) {
    %c0_i32 = arith.constant 0 : i32
    %c0_i32_0 = arith.constant 0 : i32
    %c0_i32_1 = arith.constant 0 : i32
    %c0_i32_2 = arith.constant 0 : i32
    return %c0_i32, %c0_i32_0, %c0_i32_1 : i32, i32, i32
  }
  func.func @transform_9(%arg0: i32) -> (i32, i32, i32) {
    %c0_i32 = arith.constant 0 : i32
    %c0_i32_0 = arith.constant 0 : i32
    %c0_i32_1 = arith.constant 0 : i32
    %c0_i32_2 = arith.constant 0 : i32
    return %c0_i32, %c0_i32_0, %c0_i32_1 : i32, i32, i32
  }
  func.func @transform_10(%arg0: i32) -> (i32, i32) {
    %c0_i32 = arith.constant 0 : i32
    %c0_i32_0 = arith.constant 0 : i32
    %c0_i32_1 = arith.constant 0 : i32
    return %c0_i32, %c0_i32_0 : i32, i32
  }
  func.func @transform_11(%arg0: i32) -> (i32, i32) {
    %c0_i32 = arith.constant 0 : i32
    %c0_i32_0 = arith.constant 0 : i32
    %c0_i32_1 = arith.constant 0 : i32
    return %c0_i32, %c0_i32_0 : i32, i32
  }
  func.func @transform_12(%arg0: i32) -> (i32, i32) {
    %c0_i32 = arith.constant 0 : i32
    %c0_i32_0 = arith.constant 0 : i32
    %c0_i32_1 = arith.constant 0 : i32
    return %c0_i32, %c0_i32_0 : i32, i32
  }
  func.func @transform_13(%arg0: i32) -> (i32, i32) {
    %c0_i32 = arith.constant 0 : i32
    %c0_i32_0 = arith.constant 0 : i32
    %c0_i32_1 = arith.constant 0 : i32
    return %c0_i32, %c0_i32_0 : i32, i32
  }
  func.func @transform_14(%arg0: i32) -> (i32, i32) {
    %c0_i32 = arith.constant 0 : i32
    %c0_i32_0 = arith.constant 0 : i32
    %c0_i32_1 = arith.constant 0 : i32
    return %c0_i32, %c0_i32_0 : i32, i32
  }
  func.func @transform_15(%arg0: i32) -> (i32, i32) {
    %c0_i32 = arith.constant 0 : i32
    %c0_i32_0 = arith.constant 0 : i32
    return %arg0, %c0_i32 : i32, i32
  }
}

</mosaic_0001>

<bundles_post_ra>
// kernel: net_forward.1
= control target key start
LH: loop header
LB: loop body
LE: loop exit
PB: predicated region body
PF: predicated region fallthrough
CT: control target
= control target key end

     0   :  { %20 = vsyncpa [#allocation4], 0  ;;  %s5792_s0 = inlined_call_operand.vmem [shape: f32[2,32,32], index: 0, kind: input, shape index: {}]   ;;  %s5793_s1 = inlined_call_operand.hbm [shape: bf16[3,32,180], index: 1, kind: input, shape index: {}]   ;;  %s5794_s2 = inlined_call_operand.vmem [shape: f32[1,180], index: 2, kind: input, shape index: {}]   ;;  %s5795_s3 = inlined_call_operand.vmem [shape: bf16[2,15,30], index: 3, kind: input, shape index: {}]   ;;  %s5796_s4 = inlined_call_operand.vmem [shape: bf16[2,180,90], index: 4, kind: input, shape index: {}]   ;;  %s5797_s5 = inlined_call_operand.vmem [shape: bf16[3,90,208], index: 5, kind: input, shape index: {}]   ;;  %s5798_s6 = inlined_call_operand.vmem [shape: f32[1,208], index: 6, kind: input, shape index: {}]   ;;  %s5799_s7 = inlined_call_operand.vmem [shape: bf16[2,6,12], index: 7, kind: input, shape index: {}]   ;;  %s5800_s8 = inlined_call_operand.vmem [shape: bf16[2,208,96], index: 8, kind: input, shape index: {}]   ;;  %s5801_s9 = inlined_call_operand.vmem [shape: bf16[6,96,128], index: 9, kind: input, shape index: {}]   ;;  %s5802_s10 = inlined_call_operand.vmem [shape: f32[1,128], index: 10, kind: input, shape index: {}]   ;;  %s5803_s11 = inlined_call_operand.hbm [shape: bf16[128,128], index: 11, kind: input, shape index: {}]   ;;  %s5804_s12 = inlined_call_operand.vmem [shape: f32[1,128], index: 12, kind: input, shape index: {}]   ;;  %s5805_s13 = inlined_call_operand.hbm [shape: bf16[128,128], index: 13, kind: input, shape index: {}]   ;;  %s5806_s14 = inlined_call_operand.vmem [shape: f32[1,128], index: 14, kind: input, shape index: {}]   ;;  %s5807_s15 = inlined_call_operand.hbm [shape: f32[2,128], index: 15, kind: output, shape index: {}]  }
   0x1   :  { %21 = vsyncpa [#allocation7], 0 }
   0x2   :  { %22 = vsyncpa [#allocation5], 0  ;;  %s4579_s18 = smov [#allocation6]   ;;  %s4485_s22 = scalar_lea.hbm %s5803_s11, 1024 }
   0x3   :  { %s60_s19 = sshll.u32 %s4579_s18, 4  ;;  %p4486_p0 = scmp.ne.s32.totalorder %s5803_s11, %s4485_s22  ;;  %s61_s19 = int_to_ptr.vmem [resolvable:$true] %s60_s19 }
   0x4   :  { %p4489_p1 = scmp.lt.u32.totalorder %s4485_s22, %s5803_s11 }
   0x6   :  { %p4491_p2 = pnand %p4489_p1, %p4486_p0 }
   0x8   :  { %4494 = shalt.err (!%p4491_p2)
}
   0x9   :  { %s4495_s27 = scalar_lea.vmem %s61_s19, 1024  ;;  %p4500_p4 = scmp.lt.s32.totalorder %s61_s19, %s61_s19 }
   0xa   :  { %p4496_p3 = scmp.ne.s32.totalorder %s61_s19, %s4495_s27  ;;  %p4501_p5 = scmp.lt.s32.totalorder %s4495_s27, %s4495_s27 }
   0xc   :  { %p4502_p6 = por %p4501_p5, %p4500_p4 }
   0xe   :  { %p4503_p7 = pnand %p4502_p6, %p4496_p3 }
  0x10   :  { %4506 = shalt.err (!%p4503_p7)
}
  0x11   :  { %s5808_s28 = smov 64   ;;  %s4581_s29 = smov 4  }
  0x12   :  { %66 = dma.hbm_to_vmem [thread:$0]  %s5803_s11, 1024, %s61_s19, [#allocation7], %s5808_s28, %s5808_s28, %s4581_s29  }
  0x13   :  { %s4582_s17 = smov [#allocation3]   ;;  %s4507_s22 = scalar_lea.hbm %s5793_s1, 1536 }
  0x14   :  { %s30_s18 = sshll.u32 %s4582_s17, 4  ;;  %p4508_p8 = scmp.ne.s32.totalorder %s5793_s1, %s4507_s22  ;;  %s31_s18 = int_to_ptr.vmem [resolvable:$true] %s30_s18 }
  0x15   :  { %p4511_p9 = scmp.lt.u32.totalorder %s4507_s22, %s5793_s1 }
  0x17   :  { %p4513_p10 = pnand %p4511_p9, %p4508_p8 }
  0x19   :  { %4516 = shalt.err (!%p4513_p10)
}
  0x1a   :  { %s4517_s27 = scalar_lea.vmem %s31_s18, 1536  ;;  %p4522_p12 = scmp.lt.s32.totalorder %s31_s18, %s31_s18 }
  0x1b   :  { %p4518_p11 = scmp.ne.s32.totalorder %s31_s18, %s4517_s27  ;;  %p4523_p13 = scmp.lt.s32.totalorder %s4517_s27, %s4517_s27 }
  0x1d   :  { %p4524_p0 = por %p4523_p13, %p4522_p12 }
  0x1f   :  { %p4525_p1 = pnand %p4524_p0, %p4518_p11 }
  0x21   :  { %4528 = shalt.err (!%p4525_p1)
}
  0x22   :  { %s4583_s11 = smov 128   ;;  %s4584_s19 = smov 8  }
  0x23   :  { %36 = dma.hbm_to_vmem [thread:$0]  %s5793_s1, 1536, %s31_s18, [#allocation4], %s4583_s11, %s4583_s11, %s4584_s19  }
  0x24   :  { %s4585_s17 = smov [#allocation8]   ;;  %s4529_s23 = scalar_lea.hbm %s5805_s13, 1024 }
  0x25   :  { %s74_s20 = sshll.u32 %s4585_s17, 4  ;;  %p4530_p2 = scmp.ne.s32.totalorder %s5805_s13, %s4529_s23  ;;  %s75_s20 = int_to_ptr.vmem [resolvable:$true] %s74_s20 }
  0x26   :  { %p4533_p3 = scmp.lt.u32.totalorder %s4529_s23, %s5805_s13 }
  0x28   :  { %p4535_p4 = pnand %p4533_p3, %p4530_p2 }
  0x2a   :  { %4538 = shalt.err (!%p4535_p4)
}
  0x2b   :  { %s4539_s28 = scalar_lea.vmem %s75_s20, 1024  ;;  %p4544_p6 = scmp.lt.s32.totalorder %s75_s20, %s75_s20 }
  0x2c   :  { %p4540_p5 = scmp.ne.s32.totalorder %s75_s20, %s4539_s28  ;;  %p4545_p7 = scmp.lt.s32.totalorder %s4539_s28, %s4539_s28 }
  0x2e   :  { %p4546_p8 = por %p4545_p7, %p4544_p6 }
  0x30   :  { %p4547_p9 = pnand %p4546_p8, %p4540_p5 }
  0x32   :  { %4550 = shalt.err (!%p4547_p9)
}
  0x33   :  { %s5825_s1 = smov 64  }
  0x34   :  { %80 = dma.hbm_to_vmem [thread:$0]  %s5805_s13, 1024, %s75_s20, [#allocation7], %s5825_s1, %s5825_s1, %s4581_s29  }
  0x35   :  { %4573 = dma.done.wait [#allocation4], 1536  }
  0x36   :  { %4574 = vsyncadd [#allocation4], 4294965760 }
  0x37   :  { %4575 = dma.done.wait [#allocation7], 2048  }
  0x38   :  { %4576 = vsyncadd [#allocation7], 4294965248  ;;  %v5809_v0 = vmov 0   ;;  %v4226_v1 = vld [vmem:[#allocation3 + $0x4] ss:$8 sps:$4 sm:$0xff]   ;;  %v203_v9 = vld [vmem:[%s5792_s0] sm:$0xff]  ;;  %v528_v58 = vlaneseq }
  0x39   :  { %272 = vmatprep.mubr.bf16.mxu0 %v5809_v0  ;;  %350 = vmatprep.mubr.bf16.mxu1 %v5809_v0  ;;  %v4228_v2 = vld [vmem:[#allocation3 + $0x24] ss:$8 sps:$4 sm:$0xff]   ;;  %v4230_v3 = vld [vmem:[#allocation3] ss:$8 sps:$4 sm:$0xff]   ;;  %v4232_v5 = vld [vmem:[#allocation3 + $0x14] ss:$8 sps:$4 sm:$0xff]  }
  0x3a   :  { %240 = vmatprep.subr.bf16.mxu0 %v4226_v1  ;;  %v4231_v4 = vld [vmem:[#allocation3 + $0x20] ss:$8 sps:$4 sm:$0xff]   ;;  %318 = vmatprep.subr.bf16.mxu1 %v4228_v2  ;;  %v4234_v6 = vld [vmem:[#allocation3 + $0x34] ss:$8 sps:$4 sm:$0xff]   ;;  %v4236_v7 = vld [vmem:[#allocation3 + $0x10] ss:$8 sps:$4 sm:$0xff]  }
  0x3b   :  { %241 = vmatpush1.bf16.msra.mxu0 %v4230_v3  ;;  %319 = vmatpush1.bf16.msra.mxu1 %v4231_v4  ;;  %v4237_v8 = vld [vmem:[#allocation3 + $0x30] ss:$8 sps:$4 sm:$0xff]   ;;  %v204_v10 = vld [vmem:[%s5792_s0 + $0x8] sm:$0xff]  ;;  %v4240_v12 = vld [vmem:[#allocation3 + $0x44] ss:$8 sps:$4 sm:$0xff]   ;;  %vm233_vm0 = vcmask 261120  }
  0x3c   :  { %242 = vmatprep.subr.bf16.mxu0 %v4232_v5  ;;  %320 = vmatprep.subr.bf16.mxu1 %v4234_v6  ;;  %v207_v11 = vpack.c.bf16 %v204_v10, %v203_v9  ;;  %v4238_v13 = vld [vmem:[#allocation3 + $0x40] ss:$8 sps:$4 sm:$0xff]   ;;  %v4243_v14 = vld [vmem:[#allocation3 + $0x54] ss:$8 sps:$4 sm:$0xff]   ;;  %v206_v16 = vld [vmem:[%s5792_s0 + $0x18] sm:$0xff]  ;;  %vm457_vm1 = vcmask 1046528  }
  0x3d   :  { %v205_v15 = vld [vmem:[%s5792_s0 + $0x10] sm:$0xff]  ;;  %v4241_v17 = vld [vmem:[#allocation3 + $0x50] ss:$8 sps:$4 sm:$0xff]   ;;  %v4248_v20 = vld [vmem:[%s5796_s4 + $0x8] sm:$0xff]   ;;  %v4776_v4 = vshrl.u32 %v528_v58, 7  ;;  %vm496_vm2 = vcmask 1045504  }
  0x3e   :  { %v208_v18 = vpack.c.bf16 %v206_v16, %v205_v15  ;;  %v4246_v19 = vld [vmem:[%s5796_s4] sm:$0xff]   ;;  %v4250_v21 = vld [vmem:[%s5796_s4 + $0x10] sm:$0xff]   ;;  %v4252_v22 = vld [vmem:[%s5796_s4 + $0x18] sm:$0xff]   ;;  %vm563_vm3 = vcmask 244736   ;;  %vm746_vm4 = vcmask 1041408   ;;  %vm742_vm5 = vcmask 424960  }
  0x3f   :  { %243 = vmatpush1.bf16.msra.mxu0 %v4236_v7  ;;  %321 = vmatpush1.bf16.msra.mxu1 %v4237_v8  ;;  %v4254_v23 = vld [vmem:[%s5796_s4 + $0x20] sm:$0xff]   ;;  %v4256_v24 = vld [vmem:[%s5796_s4 + $0x28] sm:$0xff]   ;;  %v4258_v25 = vld [vmem:[%s5796_s4 + $0x30] sm:$0xff]   ;;  %v534_v15 = vsub.s32 1, %v4776_v4  ;;  %vm1001_vm6 = vcmask 1044480   ;;  %vm997_vm7 = vcmask 736256  }
  0x40   :  { %396 = vmatprep.subr.bf16.mxu0 %v4240_v12  ;;  %v4260_v26 = vld [vmem:[%s5796_s4 + $0x38] sm:$0xff]   ;;  %vm1310_vm8 = vcmask 97280   ;;  %vm1487_vm9 = vcmask 654336   ;;  %vm1650_vm10 = vcmask 778240   ;;  %vm1653_vm11 = vcmask 779265   ;;  %s4589_s25 = smov [#allocation9]  }
  0x41   :  { %vm1656_vm12 = vcmask 780290   ;;  %vm1659_vm13 = vcmask 781315   ;;  %vm1662_vm14 = vcmask 782340   ;;  %vm1665_vm15 = vcmask 783365   ;;  %s3572_s26 = sshll.u32 %s4589_s25, 4  ;;  %s3573_s26 = int_to_ptr.vmem [resolvable:$true] %s3572_s26 }
  0x42   :  { %3638 = vmatmul.mubr.msk.bf16.vlgmr.msra.gmra.mrb[0].mxu0 %vm233_vm0, %v207_v11  ;;  %3644 = vmatmul.mubr.msk.bf16.vlgmr.msra.gmra.mrb[0].mxu1 %vm233_vm0, %v207_v11  ;;  %p4556_p11 = scmp.lt.s32.totalorder %s3573_s26, %s3573_s26 }
  0x43   :  { %282 = vmatprep.mubr.bf16.mxu0 %v5809_v0  ;;  %360 = vmatprep.mubr.bf16.mxu1 %v5809_v0 }
  0x44   :  { %397 = vmatpush1.bf16.msra.mxu0 %v4238_v13  ;;  %v201_v13 = vld [vmem:[%s5794_s2] sm:$0x3] }
  0x45   :  { %398 = vmatprep.subr.bf16.mxu0 %v4243_v14 }
  0x48   :  { %399 = vmatpush1.bf16.msra.mxu0 %v4241_v17 }
  0x49   :  { %750 = vmatprep.subr.bf16.mxu0 %v5809_v0 }
  0x4a   :  { %3639 = vmatmul.mubr.msk.bf16.gmra.mrb[4].mxu0 %vm233_vm0, %v208_v18  ;;  %3645 = vmatmul.mubr.msk.bf16.gmra.mrb[4].mxu1 %vm233_vm0, %v208_v18 }
  0x4b   :  { %428 = vmatprep.mubr.bf16.mxu0 %v5809_v0  ;;  %605 = vmatprep.mubr.bf16.mxu1 %v5809_v0 }
  0x52   :  { %3650 = vmatmul.mubr.msk.bf16.vlgmr.msra.gmra.mrb[8].mxu0 %vm233_vm0, %v207_v11  ;;  %v530_v11 = vsub.s32 0, %v4776_v4 }
  0x53   :  { %438 = vmatprep.mubr.bf16.mxu0 %v5809_v0  ;;  %751 = vmatpush1.bf16.msra.mxu0 %v4246_v19 }
  0x54   :  { %752 = vmatprep.subr.bf16.mxu0 %v5809_v0  ;;  %v4787_v19 = vrot.slane %v201_v13, %v530_v11 }
  0x57   :  { %753 = vmatpush1.bf16.msra.mxu0 %v4248_v20 }
  0x58   :  { %754 = vmatprep.subr.bf16.mxu0 %v5809_v0 }
  0x5a   :  { %3651 = vmatmul.mubr.msk.bf16.gmra.mrb[12].mxu0 %vm233_vm0, %v208_v18 }
  0x5b   :  { %755 = vmatpush1.bf16.msra.mxu0 %v4250_v21 }
  0x5c   :  { %756 = vmatprep.subr.bf16.mxu0 %v5809_v0 }
  0x5f   :  { %757 = vmatpush1.bf16.msra.mxu0 %v4252_v22 }
  0x60   :  { %758 = vmatprep.subr.bf16.mxu0 %v5809_v0 }
  0x63   :  { %759 = vmatpush1.bf16.msra.mxu0 %v4254_v23  ;;  %v4791_v23 = vrot.slane %v201_v13, %v534_v15  ;;  %v4911_v13 = vld [vmem:[%s5796_s4 + $0x50] sm:$0xff]  }
  0x64   :  { %760 = vmatprep.subr.bf16.mxu0 %v5809_v0 }
  0x67   :  { %761 = vmatpush1.bf16.msra.mxu0 %v4256_v24 }
  0x68   :  { %762 = vmatprep.subr.bf16.mxu0 %v5809_v0 }
  0x6b   :  { %763 = vmatpush1.bf16.msra.mxu0 %v4258_v25 }
  0x6c   :  { %764 = vmatprep.subr.bf16.mxu0 %v5809_v0 }
  0x6f   :  { %765 = vmatpush1.bf16.msra.mxu0 %v4260_v26 }
  0x70   :  { %766 = vmatprep.subr.bf16.mxu0 %v5809_v0 }
 0x115   :  { %v274_v27 = vpop.f32.mrb[0].mxu0  ;;  %v352_v28 = vpop.f32.mrb[0].mxu1 }
 0x116   :  { %v458_v29 = vrot.slane %v352_v28, 1  ;;  %v276_v30 = vpop.f32.mrb[1].mxu0  ;;  %v354_v31 = vpop.f32.mrb[1].mxu1 }
 0x117   :  { %v461_v32 = vrot.slane %v354_v31, 1  ;;  %v278_v33 = vpop.f32.mrb[2].mxu0  ;;  %v356_v34 = vpop.f32.mrb[2].mxu1 }
 0x118   :  { %v459_v35 = vrot.slane %v356_v34, 1  ;;  %v280_v36 = vpop.f32.mrb[3].mxu0  ;;  %v358_v37 = vpop.f32.mrb[3].mxu1 }
 0x119   :  { %v462_v38 = vrot.slane %v358_v37, 1 }
 0x11a   :  { %v460_v39 = vsel %vm457_vm1, %v458_v29, %v459_v35 }
 0x11b   :  { %v480_v40 = vadd.f32 %v460_v39, %v274_v27  ;;  %v463_v41 = vsel %vm457_vm1, %v461_v32, %v462_v38 }
 0x11c   :  { %v481_v42 = vadd.f32 %v463_v41, %v276_v30 }
 0x11d   :  { %v284_v43 = vpop.f32.mrb[4].mxu0  ;;  %v362_v44 = vpop.f32.mrb[4].mxu1 }
 0x11e   :  { %v464_v45 = vrot.slane %v362_v44, 1  ;;  %v286_v46 = vpop.f32.mrb[5].mxu0  ;;  %v364_v47 = vpop.f32.mrb[5].mxu1 }
 0x11f   :  { %v466_v48 = vrot.slane %v364_v47, 1  ;;  %v288_v49 = vpop.f32.mrb[6].mxu0  ;;  %v366_v50 = vpop.f32.mrb[6].mxu1 }
 0x120   :  { %v465_v51 = vsel %vm457_vm1, %v459_v35, %v464_v45  ;;  %v468_v52 = vrot.slane %v366_v50, 1  ;;  %v290_v53 = vpop.f32.mrb[7].mxu0  ;;  %v368_v54 = vpop.f32.mrb[7].mxu1 }
 0x121   :  { %v482_v55 = vadd.f32 %v465_v51, %v278_v33  ;;  %v467_v56 = vsel %vm457_vm1, %v462_v38, %v466_v48  ;;  %v470_v57 = vrot.slane %v368_v54, 1 }
 0x122   :  { %v483_v59 = vadd.f32 %v467_v56, %v280_v36  ;;  %v469_v60 = vsel %vm457_vm1, %v464_v45, %v468_v52  ;;  %v486_v61 = vadd.f32 %v468_v52, %v288_v49 }
 0x123   :  { %v484_v62 = vadd.f32 %v469_v60, %v284_v43  ;;  %v471_v63 = vsel %vm457_vm1, %v466_v48, %v470_v57  ;;  %v487_v1 = vadd.f32 %v470_v57, %v290_v53  ;;  %v4810_v60 = vld [vmem:[%s5795_s3] sm:$0xff]  }
 0x124   :  { %v485_v2 = vadd.f32 %v471_v63, %v286_v46  ;;  %v4833_v63 = vld [vmem:[%s5796_s4 + $0x64] sm:$0xff]  }
 0x125   :  { %v430_v3 = vpop.f32.mrb[8].mxu0 }
 0x126   :  { %v432_v5 = vpop.f32.mrb[9].mxu0  ;;  %v497_v7 = vrot.slane %v430_v3, 2  ;;  %v4854_v3 = vld [vmem:[%s5796_s4 + $0x7c] sm:$0xff]  }
 0x127   :  { %v434_v6 = vpop.f32.mrb[10].mxu0  ;;  %v500_v10 = vrot.slane %v432_v5, 2  ;;  %v4861_v5 = vld [vmem:[%s5796_s4 + $0x84] sm:$0xff]  }
 0x128   :  { %v498_v8 = vrot.slane %v434_v6, 2  ;;  %v436_v9 = vpop.f32.mrb[11].mxu0  ;;  %v4868_v6 = vld [vmem:[%s5796_s4 + $0x8c] sm:$0xff]  }
 0x129   :  { %v501_v12 = vrot.slane %v436_v9, 2  ;;  %v4888_v9 = vld [vmem:[%s5796_s4 + $0x9c] sm:$0xff]  }
 0x12a   :  { %v499_v14 = vsel %vm496_vm2, %v497_v7, %v498_v8  ;;  %v4875_v7 = vld [vmem:[%s5796_s4 + $0x94] sm:$0xff]  }
 0x12b   :  { %v519_v16 = vadd.f32 %v499_v14, %v480_v40  ;;  %v502_v17 = vsel %vm496_vm2, %v500_v10, %v501_v12  ;;  %v4897_v10 = vld [vmem:[%s5796_s4 + $0x48] sm:$0xff]  }
 0x12c   :  { %v520_v18 = vadd.f32 %v502_v17, %v481_v42  ;;  %v4916_v14 = vld [vmem:[%s5796_s4 + $0xac] sm:$0xff]   ;;  %v4269_v17 = vld [vmem:[%s5796_s4 + $0xb4] ss:$0 sps:$4 sm:$0x33]  }
 0x12d   :  { %v440_v20 = vpop.f32.mrb[12].mxu0  ;;  %v538_v29 = vadd.f32 %v4787_v19, %v519_v16  ;;  %v4268_v16 = vld [vmem:[%s5796_s4 + $0x58] ss:$0 sps:$4 sm:$0x33]  }
 0x12e   :  { %v503_v21 = vrot.slane %v440_v20, 2  ;;  %v442_v22 = vpop.f32.mrb[13].mxu0  ;;  %v539_v36 = vadd.f32 %v4791_v23, %v520_v18  ;;  %v4928_v18 = vsel %vm746_vm4, %v4268_v16, 0  ;;  %v4930_v20 = vsel %vm746_vm4, %v4269_v17, 0 }
 0x12f   :  { %v505_v24 = vrot.slane %v442_v22, 2  ;;  %v444_v25 = vpop.f32.mrb[14].mxu0  ;;  %v546_v44 = vmax.f32 %v538_v29, 0.0 }
 0x130   :  { %v504_v26 = vsel %vm496_vm2, %v498_v8, %v503_v21  ;;  %v507_v27 = vrot.slane %v444_v25, 2  ;;  %v446_v28 = vpop.f32.mrb[15].mxu0  ;;  %v547_v50 = vmax.f32 %v539_v36, 0.0  ;;  %v4883_v8 = vld [vmem:[%s5796_s4 + $0x40] sm:$0xff]  }
 0x131   :  { %v521_v30 = vadd.f32 %v504_v26, %v482_v55  ;;  %v506_v31 = vsel %vm496_vm2, %v501_v12, %v505_v24  ;;  %v509_v32 = vrot.slane %v446_v28, 2  ;;  %767 = vmatpush1.bf16.msra.mxu0 %v4883_v8  ;;  %v4902_v12 = vld [vmem:[%s5796_s4 + $0xa4] sm:$0xff]  }
 0x132   :  { %v522_v33 = vadd.f32 %v506_v31, %v483_v59  ;;  %v508_v34 = vsel %vm496_vm2, %v503_v21, %v507_v27  ;;  %v525_v35 = vadd.f32 %v507_v27, %v486_v61  ;;  %v4819_v61 = vld [vmem:[%s5795_s3 + $0x8] sm:$0xff]   ;;  %768 = vmatprep.subr.bf16.mxu0 %v5809_v0 }
 0x133   :  { %v540_v37 = vadd.f32 %v4787_v19, %v521_v30  ;;  %v523_v38 = vadd.f32 %v508_v34, %v484_v62  ;;  %v510_v39 = vsel %vm496_vm2, %v505_v24, %v509_v32  ;;  %v526_v40 = vadd.f32 %v509_v32, %v487_v1  ;;  %v4824_v62 = vld [vmem:[%s5796_s4 + $0x5c] sm:$0xff]   ;;  %v4840_v1 = vld [vmem:[%s5796_s4 + $0x6c] sm:$0xff]  }
 0x134   :  { %v544_v41 = vadd.f32 %v4787_v19, %v525_v35  ;;  %v524_v42 = vadd.f32 %v510_v39, %v485_v2  ;;  %v541_v43 = vadd.f32 %v4791_v23, %v522_v33  ;;  %v4847_v2 = vld [vmem:[%s5796_s4 + $0x74] sm:$0xff]   ;;  %v4272_v21 = vld [vmem:[%s5797_s5 + $0x64] ss:$8 sps:$4 sm:$0xff]  }
 0x135   :  { %v548_v45 = vmax.f32 %v540_v37, 0.0  ;;  %v545_v46 = vadd.f32 %v4791_v23, %v526_v40  ;;  %v542_v47 = vadd.f32 %v4787_v19, %v523_v38  ;;  %769 = vmatpush1.bf16.msra.mxu0 %v4897_v10  ;;  %v4270_v37 = vld [vmem:[%s5797_s5 + $0x60] ss:$8 sps:$4 sm:$0xff]   ;;  %v4275_v38 = vld [vmem:[%s5797_s5 + $0x74] ss:$8 sps:$4 sm:$0xff]  }
 0x136   :  { %v552_v48 = vmax.f32 %v544_v41, 0.0  ;;  %v543_v49 = vadd.f32 %v4791_v23, %v524_v42  ;;  %v549_v51 = vmax.f32 %v541_v43, 0.0  ;;  %770 = vmatprep.subr.bf16.mxu0 %v5809_v0  ;;  %v4273_v39 = vld [vmem:[%s5797_s5 + $0x70] ss:$8 sps:$4 sm:$0xff]   ;;  %v4278_v40 = vld [vmem:[%s5797_s5 + $0x84] ss:$8 sps:$4 sm:$0xff]  }
 0x137   :  { %v553_v52 = vmax.f32 %v545_v46, 0.0  ;;  %v554_v53 = vpack.c.bf16 %v548_v45, %v546_v44  ;;  %v550_v54 = vmax.f32 %v542_v47, 0.0  ;;  %v4276_v41 = vld [vmem:[%s5797_s5 + $0x80] ss:$8 sps:$4 sm:$0xff]   ;;  %v4281_v42 = vld [vmem:[%s5797_s5 + $0x94] ss:$8 sps:$4 sm:$0xff]  }
 0x138   :  { %v551_v55 = vmax.f32 %v543_v49, 0.0  ;;  %v555_v56 = vpack.c.bf16 %v549_v51, %v547_v50  ;;  %v4279_v43 = vld [vmem:[%s5797_s5 + $0x90] ss:$8 sps:$4 sm:$0xff]   ;;  %v4284_v44 = vld [vmem:[%s5797_s5 + $0xa4] ss:$8 sps:$4 sm:$0xff]  }
 0x139   :  { %v556_v57 = vpack.c.bf16 %v552_v48, %v550_v54  ;;  %771 = vmatpush1.bf16.msra.mxu0 %v4911_v13  ;;  %v4282_v45 = vld [vmem:[%s5797_s5 + $0xa0] ss:$8 sps:$4 sm:$0xff]   ;;  %v4285_v46 = vld [vmem:[%s5797_s5 + $0xb4] ss:$8 sps:$4 sm:$0x1f]  }
 0x13a   :  { %v557_v58 = vpack.c.bf16 %v553_v52, %v551_v55  ;;  %573 = vmatprep.subr.bf16.mxu1 %v555_v56  ;;  %772 = vmatprep.subr.bf16.mxu0 %v5809_v0  ;;  %v4287_v47 = vld [vmem:[%s5797_s5 + $0xb0] ss:$8 sps:$4 sm:$0x1f]   ;;  %v4290_v49 = vld [vmem:[%s5797_s5 + $0x4] ss:$8 sps:$4 sm:$0xff]  }
 0x13b   :  { %574 = vmatpush1.bf16.msra.mxu1 %v554_v53  ;;  %v568_v59 = vsel %vm457_vm1, %v556_v57, 0  ;;  %v1003_v48 = vsel %vm1001_vm6, %v4287_v47, 0  ;;  %v4321_v47 = vld [vmem:[%s5797_s5 + $0x114] ss:$8 sps:$4 sm:$0x1f]  }
 0x13c   :  { %3653 = vmatprep.subr.msk.bf16.mxu1 %vm457_vm1, %v557_v58 }
 0x13d   :  { %773 = vmatpush1.bf16.msra.mxu0 %v4928_v18 }
 0x13e   :  { %1008 = vmatprep.subr.bf16.mxu0 %v4272_v21 }
 0x13f   :  { %576 = vmatpush1.bf16.msra.mxu1 %v568_v59 }
 0x140   :  { %624 = vmatprep.subr.bf16.mxu1 %v555_v56 }
 0x142   :  { %3654 = vmatmul.mubr.msk.bf16.vlgmr.msra.gmra.mrb[8].mxu1 %vm563_vm3, %v4810_v60 }
 0x143   :  { %625 = vmatpush1.bf16.msra.mxu1 %v554_v53  ;;  %656 = vmatprep.mubr.bf16.mxu1 %v5809_v0 }
 0x144   :  { %3656 = vmatprep.subr.msk.bf16.mxu1 %vm457_vm1, %v557_v58 }
 0x147   :  { %627 = vmatpush1.bf16.msra.mxu1 %v568_v59 }
 0x148   :  { %863 = vmatprep.subr.bf16.mxu1 %v5809_v0 }
 0x14a   :  { %3657 = vmatmul.mubr.msk.bf16.vlgmr.msra.gmra.mrb[12].mxu1 %vm563_vm3, %v4819_v61 }
 0x14b   :  { %864 = vmatpush1.bf16.msra.mxu1 %v4824_v62 }
 0x14c   :  { %865 = vmatprep.subr.bf16.mxu1 %v5809_v0 }
 0x14f   :  { %866 = vmatpush1.bf16.msra.mxu1 %v4833_v63 }
 0x150   :  { %867 = vmatprep.subr.bf16.mxu1 %v5809_v0 }
 0x153   :  { %868 = vmatpush1.bf16.msra.mxu1 %v4840_v1 }
 0x154   :  { %869 = vmatprep.subr.bf16.mxu1 %v5809_v0 }
 0x157   :  { %870 = vmatpush1.bf16.msra.mxu1 %v4847_v2 }
 0x158   :  { %871 = vmatprep.subr.bf16.mxu1 %v5809_v0 }
 0x15b   :  { %872 = vmatpush1.bf16.msra.mxu1 %v4854_v3 }
 0x15c   :  { %873 = vmatprep.subr.bf16.mxu1 %v5809_v0 }
 0x15f   :  { %874 = vmatpush1.bf16.msra.mxu1 %v4861_v5 }
 0x160   :  { %875 = vmatprep.subr.bf16.mxu1 %v5809_v0 }
 0x163   :  { %876 = vmatpush1.bf16.msra.mxu1 %v4868_v6 }
 0x164   :  { %877 = vmatprep.subr.bf16.mxu1 %v5809_v0 }
 0x167   :  { %878 = vmatpush1.bf16.msra.mxu1 %v4875_v7 }
 0x168   :  { %879 = vmatprep.subr.bf16.mxu1 %v5809_v0 }
 0x16b   :  { %880 = vmatpush1.bf16.msra.mxu1 %v4888_v9 }
 0x16c   :  { %881 = vmatprep.subr.bf16.mxu1 %v5809_v0 }
 0x16f   :  { %882 = vmatpush1.bf16.msra.mxu1 %v4902_v12 }
 0x170   :  { %883 = vmatprep.subr.bf16.mxu1 %v5809_v0 }
 0x173   :  { %884 = vmatpush1.bf16.msra.mxu1 %v4916_v14 }
 0x174   :  { %885 = vmatprep.subr.bf16.mxu1 %v5809_v0 }
 0x177   :  { %886 = vmatpush1.bf16.msra.mxu1 %v4930_v20 }
 0x215   :  { %v607_v22 = vpop.f32.mrb[8].mxu1 }
 0x216   :  { %v609_v24 = vpop.f32.mrb[9].mxu1 }
 0x217   :  { %v611_v25 = vpop.f32.mrb[10].mxu1 }
 0x218   :  { %v613_v26 = vpop.f32.mrb[11].mxu1 }
 0x21d   :  { %v658_v27 = vpop.f32.mrb[12].mxu1 }
 0x21e   :  { %v667_v28 = vmax.f32 %v607_v22, %v658_v27  ;;  %v660_v29 = vpop.f32.mrb[13].mxu1  ;;  %v4291_v27 = vld [vmem:[%s5797_s5 + $0x10] ss:$8 sps:$4 sm:$0xff]  }
 0x21f   :  { %v668_v30 = vmax.f32 %v609_v24, %v660_v29  ;;  %v662_v31 = vpop.f32.mrb[14].mxu1  ;;  %v4288_v24 = vld [vmem:[%s5797_s5] ss:$8 sps:$4 sm:$0xff]  }
 0x220   :  { %v669_v32 = vmax.f32 %v611_v25, %v662_v31  ;;  %v664_v33 = vpop.f32.mrb[15].mxu1  ;;  %v4294_v29 = vld [vmem:[%s5797_s5 + $0x20] ss:$8 sps:$4 sm:$0xff]   ;;  %v4297_v31 = vld [vmem:[%s5797_s5 + $0x30] ss:$8 sps:$4 sm:$0xff]  }
 0x221   :  { %v670_v34 = vmax.f32 %v613_v26, %v664_v33  ;;  %v4293_v26 = vld [vmem:[%s5797_s5 + $0x14] ss:$8 sps:$4 sm:$0xff]   ;;  %v4300_v33 = vld [vmem:[%s5797_s5 + $0x40] ss:$8 sps:$4 sm:$0xff]  }
 0x222   :  { %v671_v35 = vpack.c.bf16 %v669_v32, %v667_v28  ;;  %v4296_v28 = vld [vmem:[%s5797_s5 + $0x24] ss:$8 sps:$4 sm:$0xff]  }
 0x223   :  { %v672_v36 = vpack.c.bf16 %v670_v34, %v668_v30  ;;  %v4299_v30 = vld [vmem:[%s5797_s5 + $0x34] ss:$8 sps:$4 sm:$0xff]   ;;  %v4302_v32 = vld [vmem:[%s5797_s5 + $0x44] ss:$8 sps:$4 sm:$0xff]  }
 0x224   :  { %v4303_v34 = vld [vmem:[%s5797_s5 + $0x54] ss:$8 sps:$4 sm:$0x1f]  }
 0x225   :  { %3670 = vmatprep.mubr.msk.bf16.mxu0 %vm742_vm5, %v672_v36  ;;  %3683 = vmatprep.mubr.msk.bf16.mxu1 %vm742_vm5, %v672_v36 }
 0x226   :  { %783 = vmatmul.mubr.bf16.vlgmr.msra.gmra.mrb[16].mxu0 %v671_v35  ;;  %896 = vmatmul.mubr.bf16.vlgmr.msra.gmra.mrb[16].mxu1 %v671_v35  ;;  %v4305_v35 = vld [vmem:[%s5797_s5 + $0x50] ss:$8 sps:$4 sm:$0x1f]  }
 0x227   :  { %1009 = vmatpush1.bf16.msra.mxu0 %v4270_v37  ;;  %1040 = vmatprep.mubr.bf16.mxu0 %v5809_v0  ;;  %v1112_v36 = vsel %vm1001_vm6, %v4305_v35, 0  ;;  %v4308_v37 = vld [vmem:[%s5797_s5 + $0xc4] ss:$8 sps:$4 sm:$0xff]   ;;  %v5132_v35 = vld [vmem:[%s5799_s7] sm:$0x7] }
 0x228   :  { %1010 = vmatprep.subr.bf16.mxu0 %v4275_v38  ;;  %1352 = vmatprep.mubr.bf16.mxu1 %v5809_v0  ;;  %v4306_v38 = vld [vmem:[%s5797_s5 + $0xc0] ss:$8 sps:$4 sm:$0xff]  }
 0x22b   :  { %1011 = vmatpush1.bf16.msra.mxu0 %v4273_v39  ;;  %v4311_v39 = vld [vmem:[%s5797_s5 + $0xd4] ss:$8 sps:$4 sm:$0xff]  }
 0x22c   :  { %1012 = vmatprep.subr.bf16.mxu0 %v4278_v40  ;;  %v4309_v40 = vld [vmem:[%s5797_s5 + $0xd0] ss:$8 sps:$4 sm:$0xff]  }
 0x22f   :  { %1013 = vmatpush1.bf16.msra.mxu0 %v4276_v41  ;;  %v4314_v41 = vld [vmem:[%s5797_s5 + $0xe4] ss:$8 sps:$4 sm:$0xff]  }
 0x230   :  { %1014 = vmatprep.subr.bf16.mxu0 %v4281_v42  ;;  %v4312_v42 = vld [vmem:[%s5797_s5 + $0xe0] ss:$8 sps:$4 sm:$0xff]  }
 0x233   :  { %1015 = vmatpush1.bf16.msra.mxu0 %v4279_v43  ;;  %v4317_v43 = vld [vmem:[%s5797_s5 + $0xf4] ss:$8 sps:$4 sm:$0xff]  }
 0x234   :  { %1016 = vmatprep.subr.bf16.mxu0 %v4284_v44  ;;  %v4315_v44 = vld [vmem:[%s5797_s5 + $0xf0] ss:$8 sps:$4 sm:$0xff]  }
 0x237   :  { %1017 = vmatpush1.bf16.msra.mxu0 %v4282_v45  ;;  %v4320_v45 = vld [vmem:[%s5797_s5 + $0x104] ss:$8 sps:$4 sm:$0xff]  }
 0x238   :  { %3708 = vmatprep.subr.msk.bf16.mxu0 %vm1001_vm6, %v4285_v46  ;;  %v4318_v46 = vld [vmem:[%s5797_s5 + $0x100] ss:$8 sps:$4 sm:$0xff]  }
 0x23b   :  { %1019 = vmatpush1.bf16.msra.mxu0 %v1003_v48  ;;  %v4323_v48 = vld [vmem:[%s5797_s5 + $0x110] ss:$8 sps:$4 sm:$0x1f]  }
 0x23c   :  { %1117 = vmatprep.subr.bf16.mxu0 %v4290_v49  ;;  %v1237_v49 = vsel %vm1001_vm6, %v4323_v48, 0  ;;  %v5226_v48 = vld [vmem:[%s5800_s8 + $0x50] sm:$0xff]  }
 0x23d   :  { %5834 = vst [vmem:[#allocation21_spill] sm:$0xff] %v5226_v48 }
 0x2f9   :  { %v784_v50 = vpop.f32.mrb[16].mxu0  ;;  %v897_v51 = vpop.f32.mrb[16].mxu1 }
 0x2fa   :  { %v904_v52 = vmax.f32 %v784_v50, %v897_v51  ;;  %v786_v53 = vpop.f32.mrb[17].mxu0  ;;  %v899_v54 = vpop.f32.mrb[17].mxu1  ;;  %v4325_v51 = vld [vmem:[%s5800_s8 + $0x68] sm:$0xff]  }
 0x2fb   :  { %v787_v55 = vpop.f32.mrb[18].mxu0  ;;  %v900_v56 = vpop.f32.mrb[18].mxu1  ;;  %v4329_v53 = vld [vmem:[%s5800_s8 + $0x78] sm:$0xff]   ;;  %v5073_v54 = vld [vmem:[%s5800_s8 + $0x80] sm:$0xff]  }
 0x2fc   :  { %v905_v57 = vmax.f32 %v787_v55, %v900_v56  ;;  %v789_v58 = vpop.f32.mrb[19].mxu0  ;;  %v902_v59 = vpop.f32.mrb[19].mxu1  ;;  %5826 = vst [vmem:[#allocation13_spill] sm:$0xff] %v5073_v54  ;;  %v5080_v55 = vld [vmem:[%s5800_s8 + $0x88] sm:$0xff]   ;;  %v5087_v56 = vld [vmem:[%s5800_s8 + $0x90] sm:$0xff]  }
 0x2fd   :  { %5827 = vst [vmem:[#allocation14_spill] sm:$0xff] %v5080_v55  ;;  %5828 = vst [vmem:[#allocation15_spill] sm:$0xff] %v5087_v56  ;;  %v5101_v58 = vld [vmem:[%s5800_s8 + $0xa0] sm:$0xff]   ;;  %v5108_v59 = vld [vmem:[%s5800_s8 + $0xa8] sm:$0xff]  }
 0x2fe   :  { %v906_v16 = vpack.c.bf16 %v905_v57, %v904_v52  ;;  %v4327_v52 = vld [vmem:[%s5800_s8 + $0x70] sm:$0xff]   ;;  %v5094_v57 = vld [vmem:[%s5800_s8 + $0x98] sm:$0xff]   ;;  %5830 = vst [vmem:[#allocation17_spill] sm:$0xff] %v5101_v58  ;;  %5831 = vst [vmem:[#allocation18_spill] sm:$0xff] %v5108_v59 }
 0x2ff   :  { %5829 = vst [vmem:[#allocation16_spill] sm:$0xff] %v5094_v57 }
 0x300   :  { %v935_v17 = vshll.u32 %v906_v16, 16  ;;  %v933_v21 = vshrl.u32 %v906_v16, 16  ;;  %v1174_v50 = vrot.slane %v906_v16, 1 }
 0x302   :  { %v937_v22 = vrot.slane %v935_v17, 1 }
 0x304   :  { %v938_v25 = vor.u32 %v937_v22, %v933_v21 }
 0x306   :  { %3709 = vmatmul.mubr.msk.bf16.vlgmr.msra.gmra.mrb[20].mxu0 %vm997_vm7, %v938_v25 }
 0x307   :  { %1118 = vmatpush1.bf16.msra.mxu0 %v4288_v24  ;;  %1149 = vmatprep.mubr.bf16.mxu0 %v5809_v0 }
 0x308   :  { %1119 = vmatprep.subr.bf16.mxu0 %v4293_v26 }
 0x30b   :  { %1120 = vmatpush1.bf16.msra.mxu0 %v4291_v27 }
 0x30c   :  { %1121 = vmatprep.subr.bf16.mxu0 %v4296_v28 }
 0x30f   :  { %1122 = vmatpush1.bf16.msra.mxu0 %v4294_v29 }
 0x310   :  { %1123 = vmatprep.subr.bf16.mxu0 %v4299_v30 }
 0x313   :  { %1124 = vmatpush1.bf16.msra.mxu0 %v4297_v31 }
 0x314   :  { %1125 = vmatprep.subr.bf16.mxu0 %v4302_v32 }
 0x317   :  { %1126 = vmatpush1.bf16.msra.mxu0 %v4300_v33 }
 0x318   :  { %3722 = vmatprep.subr.msk.bf16.mxu0 %vm1001_vm6, %v4303_v34 }
 0x31b   :  { %1128 = vmatpush1.bf16.msra.mxu0 %v1112_v36  ;;  %v5142_v36 = vld [vmem:[%s5799_s7 + $0x4] sm:$0x7] }
 0x31c   :  { %1242 = vmatprep.subr.bf16.mxu0 %v4308_v37  ;;  %v5147_v37 = vld [vmem:[%s5800_s8] sm:$0xff]  }
 0x31e   :  { %3723 = vmatmul.mubr.msk.bf16.vlgmr.msra.gmra.mrb[20].mxu0 %vm997_vm7, %v906_v16  ;;  %v202_v16 = vld [vmem:[%s5798_s6] sm:$0x3] }
 0x31f   :  { %1243 = vmatpush1.bf16.msra.mxu0 %v4306_v38  ;;  %1274 = vmatprep.mubr.bf16.mxu0 %v5809_v0  ;;  %v5117_v17 = vrot.slane %v202_v16, %v530_v11  ;;  %v5121_v21 = vrot.slane %v202_v16, %v534_v15  ;;  %v5155_v38 = vld [vmem:[%s5800_s8 + $0x8] sm:$0xff]   ;;  %v4352_v16 = vld [vmem:[#allocation3 + $0x4] ss:$8 sps:$4 sm:$0xff]  }
 0x320   :  { %1244 = vmatprep.subr.bf16.mxu0 %v4311_v39  ;;  %v5162_v39 = vld [vmem:[%s5800_s8 + $0x10] sm:$0xff]  }
 0x323   :  { %1245 = vmatpush1.bf16.msra.mxu0 %v4309_v40  ;;  %v5169_v40 = vld [vmem:[%s5800_s8 + $0x18] sm:$0xff]  }
 0x324   :  { %1246 = vmatprep.subr.bf16.mxu0 %v4314_v41  ;;  %v5176_v41 = vld [vmem:[%s5800_s8 + $0x20] sm:$0xff]  }
 0x327   :  { %1247 = vmatpush1.bf16.msra.mxu0 %v4312_v42  ;;  %v5183_v42 = vld [vmem:[%s5800_s8 + $0x28] sm:$0xff]  }
 0x328   :  { %1248 = vmatprep.subr.bf16.mxu0 %v4317_v43  ;;  %v5190_v43 = vld [vmem:[%s5800_s8 + $0x30] sm:$0xff]  }
 0x32b   :  { %1249 = vmatpush1.bf16.msra.mxu0 %v4315_v44  ;;  %v5197_v44 = vld [vmem:[%s5800_s8 + $0x38] sm:$0xff]  }
 0x32c   :  { %1250 = vmatprep.subr.bf16.mxu0 %v4320_v45  ;;  %v5204_v45 = vld [vmem:[%s5800_s8 + $0x40] sm:$0xff]  }
 0x32f   :  { %1251 = vmatpush1.bf16.msra.mxu0 %v4318_v46  ;;  %v5212_v46 = vld [vmem:[%s5800_s8 + $0x48] sm:$0xff]  }
 0x330   :  { %3748 = vmatprep.subr.msk.bf16.mxu0 %vm1001_vm6, %v4321_v47  ;;  %5832 = vst [vmem:[#allocation19_spill] sm:$0xff] %v5212_v46  ;;  %v5217_v47 = vld [vmem:[%s5800_s8 + $0xb0] sm:$0xff]  }
 0x331   :  { %5833 = vst [vmem:[#allocation20_spill] sm:$0xff] %v5217_v47 }
 0x333   :  { %1253 = vmatpush1.bf16.msra.mxu0 %v1237_v49  ;;  %v5231_v49 = vld [vmem:[%s5800_s8 + $0xb8] sm:$0xff]  }
 0x334   :  { %1609 = vmatprep.subr.bf16.mxu0 %v5809_v0  ;;  %5835 = vst [vmem:[#allocation22_spill] sm:$0xff] %v5231_v49 }
 0x336   :  { %3749 = vmatmul.mubr.msk.bf16.vlgmr.msra.gmra.mrb[20].mxu0 %vm997_vm7, %v1174_v50  ;;  %v5240_v50 = vld [vmem:[%s5800_s8 + $0x58] sm:$0xff]  }
 0x337   :  { %1610 = vmatpush1.bf16.msra.mxu0 %v4325_v51  ;;  %5836 = vst [vmem:[#allocation23_spill] sm:$0xff] %v5240_v50  ;;  %v5245_v51 = vld [vmem:[%s5800_s8 + $0xc0] sm:$0xff]  }
 0x338   :  { %1611 = vmatprep.subr.bf16.mxu0 %v5809_v0  ;;  %5837 = vst [vmem:[#allocation24_spill] sm:$0xff] %v5245_v51 }
 0x33b   :  { %1612 = vmatpush1.bf16.msra.mxu0 %v4327_v52  ;;  %v5254_v52 = vld [vmem:[%s5800_s8 + $0x60] sm:$0xff]  }
 0x33c   :  { %1613 = vmatprep.subr.bf16.mxu0 %v5809_v0  ;;  %5838 = vst [vmem:[#allocation25_spill] sm:$0xff] %v5254_v52 }
 0x33f   :  { %1614 = vmatpush1.bf16.msra.mxu0 %v4329_v53  ;;  %v5259_v53 = vld [vmem:[%s5800_s8 + $0xc8] sm:$0xff]  }
 0x340   :  { %1615 = vmatprep.subr.bf16.mxu0 %v5809_v0  ;;  %5839 = vst [vmem:[#allocation26_spill] sm:$0xff] %v5259_v53 }
 0x343   :  { %1616 = vmatpush1.bf16.msra.mxu0 %v5073_v54 }
 0x344   :  { %1617 = vmatprep.subr.bf16.mxu0 %v5809_v0 }
 0x347   :  { %1618 = vmatpush1.bf16.msra.mxu0 %v5080_v55 }
 0x348   :  { %1619 = vmatprep.subr.bf16.mxu0 %v5809_v0 }
 0x34b   :  { %1620 = vmatpush1.bf16.msra.mxu0 %v5087_v56 }
 0x34c   :  { %1621 = vmatprep.subr.bf16.mxu0 %v5809_v0 }
 0x34f   :  { %1622 = vmatpush1.bf16.msra.mxu0 %v5094_v57 }
 0x350   :  { %1623 = vmatprep.subr.bf16.mxu0 %v5809_v0 }
 0x353   :  { %1624 = vmatpush1.bf16.msra.mxu0 %v5101_v58 }
 0x354   :  { %1625 = vmatprep.subr.bf16.mxu0 %v5809_v0 }
 0x357   :  { %1626 = vmatpush1.bf16.msra.mxu0 %v5108_v59 }
 0x358   :  { %1627 = vmatprep.subr.bf16.mxu0 %v5809_v0 }
 0x35b   :  { %1628 = vmatpush1.bf16.msra.mxu0 %v5217_v47 }
 0x35c   :  { %1629 = vmatprep.subr.bf16.mxu0 %v5809_v0 }
 0x35f   :  { %1630 = vmatpush1.bf16.msra.mxu0 %v5231_v49 }
 0x360   :  { %1631 = vmatprep.subr.bf16.mxu0 %v5809_v0 }
 0x363   :  { %1632 = vmatpush1.bf16.msra.mxu0 %v5245_v51 }
 0x364   :  { %1633 = vmatprep.subr.bf16.mxu0 %v5809_v0 }
 0x367   :  { %1634 = vmatpush1.bf16.msra.mxu0 %v5259_v53 }
 0x409   :  { %v1276_v22 = vpop.f32.mrb[20].mxu0 }
 0x40a   :  { %v1300_v24 = vadd.f32 %v5117_v17, %v1276_v22  ;;  %v1278_v25 = vpop.f32.mrb[21].mxu0 }
 0x40b   :  { %v1301_v26 = vadd.f32 %v5121_v21, %v1278_v25  ;;  %v1280_v27 = vpop.f32.mrb[22].mxu0 }
 0x40c   :  { %v1302_v28 = vadd.f32 %v5117_v17, %v1280_v27  ;;  %v1282_v29 = vpop.f32.mrb[23].mxu0  ;;  %v1304_v31 = vmax.f32 %v1300_v24, 0.0 }
 0x40d   :  { %v1303_v30 = vadd.f32 %v5121_v21, %v1282_v29  ;;  %v1305_v11 = vmax.f32 %v1301_v26, 0.0 }
 0x40e   :  { %v1306_v32 = vmax.f32 %v1302_v28, 0.0 }
 0x40f   :  { %v1307_v33 = vmax.f32 %v1303_v30, 0.0 }
 0x410   :  { %v1308_v34 = vpack.c.bf16 %v1306_v32, %v1304_v31 }
 0x411   :  { %v1309_v4 = vpack.c.bf16 %v1307_v33, %v1305_v11  ;;  %v4350_v33 = vld [vmem:[#allocation3] ss:$8 sps:$4 sm:$0xff]  }
 0x412   :  { %v1315_v15 = vsel %vm496_vm2, %v1308_v34, 0 }
 0x413   :  { %3750 = vmatprep.subr.msk.bf16.mxu1 %vm496_vm2, %v1309_v4 }
 0x414   :  { %1321 = vmatpush1.bf16.msra.mxu1 %v1315_v15 }
 0x415   :  { %3752 = vmatprep.subr.msk.bf16.mxu1 %vm496_vm2, %v1309_v4  ;;  %v4355_v4 = vld [vmem:[#allocation3 + $0x14] ss:$8 sps:$4 sm:$0xff]  }
 0x417   :  { %3751 = vmatmul.mubr.msk.bf16.vlgmr.msra.gmra.mrb[20].mxu1 %vm1310_vm8, %v5132_v35 }
 0x418   :  { %1365 = vmatpush1.bf16.msra.mxu1 %v1315_v15  ;;  %1396 = vmatprep.mubr.bf16.mxu1 %v5809_v0  ;;  %v4353_v15 = vld [vmem:[#allocation3 + $0x10] ss:$8 sps:$4 sm:$0xff]  }
 0x419   :  { %1491 = vmatprep.subr.bf16.mxu1 %v5809_v0 }
 0x41f   :  { %3753 = vmatmul.mubr.msk.bf16.vlgmr.msra.gmra.mrb[24].mxu1 %vm1310_vm8, %v5142_v36 }
 0x420   :  { %1492 = vmatpush1.bf16.msra.mxu1 %v5147_v37 }
 0x421   :  { %1493 = vmatprep.subr.bf16.mxu1 %v5809_v0 }
 0x424   :  { %1494 = vmatpush1.bf16.msra.mxu1 %v5155_v38 }
 0x425   :  { %1495 = vmatprep.subr.bf16.mxu1 %v5809_v0 }
 0x428   :  { %1496 = vmatpush1.bf16.msra.mxu1 %v5162_v39 }
 0x429   :  { %1497 = vmatprep.subr.bf16.mxu1 %v5809_v0 }
 0x42c   :  { %1498 = vmatpush1.bf16.msra.mxu1 %v5169_v40 }
 0x42d   :  { %1499 = vmatprep.subr.bf16.mxu1 %v5809_v0 }
 0x430   :  { %1500 = vmatpush1.bf16.msra.mxu1 %v5176_v41 }
 0x431   :  { %1501 = vmatprep.subr.bf16.mxu1 %v5809_v0 }
 0x434   :  { %1502 = vmatpush1.bf16.msra.mxu1 %v5183_v42 }
 0x435   :  { %1503 = vmatprep.subr.bf16.mxu1 %v5809_v0 }
 0x438   :  { %1504 = vmatpush1.bf16.msra.mxu1 %v5190_v43 }
 0x439   :  { %1505 = vmatprep.subr.bf16.mxu1 %v5809_v0 }
 0x43c   :  { %1506 = vmatpush1.bf16.msra.mxu1 %v5197_v44 }
 0x43d   :  { %1507 = vmatprep.subr.bf16.mxu1 %v5809_v0 }
 0x440   :  { %1508 = vmatpush1.bf16.msra.mxu1 %v5204_v45 }
 0x441   :  { %1509 = vmatprep.subr.bf16.mxu1 %v5809_v0 }
 0x444   :  { %1510 = vmatpush1.bf16.msra.mxu1 %v5212_v46 }
 0x445   :  { %1511 = vmatprep.subr.bf16.mxu1 %v5809_v0 }
 0x448   :  { %1512 = vmatpush1.bf16.msra.mxu1 %v5226_v48 }
 0x449   :  { %1513 = vmatprep.subr.bf16.mxu1 %v5809_v0 }
 0x44c   :  { %1514 = vmatpush1.bf16.msra.mxu1 %v5240_v50 }
 0x44d   :  { %1515 = vmatprep.subr.bf16.mxu1 %v5809_v0 }
 0x450   :  { %1516 = vmatpush1.bf16.msra.mxu1 %v5254_v52 }
 0x451   :  { %1704 = vmatprep.subr.bf16.mxu1 %v4352_v16  ;;  %v3782_v16 = vld [vmem:[%s5792_s0 + $0x20] sm:$0xff] }
 0x4ea   :  { %v1354_v22 = vpop.f32.mrb[20].mxu1 }
 0x4eb   :  { %v1356_v24 = vpop.f32.mrb[21].mxu1 }
 0x4ec   :  { %v1358_v25 = vpop.f32.mrb[22].mxu1 }
 0x4ed   :  { %v1359_v26 = vpop.f32.mrb[23].mxu1 }
 0x4ee   :  { %v4356_v26 = vld [vmem:[#allocation3 + $0x20] ss:$8 sps:$4 sm:$0xff]  }
 0x4f2   :  { %v1398_v27 = vpop.f32.mrb[24].mxu1 }
 0x4f3   :  { %v1405_v28 = vmax.f32 %v1354_v22, %v1398_v27  ;;  %v1400_v29 = vpop.f32.mrb[25].mxu1  ;;  %v3783_v22 = vld [vmem:[%s5792_s0 + $0x28] sm:$0xff] }
 0x4f4   :  { %v1406_v30 = vmax.f32 %v1356_v24, %v1400_v29  ;;  %v1402_v31 = vpop.f32.mrb[26].mxu1  ;;  %v4358_v24 = vld [vmem:[#allocation3 + $0x24] ss:$8 sps:$4 sm:$0xff]   ;;  %v1672_v25 = vpack.c.bf16 %v3783_v22, %v3782_v16  ;;  %v4361_v27 = vld [vmem:[#allocation3 + $0x34] ss:$8 sps:$4 sm:$0xff]  }
 0x4f5   :  { %v1403_v32 = vpop.f32.mrb[27].mxu1  ;;  %v1407_v34 = vpack.c.bf16 %v1405_v28, %v1405_v28  ;;  %v3784_v28 = vld [vmem:[%s5792_s0 + $0x30] sm:$0xff]  ;;  %v3785_v29 = vld [vmem:[%s5792_s0 + $0x38] sm:$0xff] }
 0x4f6   :  { %v1408_v11 = vpack.c.bf16 %v1406_v30, %v1406_v30  ;;  %v4359_v30 = vld [vmem:[#allocation3 + $0x30] ss:$8 sps:$4 sm:$0xff]   ;;  %v4364_v31 = vld [vmem:[#allocation3 + $0x44] ss:$8 sps:$4 sm:$0xff]   ;;  %v1673_v32 = vpack.c.bf16 %v3785_v29, %v3784_v28 }
 0x4f8   :  { %3767 = vmatprep.mubr.msk.bf16.mxu1 %vm1487_vm9, %v1408_v11  ;;  %3781 = vmatprep.mubr.msk.bf16.mxu0 %vm1487_vm9, %v1408_v11  ;;  %v4362_v11 = vld [vmem:[#allocation3 + $0x40] ss:$8 sps:$4 sm:$0xff]  }
 0x4f9   :  { %1524 = vmatmul.mubr.bf16.vlgmr.msra.gmra.mrb[28].mxu1 %v1407_v34  ;;  %1642 = vmatmul.mubr.bf16.vlgmr.msra.gmra.mrb[24].mxu0 %v1407_v34  ;;  %v4365_v34 = vld [vmem:[#allocation3 + $0x50] ss:$8 sps:$4 sm:$0xff]  }
 0x4fa   :  { %1705 = vmatpush1.bf16.msra.mxu1 %v4350_v33  ;;  %1736 = vmatprep.mubr.bf16.mxu1 %v5809_v0  ;;  %v4367_v33 = vld [vmem:[#allocation3 + $0x54] ss:$8 sps:$4 sm:$0xff]  }
 0x4fb   :  { %1706 = vmatprep.subr.bf16.mxu1 %v4355_v4  ;;  %2045 = vmatprep.mubr.bf16.mxu0 %v5809_v0 }
 0x4fe   :  { %1707 = vmatpush1.bf16.msra.mxu1 %v4353_v15 }
 0x4ff   :  { %1781 = vmatprep.subr.bf16.mxu1 %v4358_v24 }
 0x501   :  { %3790 = vmatmul.mubr.msk.bf16.vlgmr.msra.gmra.mrb[32].mxu1 %vm233_vm0, %v1672_v25 }
 0x502   :  { %1746 = vmatprep.mubr.bf16.mxu1 %v5809_v0  ;;  %1782 = vmatpush1.bf16.msra.mxu1 %v4356_v26 }
 0x503   :  { %1783 = vmatprep.subr.bf16.mxu1 %v4361_v27 }
 0x506   :  { %1784 = vmatpush1.bf16.msra.mxu1 %v4359_v30 }
 0x507   :  { %1858 = vmatprep.subr.bf16.mxu1 %v4364_v31 }
 0x509   :  { %3791 = vmatmul.mubr.msk.bf16.gmra.mrb[36].mxu1 %vm233_vm0, %v1673_v32 }
 0x50a   :  { %1813 = vmatprep.mubr.bf16.mxu1 %v5809_v0 }
 0x511   :  { %3796 = vmatmul.mubr.msk.bf16.vlgmr.msra.gmra.mrb[40].mxu1 %vm233_vm0, %v1672_v25 }
 0x512   :  { %1823 = vmatprep.mubr.bf16.mxu1 %v5809_v0  ;;  %1859 = vmatpush1.bf16.msra.mxu1 %v4362_v11 }
 0x513   :  { %1860 = vmatprep.subr.bf16.mxu1 %v4367_v33 }
 0x516   :  { %1861 = vmatpush1.bf16.msra.mxu1 %v4365_v34 }
 0x519   :  { %3797 = vmatmul.mubr.msk.bf16.gmra.mrb[44].mxu1 %vm233_vm0, %v1673_v32 }
 0x51a   :  { %1890 = vmatprep.mubr.bf16.mxu1 %v5809_v0 }
 0x521   :  { %3802 = vmatmul.mubr.msk.bf16.vlgmr.msra.gmra.mrb[48].mxu1 %vm233_vm0, %v1672_v25 }
 0x522   :  { %1900 = vmatprep.mubr.bf16.mxu1 %v5809_v0 }
 0x529   :  { %3803 = vmatmul.mubr.msk.bf16.gmra.mrb[52].mxu1 %vm233_vm0, %v1673_v32  ;;  %vm4588_vm0 = vmmov 0  }
 0x52a   :  { %2088 = vmatprep.mubr.bf16.mxu1 %v5809_v0 }
 0x5cc   :  { %v1525_v4 = vpop.f32.mrb[28].mxu1  ;;  %v1643_v15 = vpop.f32.mrb[24].mxu0 }
 0x5cd   :  { %v1649_v16 = vmax.f32 %v1525_v4, %v1643_v15  ;;  %v1527_v22 = vpop.f32.mrb[29].mxu1  ;;  %v1645_v24 = vpop.f32.mrb[25].mxu0 }
 0x5ce   :  { %v1528_v26 = vpop.f32.mrb[30].mxu1  ;;  %v1646_v27 = vpop.f32.mrb[26].mxu0 }
 0x5cf   :  { %1651 = vst.msk [vmem:[#allocation2] sm:$0x1] %vm1650_vm10, %v1649_v16  ;;  %v1529_v25 = vpop.f32.mrb[31].mxu1  ;;  %v1647_v28 = vpop.f32.mrb[27].mxu0 }
 0x5d0   :  { %1654 = vst.msk [vmem:[#allocation2 + $0x1] sm:$0x2] %vm1653_vm11, %v1649_v16 }
 0x5d1   :  { %1657 = vst.msk [vmem:[#allocation2 + $0x2] sm:$0x4] %vm1656_vm12, %v1649_v16 }
 0x5d2   :  { %1660 = vst.msk [vmem:[#allocation2 + $0x3] sm:$0x8] %vm1659_vm13, %v1649_v16 }
 0x5d3   :  { %1663 = vst.msk [vmem:[#allocation2 + $0x4] sm:$0x10] %vm1662_vm14, %v1649_v16 }
 0x5d4   :  { %1666 = vst.msk [vmem:[#allocation2 + $0x5] sm:$0x20] %vm1665_vm15, %v1649_v16  ;;  %v1738_v29 = vpop.f32.mrb[32].mxu1 }
 0x5d5   :  { %v1740_v30 = vpop.f32.mrb[33].mxu1 }
 0x5d6   :  { %v1742_v31 = vpop.f32.mrb[34].mxu1 }
 0x5d7   :  { %v1744_v32 = vpop.f32.mrb[35].mxu1 }
 0x5dc   :  { %v1748_v11 = vpop.f32.mrb[36].mxu1 }
 0x5dd   :  { %v1750_v33 = vpop.f32.mrb[37].mxu1 }
 0x5de   :  { %v1752_v34 = vpop.f32.mrb[38].mxu1 }
 0x5df   :  { %v1754_v4 = vpop.f32.mrb[39].mxu1 }
 0x5e4   :  { %v1815_v15 = vpop.f32.mrb[40].mxu1 }
 0x5e5   :  { %v1817_v22 = vpop.f32.mrb[41].mxu1  ;;  %v1919_v26 = vrot.slane %v1815_v15, 1 }
 0x5e6   :  { %v1819_v24 = vpop.f32.mrb[42].mxu1  ;;  %v1922_v53 = vrot.slane %v1817_v22, 1 }
 0x5e7   :  { %v1920_v27 = vrot.slane %v1819_v24, 1  ;;  %v1821_v0 = vpop.f32.mrb[43].mxu1 }
 0x5e8   :  { %v1923_v51 = vrot.slane %v1821_v0, 1 }
 0x5e9   :  { %v1921_v16 = vsel %vm457_vm1, %v1919_v26, %v1920_v27 }
 0x5ea   :  { %v1941_v25 = vadd.f32 %v1921_v16, %v1738_v29  ;;  %v1924_v28 = vsel %vm457_vm1, %v1922_v53, %v1923_v51 }
 0x5eb   :  { %v1942_v49 = vadd.f32 %v1924_v28, %v1740_v30 }
 0x5ec   :  { %v1825_v47 = vpop.f32.mrb[44].mxu1 }
 0x5ed   :  { %v1925_v59 = vrot.slane %v1825_v47, 1  ;;  %v1827_v58 = vpop.f32.mrb[45].mxu1 }
 0x5ee   :  { %v1927_v57 = vrot.slane %v1827_v58, 1  ;;  %v1829_v56 = vpop.f32.mrb[46].mxu1 }
 0x5ef   :  { %v1926_v55 = vsel %vm457_vm1, %v1920_v27, %v1925_v59  ;;  %v1929_v54 = vrot.slane %v1829_v56, 1  ;;  %v1831_v52 = vpop.f32.mrb[47].mxu1 }
 0x5f0   :  { %v1943_v15 = vadd.f32 %v1926_v55, %v1742_v31  ;;  %v1928_v24 = vsel %vm457_vm1, %v1923_v51, %v1927_v57  ;;  %v1931_v22 = vrot.slane %v1831_v52, 1 }
 0x5f1   :  { %v1944_v0 = vadd.f32 %v1928_v24, %v1744_v32  ;;  %v1930_v26 = vsel %vm457_vm1, %v1925_v59, %v1929_v54  ;;  %v1947_v29 = vadd.f32 %v1929_v54, %v1752_v34 }
 0x5f2   :  { %v1945_v16 = vadd.f32 %v1930_v26, %v1748_v11  ;;  %v1932_v53 = vsel %vm457_vm1, %v1927_v57, %v1931_v22  ;;  %v1948_v30 = vadd.f32 %v1931_v22, %v1754_v4 }
 0x5f3   :  { %v1946_v47 = vadd.f32 %v1932_v53, %v1750_v33 }
 0x5f4   :  { %v1892_v28 = vpop.f32.mrb[48].mxu1 }
 0x5f5   :  { %v1894_v58 = vpop.f32.mrb[49].mxu1  ;;  %v1957_v48 = vrot.slane %v1892_v28, 2 }
 0x5f6   :  { %v1896_v50 = vpop.f32.mrb[50].mxu1  ;;  %v1960_v46 = vrot.slane %v1894_v58, 2 }
 0x5f7   :  { %v1958_v27 = vrot.slane %v1896_v50, 2  ;;  %v1898_v56 = vpop.f32.mrb[51].mxu1 }
 0x5f8   :  { %v1961_v55 = vrot.slane %v1898_v56, 2 }
 0x5f9   :  { %v1959_v51 = vsel %vm496_vm2, %v1957_v48, %v1958_v27 }
 0x5fa   :  { %v1979_v52 = vadd.f32 %v1959_v51, %v1941_v25  ;;  %v1962_v31 = vsel %vm496_vm2, %v1960_v46, %v1961_v55 }
 0x5fb   :  { %v1980_v59 = vadd.f32 %v1962_v31, %v1942_v49 }
 0x5fc   :  { %v1902_v54 = vpop.f32.mrb[52].mxu1  ;;  %v1987_v50 = vadd.f32 %v1979_v52, %v4787_v19 }
 0x5fd   :  { %v1963_v32 = vrot.slane %v1902_v54, 2  ;;  %v1904_v11 = vpop.f32.mrb[53].mxu1  ;;  %v1988_v49 = vadd.f32 %v1980_v59, %v4791_v23 }
 0x5fe   :  { %v1965_v57 = vrot.slane %v1904_v11, 2  ;;  %v1906_v34 = vpop.f32.mrb[54].mxu1  ;;  %v1995_v52 = vmax.f32 %v1987_v50, 0.0  ;;  %v4475_v50 = vld [vmem:[%s5796_s4 + $0x8] sm:$0xff]  }
 0x5ff   :  { %v1964_v33 = vsel %vm496_vm2, %v1958_v27, %v1963_v32  ;;  %v1967_v4 = vrot.slane %v1906_v34, 2  ;;  %v1908_v24 = vpop.f32.mrb[55].mxu1 }
 0x600   :  { %v1981_v22 = vadd.f32 %v1964_v33, %v1943_v15  ;;  %v1966_v26 = vsel %vm496_vm2, %v1961_v55, %v1965_v57  ;;  %v1969_v53 = vrot.slane %v1908_v24, 2  ;;  %v4474_v24 = vld [vmem:[%s5796_s4] sm:$0xff]  }
 0x601   :  { %v1982_v48 = vadd.f32 %v1966_v26, %v1944_v0  ;;  %v1968_v25 = vsel %vm496_vm2, %v1963_v32, %v1967_v4  ;;  %v1985_v46 = vadd.f32 %v1967_v4, %v1947_v29  ;;  %v1996_v32 = vmax.f32 %v1988_v49, 0.0  ;;  %v4376_v49 = vld [vmem:[%s5797_s5 + $0x84] ss:$8 sps:$4 sm:$0xff]  }
 0x602   :  { %v1989_v28 = vadd.f32 %v1981_v22, %v4787_v19  ;;  %v1983_v58 = vadd.f32 %v1968_v25, %v1945_v16  ;;  %v1970_v56 = vsel %vm496_vm2, %v1965_v57, %v1969_v53  ;;  %v1986_v27 = vadd.f32 %v1969_v53, %v1948_v30  ;;  %v4373_v25 = vld [vmem:[%s5797_s5 + $0x74] ss:$8 sps:$4 sm:$0xff]  }
 0x603   :  { %v1993_v51 = vadd.f32 %v1985_v46, %v4787_v19  ;;  %v1984_v31 = vadd.f32 %v1970_v56, %v1946_v47  ;;  %v1990_v15 = vadd.f32 %v1982_v48, %v4791_v23  ;;  %v4371_v46 = vld [vmem:[%s5797_s5 + $0x70] ss:$8 sps:$4 sm:$0xff]  }
 0x604   :  { %v1997_v55 = vmax.f32 %v1989_v28, 0.0  ;;  %v1994_v0 = vadd.f32 %v1986_v27, %v4791_v23  ;;  %v1991_v54 = vadd.f32 %v1983_v58, %v4787_v19  ;;  %v4374_v28 = vld [vmem:[%s5797_s5 + $0x80] ss:$8 sps:$4 sm:$0xff]   ;;  %v4379_v58 = vld [vmem:[%s5797_s5 + $0x94] ss:$8 sps:$4 sm:$0xff]  }
 0x605   :  { %v2001_v29 = vmax.f32 %v1993_v51, 0.0  ;;  %v1992_v59 = vadd.f32 %v1984_v31, %v4791_v23  ;;  %v1998_v11 = vmax.f32 %v1990_v15, 0.0  ;;  %v5840_v23 = vmov 0   ;;  %v4377_v56 = vld [vmem:[%s5797_s5 + $0x90] ss:$8 sps:$4 sm:$0xff]  }
 0x606   :  { %v2002_v16 = vmax.f32 %v1994_v0, 0.0  ;;  %v2003_v34 = vpack.c.bf16 %v1997_v55, %v1995_v52  ;;  %v1999_v57 = vmax.f32 %v1991_v54, 0.0  ;;  %v4382_v27 = vld [vmem:[%s5797_s5 + $0xa4] ss:$8 sps:$4 sm:$0xff]   ;;  %v4380_v51 = vld [vmem:[%s5797_s5 + $0xa0] ss:$8 sps:$4 sm:$0xff]  }
 0x607   :  { %v2000_v30 = vmax.f32 %v1992_v59, 0.0  ;;  %v2004_v33 = vpack.c.bf16 %v1998_v11, %v1996_v32  ;;  %v4383_v31 = vld [vmem:[%s5797_s5 + $0xb4] ss:$8 sps:$4 sm:$0x1f]   ;;  %v4388_v55 = vld [vmem:[%s5797_s5 + $0x4] ss:$8 sps:$4 sm:$0xff]  }
 0x608   :  { %v2005_v4 = vpack.c.bf16 %v2001_v29, %v1999_v57  ;;  %v4385_v15 = vld [vmem:[%s5797_s5 + $0xb0] ss:$8 sps:$4 sm:$0x1f]  }
 0x609   :  { %v2006_v47 = vpack.c.bf16 %v2002_v16, %v2000_v30  ;;  %2013 = vmatprep.subr.bf16.mxu0 %v2004_v33  ;;  %2056 = vmatprep.subr.bf16.mxu1 %v2004_v33  ;;  %v2286_v52 = vsel %vm1001_vm6, %v4385_v15, 0 }
 0x60a   :  { %2014 = vmatpush1.bf16.msra.mxu0 %v2003_v34  ;;  %2057 = vmatpush1.bf16.msra.mxu1 %v2003_v34  ;;  %v2008_v19 = vsel %vm457_vm1, %v2005_v4, 0 }
 0x60b   :  { %3804 = vmatprep.subr.msk.bf16.mxu0 %vm457_vm1, %v2006_v47  ;;  %3806 = vmatprep.subr.msk.bf16.mxu1 %vm457_vm1, %v2006_v47  ;;  %vm2828_vm1 = vcmask 785408  }
 0x60e   :  { %2016 = vmatpush1.bf16.msra.mxu0 %v2008_v19  ;;  %2059 = vmatpush1.bf16.msra.mxu1 %v2008_v19 }
 0x60f   :  { %2108 = vmatprep.subr.bf16.mxu0 %v5840_v23  ;;  %2149 = vmatprep.subr.bf16.mxu1 %v5840_v23 }
 0x611   :  { %3805 = vmatmul.mubr.msk.bf16.vlgmr.msra.gmra.mrb[28].mxu0 %vm563_vm3, %v4810_v60  ;;  %3807 = vmatmul.mubr.msk.bf16.vlgmr.msra.gmra.mrb[56].mxu1 %vm563_vm3, %v4819_v61  ;;  %v4476_v60 = vld [vmem:[%s5796_s4 + $0x10] sm:$0xff]   ;;  %v4477_v61 = vld [vmem:[%s5796_s4 + $0x18] sm:$0xff]  }
 0x612   :  { %2109 = vmatpush1.bf16.msra.mxu0 %v4474_v24  ;;  %2150 = vmatpush1.bf16.msra.mxu1 %v4824_v62  ;;  %v4478_v62 = vld [vmem:[%s5796_s4 + $0x20] sm:$0xff]  }
 0x613   :  { %2110 = vmatprep.subr.bf16.mxu0 %v5840_v23  ;;  %2151 = vmatprep.subr.bf16.mxu1 %v5840_v23  ;;  %v4386_v24 = vld [vmem:[%s5797_s5] ss:$8 sps:$4 sm:$0xff]  }
 0x616   :  { %2111 = vmatpush1.bf16.msra.mxu0 %v4475_v50  ;;  %2152 = vmatpush1.bf16.msra.mxu1 %v4833_v63  ;;  %v4479_v63 = vld [vmem:[%s5796_s4 + $0x28] sm:$0xff]  }
 0x617   :  { %2112 = vmatprep.subr.bf16.mxu0 %v5840_v23  ;;  %2153 = vmatprep.subr.bf16.mxu1 %v5840_v23 }
 0x61a   :  { %2113 = vmatpush1.bf16.msra.mxu0 %v4476_v60  ;;  %2154 = vmatpush1.bf16.msra.mxu1 %v4840_v1  ;;  %v4480_v1 = vld [vmem:[%s5796_s4 + $0x30] sm:$0xff]  }
 0x61b   :  { %2114 = vmatprep.subr.bf16.mxu0 %v5840_v23  ;;  %2155 = vmatprep.subr.bf16.mxu1 %v5840_v23  ;;  %v4391_v60 = vld [vmem:[%s5797_s5 + $0x14] ss:$8 sps:$4 sm:$0xff]  }
 0x61e   :  { %2115 = vmatpush1.bf16.msra.mxu0 %v4477_v61  ;;  %2156 = vmatpush1.bf16.msra.mxu1 %v4847_v2  ;;  %v4481_v2 = vld [vmem:[%s5796_s4 + $0x38] sm:$0xff]  }
 0x61f   :  { %2116 = vmatprep.subr.bf16.mxu0 %v5840_v23  ;;  %2157 = vmatprep.subr.bf16.mxu1 %v5840_v23  ;;  %v4389_v61 = vld [vmem:[%s5797_s5 + $0x10] ss:$8 sps:$4 sm:$0xff]  }
 0x622   :  { %2117 = vmatpush1.bf16.msra.mxu0 %v4478_v62  ;;  %2158 = vmatpush1.bf16.msra.mxu1 %v4854_v3  ;;  %v4370_v3 = vld [vmem:[%s5797_s5 + $0x64] ss:$8 sps:$4 sm:$0xff]  }
 0x623   :  { %2118 = vmatprep.subr.bf16.mxu0 %v5840_v23  ;;  %2159 = vmatprep.subr.bf16.mxu1 %v5840_v23  ;;  %v4394_v62 = vld [vmem:[%s5797_s5 + $0x24] ss:$8 sps:$4 sm:$0xff]  }
 0x626   :  { %2119 = vmatpush1.bf16.msra.mxu0 %v4479_v63  ;;  %2160 = vmatpush1.bf16.msra.mxu1 %v4861_v5  ;;  %v4392_v63 = vld [vmem:[%s5797_s5 + $0x20] ss:$8 sps:$4 sm:$0xff]  }
 0x627   :  { %2120 = vmatprep.subr.bf16.mxu0 %v5840_v23  ;;  %2161 = vmatprep.subr.bf16.mxu1 %v5840_v23 }
 0x62a   :  { %2121 = vmatpush1.bf16.msra.mxu0 %v4480_v1  ;;  %2162 = vmatpush1.bf16.msra.mxu1 %v4868_v6  ;;  %v4397_v1 = vld [vmem:[%s5797_s5 + $0x34] ss:$8 sps:$4 sm:$0xff]  }
 0x62b   :  { %2122 = vmatprep.subr.bf16.mxu0 %v5840_v23  ;;  %2163 = vmatprep.subr.bf16.mxu1 %v5840_v23 }
 0x62e   :  { %2123 = vmatpush1.bf16.msra.mxu0 %v4481_v2  ;;  %2164 = vmatpush1.bf16.msra.mxu1 %v4875_v7  ;;  %v4395_v2 = vld [vmem:[%s5797_s5 + $0x30] ss:$8 sps:$4 sm:$0xff]  }
 0x62f   :  { %2124 = vmatprep.subr.bf16.mxu0 %v5840_v23  ;;  %2165 = vmatprep.subr.bf16.mxu1 %v5840_v23 }
 0x632   :  { %2125 = vmatpush1.bf16.msra.mxu0 %v4883_v8  ;;  %2166 = vmatpush1.bf16.msra.mxu1 %v4888_v9 }
 0x633   :  { %2126 = vmatprep.subr.bf16.mxu0 %v5840_v23  ;;  %2167 = vmatprep.subr.bf16.mxu1 %v5840_v23 }
 0x636   :  { %2127 = vmatpush1.bf16.msra.mxu0 %v4897_v10  ;;  %2168 = vmatpush1.bf16.msra.mxu1 %v4902_v12 }
 0x637   :  { %2128 = vmatprep.subr.bf16.mxu0 %v5840_v23  ;;  %2169 = vmatprep.subr.bf16.mxu1 %v5840_v23 }
 0x63a   :  { %2129 = vmatpush1.bf16.msra.mxu0 %v4911_v13  ;;  %2170 = vmatpush1.bf16.msra.mxu1 %v4916_v14 }
 0x63b   :  { %2130 = vmatprep.subr.bf16.mxu0 %v5840_v23  ;;  %2171 = vmatprep.subr.bf16.mxu1 %v5840_v23 }
 0x63e   :  { %2131 = vmatpush1.bf16.msra.mxu0 %v4928_v18  ;;  %2172 = vmatpush1.bf16.msra.mxu1 %v4930_v20  ;;  %v4368_v20 = vld [vmem:[%s5797_s5 + $0x60] ss:$8 sps:$4 sm:$0xff]  }
 0x63f   :  { %2291 = vmatprep.subr.bf16.mxu0 %v4370_v3  ;;  %v4400_v3 = vld [vmem:[%s5797_s5 + $0x44] ss:$8 sps:$4 sm:$0xff]  }
 0x6e4   :  { %v2047_v5 = vpop.f32.mrb[28].mxu0  ;;  %v2090_v6 = vpop.f32.mrb[56].mxu1 }
 0x6e5   :  { %v2099_v7 = vmax.f32 %v2047_v5, %v2090_v6  ;;  %v2049_v8 = vpop.f32.mrb[29].mxu0  ;;  %v2092_v9 = vpop.f32.mrb[57].mxu1  ;;  %v4398_v5 = vld [vmem:[%s5797_s5 + $0x40] ss:$8 sps:$4 sm:$0xff]  }
 0x6e6   :  { %v2100_v10 = vmax.f32 %v2049_v8, %v2092_v9  ;;  %v2051_v12 = vpop.f32.mrb[30].mxu0  ;;  %v2094_v13 = vpop.f32.mrb[58].mxu1  ;;  %v4401_v6 = vld [vmem:[%s5797_s5 + $0x54] ss:$8 sps:$4 sm:$0x1f]  }
 0x6e7   :  { %v2101_v14 = vmax.f32 %v2051_v12, %v2094_v13  ;;  %v2053_v22 = vpop.f32.mrb[31].mxu0  ;;  %v2096_v26 = vpop.f32.mrb[59].mxu1  ;;  %v4406_v9 = vld [vmem:[%s5797_s5 + $0xc4] ss:$8 sps:$4 sm:$0xff]   ;;  %v4409_v12 = vld [vmem:[%s5797_s5 + $0xd4] ss:$8 sps:$4 sm:$0xff]  }
 0x6e8   :  { %v2102_v53 = vmax.f32 %v2053_v22, %v2096_v26  ;;  %v4407_v13 = vld [vmem:[%s5797_s5 + $0xd0] ss:$8 sps:$4 sm:$0xff]   ;;  %v4410_v22 = vld [vmem:[%s5797_s5 + $0xe0] ss:$8 sps:$4 sm:$0xff]   ;;  %v4415_v26 = vld [vmem:[%s5797_s5 + $0xf4] ss:$8 sps:$4 sm:$0xff]  }
 0x6e9   :  { %v2103_v18 = vpack.c.bf16 %v2101_v14, %v2099_v7  ;;  %v4403_v7 = vld [vmem:[%s5797_s5 + $0x50] ss:$8 sps:$4 sm:$0x1f]   ;;  %v4412_v14 = vld [vmem:[%s5797_s5 + $0xe4] ss:$8 sps:$4 sm:$0xff]  }
 0x6ea   :  { %v2104_v48 = vpack.c.bf16 %v2102_v53, %v2100_v10  ;;  %v2395_v8 = vsel %vm1001_vm6, %v4403_v7, 0  ;;  %v4404_v10 = vld [vmem:[%s5797_s5 + $0xc0] ss:$8 sps:$4 sm:$0xff]   ;;  %v4413_v53 = vld [vmem:[%s5797_s5 + $0xf0] ss:$8 sps:$4 sm:$0xff]  }
 0x6eb   :  { %v4425_v7 = vld [vmem:[%s5801_s9 + $0x98] sm:$0xff]  }
 0x6ec   :  { %3808 = vmatprep.mubr.msk.bf16.mxu0 %vm742_vm5, %v2104_v48  ;;  %3809 = vmatprep.mubr.msk.bf16.mxu1 %vm742_vm5, %v2104_v48  ;;  %v4416_v48 = vld [vmem:[%s5797_s5 + $0x100] ss:$8 sps:$4 sm:$0xff]  }
 0x6ed   :  { %2141 = vmatmul.mubr.bf16.vlgmr.msra.gmra.mrb[32].mxu0 %v2103_v18  ;;  %2182 = vmatmul.mubr.bf16.vlgmr.msra.gmra.mrb[60].mxu1 %v2103_v18  ;;  %v4418_v18 = vld [vmem:[%s5797_s5 + $0x104] ss:$8 sps:$4 sm:$0xff]  }
 0x6ee   :  { %2292 = vmatpush1.bf16.msra.mxu0 %v4368_v20  ;;  %2323 = vmatprep.mubr.bf16.mxu0 %v5840_v23  ;;  %v4419_v20 = vld [vmem:[%s5797_s5 + $0x114] ss:$8 sps:$4 sm:$0x1f]  }
 0x6ef   :  { %2293 = vmatprep.subr.bf16.mxu0 %v4373_v25  ;;  %2619 = vmatprep.mubr.bf16.mxu1 %v5840_v23  ;;  %v4421_v25 = vld [vmem:[%s5797_s5 + $0x110] ss:$8 sps:$4 sm:$0x1f]  }
 0x6f2   :  { %2294 = vmatpush1.bf16.msra.mxu0 %v4371_v46  ;;  %v2519_v46 = vsel %vm1001_vm6, %v4421_v25, 0 }
 0x6f3   :  { %2295 = vmatprep.subr.bf16.mxu0 %v4376_v49 }
 0x6f6   :  { %2296 = vmatpush1.bf16.msra.mxu0 %v4374_v28 }
 0x6f7   :  { %2297 = vmatprep.subr.bf16.mxu0 %v4379_v58 }
 0x6fa   :  { %2298 = vmatpush1.bf16.msra.mxu0 %v4377_v56 }
 0x6fb   :  { %2299 = vmatprep.subr.bf16.mxu0 %v4382_v27 }
 0x6fe   :  { %2300 = vmatpush1.bf16.msra.mxu0 %v4380_v51 }
 0x6ff   :  { %3834 = vmatprep.subr.msk.bf16.mxu0 %vm1001_vm6, %v4383_v31 }
 0x702   :  { %2302 = vmatpush1.bf16.msra.mxu0 %v2286_v52 }
 0x703   :  { %2400 = vmatprep.subr.bf16.mxu0 %v4388_v55 }
 0x7c0   :  { %v2142_v0 = vpop.f32.mrb[32].mxu0  ;;  %v2183_v54 = vpop.f32.mrb[60].mxu1 }
 0x7c1   :  { %v2190_v29 = vmax.f32 %v2142_v0, %v2183_v54  ;;  %v2144_v59 = vpop.f32.mrb[33].mxu0  ;;  %v2185_v32 = vpop.f32.mrb[61].mxu1 }
 0x7c2   :  { %v2145_v11 = vpop.f32.mrb[34].mxu0  ;;  %v2186_v16 = vpop.f32.mrb[62].mxu1 }
 0x7c3   :  { %v2191_v34 = vmax.f32 %v2145_v11, %v2186_v16  ;;  %v2147_v57 = vpop.f32.mrb[35].mxu0  ;;  %v2188_v30 = vpop.f32.mrb[63].mxu1 }
 0x7c4   :  { %v4482_v30 = vld [vmem:[%s5800_s8 + $0x68] sm:$0xff]  }
 0x7c5   :  { %v2192_v33 = vpack.c.bf16 %v2191_v34, %v2190_v29 }
 0x7c7   :  { %v2220_v4 = vshll.u32 %v2192_v33, 16  ;;  %v2218_v47 = vshrl.u32 %v2192_v33, 16  ;;  %v2456_v49 = vrot.slane %v2192_v33, 1 }
 0x7c9   :  { %v2222_v19 = vrot.slane %v2220_v4, 1  ;;  %v4484_v4 = vld [vmem:[%s5800_s8 + $0x78] sm:$0xff]  }
 0x7cb   :  { %v2223_v50 = vor.u32 %v2222_v19, %v2218_v47  ;;  %v5845_v47 = vld [vmem:[#allocation13_spill] sm:$0xff]  ;;  %v5846_v19 = vld [vmem:[#allocation14_spill] sm:$0xff] }
 0x7cd   :  { %3835 = vmatmul.mubr.msk.bf16.vlgmr.msra.gmra.mrb[36].mxu0 %vm997_vm7, %v2223_v50  ;;  %v5848_v50 = vld [vmem:[#allocation16_spill] sm:$0xff] }
 0x7ce   :  { %2401 = vmatpush1.bf16.msra.mxu0 %v4386_v24  ;;  %2432 = vmatprep.mubr.bf16.mxu0 %v5840_v23  ;;  %v5847_v24 = vld [vmem:[#allocation15_spill] sm:$0xff] }
 0x7cf   :  { %2402 = vmatprep.subr.bf16.mxu0 %v4391_v60  ;;  %v5849_v60 = vld [vmem:[#allocation17_spill] sm:$0xff] }
 0x7d2   :  { %2403 = vmatpush1.bf16.msra.mxu0 %v4389_v61  ;;  %v5850_v61 = vld [vmem:[#allocation18_spill] sm:$0xff] }
 0x7d3   :  { %2404 = vmatprep.subr.bf16.mxu0 %v4394_v62  ;;  %v5851_v62 = vld [vmem:[#allocation20_spill] sm:$0xff] }
 0x7d6   :  { %2405 = vmatpush1.bf16.msra.mxu0 %v4392_v63  ;;  %v5852_v63 = vld [vmem:[#allocation22_spill] sm:$0xff] }
 0x7d7   :  { %2406 = vmatprep.subr.bf16.mxu0 %v4397_v1  ;;  %v5853_v1 = vld [vmem:[#allocation24_spill] sm:$0xff] }
 0x7da   :  { %2407 = vmatpush1.bf16.msra.mxu0 %v4395_v2  ;;  %v5854_v2 = vld [vmem:[#allocation26_spill] sm:$0xff] }
 0x7db   :  { %2408 = vmatprep.subr.bf16.mxu0 %v4400_v3  ;;  %v4422_v3 = vld [vmem:[%s5801_s9 + $0x30] sm:$0xff]  }
 0x7de   :  { %2409 = vmatpush1.bf16.msra.mxu0 %v4398_v5  ;;  %v4423_v5 = vld [vmem:[%s5801_s9 + $0x90] sm:$0xff]  }
 0x7df   :  { %3848 = vmatprep.subr.msk.bf16.mxu0 %vm1001_vm6, %v4401_v6  ;;  %v4587_v6 = vmov 0.0  }
 0x7e2   :  { %2411 = vmatpush1.bf16.msra.mxu0 %v2395_v8  ;;  %v4426_v8 = vld [vmem:[%s5801_s9 + $0x40] sm:$0xff]  }
 0x7e3   :  { %2524 = vmatprep.subr.bf16.mxu0 %v4406_v9  ;;  %v4427_v9 = vld [vmem:[%s5801_s9 + $0xa0] sm:$0xff]  }
 0x7e5   :  { %3849 = vmatmul.mubr.msk.bf16.vlgmr.msra.gmra.mrb[36].mxu0 %vm997_vm7, %v2192_v33  ;;  %v4483_v33 = vld [vmem:[%s5800_s8 + $0x70] sm:$0xff]  }
 0x7e6   :  { %2525 = vmatpush1.bf16.msra.mxu0 %v4404_v10  ;;  %2556 = vmatprep.mubr.bf16.mxu0 %v5840_v23  ;;  %v4428_v10 = vld [vmem:[%s5801_s9 + $0x48] sm:$0xff]  }
 0x7e7   :  { %2526 = vmatprep.subr.bf16.mxu0 %v4409_v12  ;;  %v4429_v12 = vld [vmem:[%s5801_s9 + $0xa8] sm:$0xff]  }
 0x7ea   :  { %2527 = vmatpush1.bf16.msra.mxu0 %v4407_v13  ;;  %v4430_v13 = vld [vmem:[%s5801_s9 + $0x50] sm:$0xff]  }
 0x7eb   :  { %2528 = vmatprep.subr.bf16.mxu0 %v4412_v14  ;;  %v4431_v14 = vld [vmem:[%s5801_s9 + $0xb0] sm:$0xff]  }
 0x7ee   :  { %2529 = vmatpush1.bf16.msra.mxu0 %v4410_v22  ;;  %v4432_v22 = vld [vmem:[%s5801_s9 + $0x58] sm:$0xff]  }
 0x7ef   :  { %2530 = vmatprep.subr.bf16.mxu0 %v4415_v26  ;;  %v4433_v26 = vld [vmem:[%s5801_s9 + $0xb8] sm:$0xff]  }
 0x7f2   :  { %2531 = vmatpush1.bf16.msra.mxu0 %v4413_v53 }
 0x7f3   :  { %2532 = vmatprep.subr.bf16.mxu0 %v4418_v18 }
 0x7f6   :  { %2533 = vmatpush1.bf16.msra.mxu0 %v4416_v48 }
 0x7f7   :  { %3874 = vmatprep.subr.msk.bf16.mxu0 %vm1001_vm6, %v4419_v20 }
 0x7fa   :  { %2535 = vmatpush1.bf16.msra.mxu0 %v2519_v46 }
 0x7fb   :  { %4063 = vmatprep.subr.bf16.mxu0 %v4587_v6 }
 0x7fd   :  { %3875 = vmatmul.mubr.msk.bf16.vlgmr.msra.gmra.mrb[36].mxu0 %vm997_vm7, %v2456_v49 }
 0x7fe   :  { %4064 = vmatpush3.bf16.msra.mxu0 %v4422_v3  ;;  %4075 = vmatprep.mubr.msk.bf16.mxu0 %vm4588_vm0, %v4587_v6  ;;  %v4464_v3 = vld [vmem:[#allocation6 + $0x30] sm:$0xff]  }
 0x7ff   :  { %4065 = vmatprep.subr.bf16.mxu0 %v4587_v6 }
 0x8d0   :  { %v2558_v28 = vpop.f32.mrb[36].mxu0 }
 0x8d1   :  { %v2571_v58 = vadd.f32 %v2558_v28, %v5117_v17  ;;  %v2560_v56 = vpop.f32.mrb[37].mxu0 }
 0x8d2   :  { %v2572_v27 = vadd.f32 %v2560_v56, %v5121_v21  ;;  %v2562_v51 = vpop.f32.mrb[38].mxu0  ;;  %v4434_v56 = vld [vmem:[%s5801_s9] sm:$0xff]  }
 0x8d3   :  { %v2573_v31 = vadd.f32 %v2562_v51, %v5117_v17  ;;  %v2564_v15 = vpop.f32.mrb[39].mxu0  ;;  %v2575_v55 = vmax.f32 %v2571_v58, 0.0  ;;  %v5841_v17 = vld [vmem:[#allocation19_spill] sm:$0xff] }
 0x8d4   :  { %v2574_v52 = vadd.f32 %v2564_v15, %v5121_v21  ;;  %v2576_v54 = vmax.f32 %v2572_v27, 0.0  ;;  %v5842_v21 = vld [vmem:[#allocation21_spill] sm:$0xff] }
 0x8d5   :  { %v2577_v0 = vmax.f32 %v2573_v31, 0.0  ;;  %v4435_v31 = vld [vmem:[%s5801_s9 + $0xf0] sm:$0xff]  }
 0x8d6   :  { %v2578_v29 = vmax.f32 %v2574_v52, 0.0 }
 0x8d7   :  { %v2579_v59 = vpack.c.bf16 %v2577_v0, %v2575_v55  ;;  %v4436_v55 = vld [vmem:[%s5801_s9 + $0x8] sm:$0xff]   ;;  %v4437_v0 = vld [vmem:[%s5801_s9 + $0xf8] sm:$0xff]  }
 0x8d8   :  { %v2580_v32 = vpack.c.bf16 %v2578_v29, %v2576_v54  ;;  %v4438_v54 = vld [vmem:[%s5801_s9 + $0x10] sm:$0xff]   ;;  %v4439_v29 = vld [vmem:[%s5801_s9 + $0x100] sm:$0xff]  }
 0x8d9   :  { %v2582_v11 = vsel %vm496_vm2, %v2579_v59, 0  ;;  %v4440_v59 = vld [vmem:[%s5801_s9 + $0x18] sm:$0xff]  }
 0x8da   :  { %3876 = vmatprep.subr.msk.bf16.mxu1 %vm496_vm2, %v2580_v32 }
 0x8db   :  { %2588 = vmatpush1.bf16.msra.mxu1 %v2582_v11 }
 0x8dc   :  { %3878 = vmatprep.subr.msk.bf16.mxu1 %vm496_vm2, %v2580_v32  ;;  %v4441_v32 = vld [vmem:[%s5801_s9 + $0x108] sm:$0xff]  }
 0x8de   :  { %3877 = vmatmul.mubr.msk.bf16.vlgmr.msra.gmra.mrb[64].mxu1 %vm1310_vm8, %v5132_v35  ;;  %v5843_v35 = vld [vmem:[#allocation23_spill] sm:$0xff] }
 0x8df   :  { %2629 = vmatpush1.bf16.msra.mxu1 %v2582_v11  ;;  %2660 = vmatprep.mubr.bf16.mxu1 %v5840_v23  ;;  %v4442_v11 = vld [vmem:[%s5801_s9 + $0x20] sm:$0xff]  }
 0x8e0   :  { %2676 = vmatprep.subr.bf16.mxu1 %v5840_v23 }
 0x8e6   :  { %3879 = vmatmul.mubr.msk.bf16.vlgmr.msra.gmra.mrb[68].mxu1 %vm1310_vm8, %v5142_v36  ;;  %v5844_v36 = vld [vmem:[#allocation25_spill] sm:$0xff] }
 0x8e7   :  { %2677 = vmatpush1.bf16.msra.mxu1 %v5147_v37 }
 0x8e8   :  { %2678 = vmatprep.subr.bf16.mxu1 %v5840_v23 }
 0x8eb   :  { %2679 = vmatpush1.bf16.msra.mxu1 %v5155_v38 }
 0x8ec   :  { %2680 = vmatprep.subr.bf16.mxu1 %v5840_v23 }
 0x8ef   :  { %2681 = vmatpush1.bf16.msra.mxu1 %v5162_v39 }
 0x8f0   :  { %2682 = vmatprep.subr.bf16.mxu1 %v5840_v23 }
 0x8f3   :  { %2683 = vmatpush1.bf16.msra.mxu1 %v5169_v40 }
 0x8f4   :  { %2684 = vmatprep.subr.bf16.mxu1 %v5840_v23 }
 0x8f7   :  { %2685 = vmatpush1.bf16.msra.mxu1 %v5176_v41 }
 0x8f8   :  { %2686 = vmatprep.subr.bf16.mxu1 %v5840_v23 }
 0x8fb   :  { %2687 = vmatpush1.bf16.msra.mxu1 %v5183_v42 }
 0x8fc   :  { %2688 = vmatprep.subr.bf16.mxu1 %v5840_v23 }
 0x8ff   :  { %2689 = vmatpush1.bf16.msra.mxu1 %v5190_v43 }
 0x900   :  { %2690 = vmatprep.subr.bf16.mxu1 %v5840_v23 }
 0x903   :  { %2691 = vmatpush1.bf16.msra.mxu1 %v5197_v44 }
 0x904   :  { %2692 = vmatprep.subr.bf16.mxu1 %v5840_v23 }
 0x907   :  { %2693 = vmatpush1.bf16.msra.mxu1 %v5204_v45 }
 0x908   :  { %2694 = vmatprep.subr.bf16.mxu1 %v5840_v23 }
 0x90b   :  { %2695 = vmatpush1.bf16.msra.mxu1 %v5841_v17  ;;  %v4443_v17 = vld [vmem:[%s5801_s9 + $0x110] sm:$0xff]  }
 0x90c   :  { %2696 = vmatprep.subr.bf16.mxu1 %v5840_v23 }
 0x90f   :  { %2697 = vmatpush1.bf16.msra.mxu1 %v5842_v21  ;;  %v4444_v21 = vld [vmem:[%s5801_s9 + $0x28] sm:$0xff]  }
 0x910   :  { %2698 = vmatprep.subr.bf16.mxu1 %v5840_v23 }
 0x913   :  { %2699 = vmatpush1.bf16.msra.mxu1 %v5843_v35  ;;  %v4445_v35 = vld [vmem:[%s5801_s9 + $0x118] sm:$0xff]  }
 0x914   :  { %2700 = vmatprep.subr.bf16.mxu1 %v5840_v23 }
 0x917   :  { %2701 = vmatpush1.bf16.msra.mxu1 %v5844_v36 }
 0x918   :  { %2716 = vmatprep.subr.bf16.mxu1 %v5840_v23 }
 0x9b1   :  { %v2621_v37 = vpop.f32.mrb[64].mxu1 }
 0x9b2   :  { %v2623_v38 = vpop.f32.mrb[65].mxu1 }
 0x9b3   :  { %v2625_v39 = vpop.f32.mrb[66].mxu1 }
 0x9b4   :  { %v2626_v40 = vpop.f32.mrb[67].mxu1 }
 0x9b9   :  { %v2662_v41 = vpop.f32.mrb[68].mxu1 }
 0x9ba   :  { %v2669_v42 = vmax.f32 %v2621_v37, %v2662_v41  ;;  %v2664_v43 = vpop.f32.mrb[69].mxu1  ;;  %v4447_v41 = vld [vmem:[%s5801_s9 + $0x68] sm:$0xff]  }
 0x9bb   :  { %v2670_v44 = vmax.f32 %v2623_v38, %v2664_v43  ;;  %v2666_v45 = vpop.f32.mrb[70].mxu1  ;;  %v4446_v38 = vld [vmem:[%s5801_s9 + $0x60] sm:$0xff]   ;;  %v4449_v43 = vld [vmem:[%s5801_s9 + $0x78] sm:$0xff]  }
 0x9bc   :  { %v2667_v16 = vpop.f32.mrb[71].mxu1  ;;  %v2671_v57 = vpack.c.bf16 %v2669_v42, %v2669_v42  ;;  %v4448_v42 = vld [vmem:[%s5801_s9 + $0x70] sm:$0xff]   ;;  %v4451_v45 = vld [vmem:[%s5801_s9 + $0x88] sm:$0xff]  }
 0x9bd   :  { %v2672_v34 = vpack.c.bf16 %v2670_v44, %v2670_v44  ;;  %v4450_v44 = vld [vmem:[%s5801_s9 + $0x80] sm:$0xff]  }
 0x9bf   :  { %3880 = vmatprep.mubr.msk.bf16.mxu1 %vm1487_vm9, %v2672_v34 }
 0x9c0   :  { %2709 = vmatmul.mubr.bf16.vlgmr.msra.gmra.mrb[72].mxu1 %v2671_v57 }
 0x9c1   :  { %2717 = vmatpush1.bf16.msra.mxu1 %v4482_v30  ;;  %3881 = vmatprep.mubr.msk.bf16.mxu1 %vm1487_vm9, %v2672_v34  ;;  %v4452_v34 = vld [vmem:[%s5801_s9 + $0xc0] sm:$0xff]   ;;  %v4453_v30 = vld [vmem:[%s5801_s9 + $0xc8] sm:$0xff]  }
 0x9c2   :  { %2718 = vmatprep.subr.bf16.mxu1 %v5840_v23 }
 0x9c5   :  { %2719 = vmatpush1.bf16.msra.mxu1 %v4483_v33  ;;  %v4454_v33 = vld [vmem:[%s5801_s9 + $0xd0] sm:$0xff]  }
 0x9c6   :  { %2720 = vmatprep.subr.bf16.mxu1 %v5840_v23 }
 0x9c9   :  { %2721 = vmatpush1.bf16.msra.mxu1 %v4484_v4  ;;  %v4455_v4 = vld [vmem:[%s5801_s9 + $0xd8] sm:$0xff]  }
 0x9ca   :  { %2722 = vmatprep.subr.bf16.mxu1 %v5840_v23 }
 0x9cd   :  { %2723 = vmatpush1.bf16.msra.mxu1 %v5845_v47  ;;  %v4456_v47 = vld [vmem:[%s5801_s9 + $0xe0] sm:$0xff]  }
 0x9ce   :  { %2724 = vmatprep.subr.bf16.mxu1 %v5840_v23 }
 0x9d1   :  { %2725 = vmatpush1.bf16.msra.mxu1 %v5846_v19  ;;  %v4457_v19 = vld [vmem:[%s5801_s9 + $0xe8] sm:$0xff]  }
 0x9d2   :  { %2726 = vmatprep.subr.bf16.mxu1 %v5840_v23 }
 0x9d5   :  { %2727 = vmatpush1.bf16.msra.mxu1 %v5847_v24 }
 0x9d6   :  { %2728 = vmatprep.subr.bf16.mxu1 %v5840_v23 }
 0x9d9   :  { %2729 = vmatpush1.bf16.msra.mxu1 %v5848_v50 }
 0x9da   :  { %2730 = vmatprep.subr.bf16.mxu1 %v5840_v23 }
 0x9dd   :  { %2731 = vmatpush1.bf16.msra.mxu1 %v5849_v60  ;;  %v4458_v60 = vld [vmem:[#allocation6] sm:$0xff]  }
 0x9de   :  { %2732 = vmatprep.subr.bf16.mxu1 %v5840_v23 }
 0x9e1   :  { %2733 = vmatpush1.bf16.msra.mxu1 %v5850_v61  ;;  %v4459_v61 = vld [vmem:[#allocation6 + $0x8] sm:$0xff]  }
 0x9e2   :  { %2734 = vmatprep.subr.bf16.mxu1 %v5840_v23 }
 0x9e5   :  { %2735 = vmatpush1.bf16.msra.mxu1 %v5851_v62  ;;  %v4460_v62 = vld [vmem:[#allocation6 + $0x10] sm:$0xff]  }
 0x9e6   :  { %2736 = vmatprep.subr.bf16.mxu1 %v5840_v23 }
 0x9e9   :  { %2737 = vmatpush1.bf16.msra.mxu1 %v5852_v63  ;;  %v4461_v63 = vld [vmem:[#allocation6 + $0x18] sm:$0xff]  }
 0x9ea   :  { %2738 = vmatprep.subr.bf16.mxu1 %v5840_v23 }
 0x9ed   :  { %2739 = vmatpush1.bf16.msra.mxu1 %v5853_v1  ;;  %v4462_v1 = vld [vmem:[#allocation6 + $0x20] sm:$0xff]  }
 0x9ee   :  { %2740 = vmatprep.subr.bf16.mxu1 %v5840_v23  ;;  %v4424_v23 = vld [vmem:[%s5801_s9 + $0x38] sm:$0xff]  }
 0x9ef   :  { %4066 = vmatpush3.bf16.msra.mxu0 %v4424_v23  ;;  %v4466_v23 = vld [vmem:[#allocation8] sm:$0xff]  }
 0x9f0   :  { %4067 = vmatprep.subr.bf16.mxu0 %v4587_v6 }
 0x9f1   :  { %2741 = vmatpush1.bf16.msra.mxu1 %v5854_v2  ;;  %v4463_v2 = vld [vmem:[#allocation6 + $0x28] sm:$0xff]  }
 0x9f2   :  { %4111 = vmatprep.subr.bf16.mxu1 %v4587_v6 }
 0x9f3   :  { %4068 = vmatpush3.bf16.msra.mxu0 %v4426_v8  ;;  %v4468_v8 = vld [vmem:[#allocation8 + $0x10] sm:$0xff]  }
 0x9f4   :  { %2749 = vmatmul.mubr.bf16.vlgmr.msra.gmra.mrb[76].mxu1 %v2671_v57  ;;  %4069 = vmatprep.subr.bf16.mxu0 %v4587_v6 }
 0x9f5   :  { %4112 = vmatpush3.bf16.msra.mxu1 %v4423_v5  ;;  %4123 = vmatprep.mubr.msk.bf16.mxu1 %vm4588_vm0, %v4587_v6  ;;  %v4465_v5 = vld [vmem:[#allocation6 + $0x38] sm:$0xff]  }
 0x9f6   :  { %4113 = vmatprep.subr.bf16.mxu1 %v4587_v6 }
 0x9f7   :  { %4070 = vmatpush3.bf16.msra.mxu0 %v4428_v10  ;;  %v4470_v10 = vld [vmem:[#allocation8 + $0x20] sm:$0xff]  }
 0x9f8   :  { %4071 = vmatprep.subr.bf16.mxu0 %v4587_v6 }
 0x9f9   :  { %4114 = vmatpush3.bf16.msra.mxu1 %v4425_v7  ;;  %v4467_v7 = vld [vmem:[#allocation8 + $0x8] sm:$0xff]  }
 0x9fa   :  { %4115 = vmatprep.subr.bf16.mxu1 %v4587_v6 }
 0x9fb   :  { %4072 = vmatpush3.bf16.msra.mxu0 %v4430_v13 }
 0x9fc   :  { %4073 = vmatprep.subr.bf16.mxu0 %v4587_v6 }
 0x9fd   :  { %4116 = vmatpush3.bf16.msra.mxu1 %v4427_v9  ;;  %v4469_v9 = vld [vmem:[#allocation8 + $0x18] sm:$0xff]  }
 0x9fe   :  { %4117 = vmatprep.subr.bf16.mxu1 %v4587_v6 }
 0x9ff   :  { %4074 = vmatpush3.bf16.msra.mxu0 %v4432_v22 }
 0xa00   :  { %4079 = vmatprep.subr.bf16.mxu0 %v4587_v6 }
 0xa01   :  { %4118 = vmatpush3.bf16.msra.mxu1 %v4429_v12  ;;  %v4471_v12 = vld [vmem:[#allocation8 + $0x28] sm:$0xff]  }
 0xa02   :  { %4119 = vmatprep.subr.bf16.mxu1 %v4587_v6 }
 0xa05   :  { %4120 = vmatpush3.bf16.msra.mxu1 %v4431_v14 }
 0xa06   :  { %4121 = vmatprep.subr.bf16.mxu1 %v4587_v6 }
 0xa09   :  { %4122 = vmatpush3.bf16.msra.mxu1 %v4433_v26 }
 0xa0a   :  { %4143 = vmatprep.subr.bf16.mxu1 %v4587_v6 }
 0xa93   :  { %v2710_v53 = vpop.f32.mrb[72].mxu1 }
 0xa94   :  { %v2712_v18 = vpop.f32.mrb[73].mxu1 }
 0xa95   :  { %v2713_v48 = vpop.f32.mrb[74].mxu1 }
 0xa96   :  { %v2714_v20 = vpop.f32.mrb[75].mxu1 }
 0xac7   :  { %v2750_v25 = vpop.f32.mrb[76].mxu1 }
 0xac8   :  { %v2756_v46 = vmax.f32 %v2710_v53, %v2750_v25  ;;  %v2752_v49 = vpop.f32.mrb[77].mxu1 }
 0xac9   :  { %v2753_v28 = vpop.f32.mrb[78].mxu1 }
 0xaca   :  { %2757 = vst.msk [vmem:[#allocation2 + $0x1] sm:$0x1] %vm1650_vm10, %v2756_v46  ;;  %v2754_v58 = vpop.f32.mrb[79].mxu1 }
 0xacb   :  { %2758 = vst.msk [vmem:[#allocation2 + $0x2] sm:$0x2] %vm1653_vm11, %v2756_v46 }
 0xacc   :  { %2759 = vst.msk [vmem:[#allocation2 + $0x3] sm:$0x4] %vm1656_vm12, %v2756_v46 }
 0xacd   :  { %2760 = vst.msk [vmem:[#allocation2 + $0x4] sm:$0x8] %vm1659_vm13, %v2756_v46 }
 0xace   :  { %2761 = vst.msk [vmem:[#allocation2 + $0x5] sm:$0x10] %vm1662_vm14, %v2756_v46 }
 0xacf   :  { %2762 = vst.msk [vmem:[#allocation2 + $0x6] sm:$0x20] %vm1665_vm15, %v2756_v46 }
 0xad1   :  { %v2763_v36 = vld [vmem:[#allocation2] sm:$0x3] }
 0xad2   :  { %v2777_v27 = vld [vmem:[#allocation2 + $0x2] sm:$0x3]  ;;  %v2764_v39 = vpack.c.bf16 %v2763_v36, %v2763_v36 }
 0xad3   :  { %v2778_v15 = vpack.c.bf16 %v2777_v27, %v2777_v27  ;;  %v2951_v16 = vld [vmem:[#allocation2 + $0x4] sm:$0x3] }
 0xad4   :  { %v3046_v51 = vld [vmem:[#allocation2 + $0x6] sm:$0x3]  ;;  %v2952_v57 = vpack.c.bf16 %v2951_v16, %v2951_v16 }
 0xad5   :  { %v3047_v52 = vpack.c.bf16 %v3046_v51, %v3046_v51  ;;  %4076 = vmatmul.mubr.msk.bf16.vlgmr.msra.gmra.mrb[40].mxu0 %vm2828_vm1, %v2778_v15  ;;  %v3141_v24 = vld [vmem:[#allocation2 + $0x8] sm:$0x3] }
 0xad6   :  { %4080 = vmatpush3.bf16.msra.mxu0 %v4434_v56  ;;  %4091 = vmatprep.mubr.msk.bf16.mxu0 %vm4588_vm0, %v4587_v6  ;;  %v3236_v37 = vld [vmem:[#allocation2 + $0xa] sm:$0x3]  ;;  %v3142_v50 = vpack.c.bf16 %v3141_v24, %v3141_v24 }
 0xad7   :  { %4124 = vmatmul.mubr.msk.bf16.vlgmr.msra.gmra.mrb[80].mxu1 %vm2828_vm1, %v3047_v52  ;;  %4081 = vmatprep.subr.bf16.mxu0 %v4587_v6  ;;  %v3237_v40 = vpack.c.bf16 %v3236_v37, %v3236_v37 }
 0xad8   :  { %4144 = vmatpush3.bf16.msra.mxu1 %v4435_v31  ;;  %4155 = vmatprep.mubr.msk.bf16.mxu1 %vm4588_vm0, %v4587_v6 }
 0xad9   :  { %4145 = vmatprep.subr.bf16.mxu1 %v4587_v6 }
 0xada   :  { %4082 = vmatpush3.bf16.msra.mxu0 %v4436_v55 }
 0xadb   :  { %4083 = vmatprep.subr.bf16.mxu0 %v4587_v6 }
 0xadc   :  { %4146 = vmatpush3.bf16.msra.mxu1 %v4437_v0 }
 0xadd   :  { %4147 = vmatprep.subr.bf16.mxu1 %v4587_v6 }
 0xade   :  { %4084 = vmatpush3.bf16.msra.mxu0 %v4438_v54 }
 0xadf   :  { %4085 = vmatprep.subr.bf16.mxu0 %v4587_v6 }
 0xae0   :  { %4148 = vmatpush3.bf16.msra.mxu1 %v4439_v29 }
 0xae1   :  { %4149 = vmatprep.subr.bf16.mxu1 %v4587_v6 }
 0xae2   :  { %4086 = vmatpush3.bf16.msra.mxu0 %v4440_v59 }
 0xae3   :  { %4087 = vmatprep.subr.bf16.mxu0 %v4587_v6 }
 0xae4   :  { %4150 = vmatpush3.bf16.msra.mxu1 %v4441_v32 }
 0xae5   :  { %4151 = vmatprep.subr.bf16.mxu1 %v4587_v6 }
 0xae6   :  { %4088 = vmatpush3.bf16.msra.mxu0 %v4442_v11 }
 0xae7   :  { %4089 = vmatprep.subr.bf16.mxu0 %v4587_v6 }
 0xae8   :  { %4152 = vmatpush3.bf16.msra.mxu1 %v4443_v17  ;;  %v3984_v17 = vld [vmem:[%s5802_s10] ss:$0 sm:$0xff] }
 0xae9   :  { %4153 = vmatprep.subr.bf16.mxu1 %v4587_v6 }
 0xaea   :  { %4090 = vmatpush3.bf16.msra.mxu0 %v4444_v21 }
 0xaeb   :  { %4095 = vmatprep.subr.bf16.mxu0 %v4587_v6 }
 0xaec   :  { %4154 = vmatpush3.bf16.msra.mxu1 %v4445_v35 }
 0xaed   :  { %4179 = vmatprep.subr.bf16.mxu1 %v4587_v6  ;;  %4092 = vmatmul.mubr.msk.bf16.vlgmr.msra.gmra.mrb[44].mxu0 %vm2828_vm1, %v2764_v39 }
 0xaee   :  { %4096 = vmatpush3.bf16.msra.mxu0 %v4446_v38  ;;  %4107 = vmatprep.mubr.msk.bf16.mxu0 %vm4588_vm0, %v4587_v6 }
 0xaef   :  { %4156 = vmatmul.mubr.msk.bf16.vlgmr.msra.gmra.mrb[84].mxu1 %vm2828_vm1, %v3237_v40  ;;  %4097 = vmatprep.subr.bf16.mxu0 %v4587_v6  ;;  %v4472_v40 = vld [vmem:[#allocation8 + $0x30] sm:$0xff]  }
 0xaf0   :  { %4195 = vmatprep.mubr.msk.bf16.mxu1 %vm4588_vm0, %v4587_v6  ;;  %4180 = vmatpush3.bf16.msra.mxu1 %v4466_v23 }
 0xaf1   :  { %4181 = vmatprep.subr.bf16.mxu1 %v4587_v6 }
 0xaf2   :  { %4098 = vmatpush3.bf16.msra.mxu0 %v4447_v41  ;;  %v4473_v41 = vld [vmem:[#allocation8 + $0x38] sm:$0xff]  }
 0xaf3   :  { %4099 = vmatprep.subr.bf16.mxu0 %v4587_v6 }
 0xaf4   :  { %4182 = vmatpush3.bf16.msra.mxu1 %v4467_v7 }
 0xaf5   :  { %4183 = vmatprep.subr.bf16.mxu1 %v4587_v6 }
 0xaf6   :  { %4100 = vmatpush3.bf16.msra.mxu0 %v4448_v42  ;;  %v3985_v42 = vld [vmem:[%s5804_s12] ss:$0 sm:$0xff]  ;;  %s4551_s12 = scalar_lea.vmem %s3573_s26, 32 }
 0xaf7   :  { %4101 = vmatprep.subr.bf16.mxu0 %v4587_v6  ;;  %p4552_p10 = scmp.ne.s32.totalorder %s3573_s26, %s4551_s12  ;;  %p4557_p12 = scmp.lt.s32.totalorder %s4551_s12, %s4551_s12 }
 0xaf8   :  { %4184 = vmatpush3.bf16.msra.mxu1 %v4468_v8 }
 0xaf9   :  { %4185 = vmatprep.subr.bf16.mxu1 %v4587_v6  ;;  %p4558_p13 = por %p4557_p12, %p4556_p11 }
 0xafa   :  { %4102 = vmatpush3.bf16.msra.mxu0 %v4449_v43 }
 0xafb   :  { %4103 = vmatprep.subr.bf16.mxu0 %v4587_v6  ;;  %p4559_p0 = pnand %p4558_p13, %p4552_p10 }
 0xafc   :  { %4186 = vmatpush3.bf16.msra.mxu1 %v4469_v9 }
 0xafd   :  { %4187 = vmatprep.subr.bf16.mxu1 %v4587_v6 }
 0xafe   :  { %4104 = vmatpush3.bf16.msra.mxu0 %v4450_v44 }
 0xaff   :  { %4105 = vmatprep.subr.bf16.mxu0 %v4587_v6 }
 0xb00   :  { %4188 = vmatpush3.bf16.msra.mxu1 %v4470_v10 }
 0xb01   :  { %4189 = vmatprep.subr.bf16.mxu1 %v4587_v6 }
 0xb02   :  { %4106 = vmatpush3.bf16.msra.mxu0 %v4451_v45 }
 0xb03   :  { %4127 = vmatprep.subr.bf16.mxu0 %v4587_v6 }
 0xb04   :  { %4190 = vmatpush3.bf16.msra.mxu1 %v4471_v12 }
 0xb05   :  { %4108 = vmatmul.mubr.msk.bf16.vlgmr.msra.gmra.mrb[48].mxu0 %vm2828_vm1, %v2952_v57  ;;  %4191 = vmatprep.subr.bf16.mxu1 %v4587_v6 }
 0xb06   :  { %4128 = vmatpush3.bf16.msra.mxu0 %v4452_v34  ;;  %4139 = vmatprep.mubr.msk.bf16.mxu0 %vm4588_vm0, %v4587_v6 }
 0xb07   :  { %4129 = vmatprep.subr.bf16.mxu0 %v4587_v6 }
 0xb08   :  { %4192 = vmatpush3.bf16.msra.mxu1 %v4472_v40 }
 0xb09   :  { %4193 = vmatprep.subr.bf16.mxu1 %v4587_v6 }
 0xb0a   :  { %4130 = vmatpush3.bf16.msra.mxu0 %v4453_v30 }
 0xb0b   :  { %4131 = vmatprep.subr.bf16.mxu0 %v4587_v6 }
 0xb0c   :  { %4194 = vmatpush3.bf16.msra.mxu1 %v4473_v41 }
 0xb0e   :  { %4132 = vmatpush3.bf16.msra.mxu0 %v4454_v33  ;;  %v3994_v33 = vld [vmem:[%s5806_s14] ss:$0 sm:$0xff] }
 0xb0f   :  { %4133 = vmatprep.subr.bf16.mxu0 %v4587_v6 }
 0xb12   :  { %4134 = vmatpush3.bf16.msra.mxu0 %v4455_v4 }
 0xb13   :  { %4135 = vmatprep.subr.bf16.mxu0 %v4587_v6 }
 0xb16   :  { %4136 = vmatpush3.bf16.msra.mxu0 %v4456_v47 }
 0xb17   :  { %4137 = vmatprep.subr.bf16.mxu0 %v4587_v6 }
 0xb1a   :  { %4138 = vmatpush3.bf16.msra.mxu0 %v4457_v19 }
 0xb1b   :  { %4159 = vmatprep.subr.bf16.mxu0 %v4587_v6 }
 0xb1d   :  { %4140 = vmatmul.mubr.msk.bf16.vlgmr.msra.gmra.mrb[52].mxu0 %vm2828_vm1, %v3142_v50 }
 0xb1e   :  { %4175 = vmatprep.mubr.msk.bf16.mxu0 %vm4588_vm0, %v4587_v6  ;;  %4160 = vmatpush3.bf16.msra.mxu0 %v4458_v60 }
 0xb1f   :  { %4161 = vmatprep.subr.bf16.mxu0 %v4587_v6 }
 0xb22   :  { %4162 = vmatpush3.bf16.msra.mxu0 %v4459_v61 }
 0xb23   :  { %4163 = vmatprep.subr.bf16.mxu0 %v4587_v6 }
 0xb26   :  { %4164 = vmatpush3.bf16.msra.mxu0 %v4460_v62 }
 0xb27   :  { %4165 = vmatprep.subr.bf16.mxu0 %v4587_v6 }
 0xb2a   :  { %4166 = vmatpush3.bf16.msra.mxu0 %v4461_v63 }
 0xb2b   :  { %4167 = vmatprep.subr.bf16.mxu0 %v4587_v6 }
 0xb2e   :  { %4168 = vmatpush3.bf16.msra.mxu0 %v4462_v1 }
 0xb2f   :  { %4169 = vmatprep.subr.bf16.mxu0 %v4587_v6 }
 0xb32   :  { %4170 = vmatpush3.bf16.msra.mxu0 %v4463_v2 }
 0xb33   :  { %4171 = vmatprep.subr.bf16.mxu0 %v4587_v6 }
 0xb36   :  { %4172 = vmatpush3.bf16.msra.mxu0 %v4464_v3 }
 0xb37   :  { %4173 = vmatprep.subr.bf16.mxu0 %v4587_v6 }
 0xb3a   :  { %4174 = vmatpush3.bf16.msra.mxu0 %v4465_v5 }
 0xba8   :  { %v2866_v13 = vpop.f32.mrb[40].mxu0 }
 0xba9   :  { %v4077_v22 = vpop.f32.mrb[41].mxu0 }
 0xbaa   :  { %v3134_v14 = vpop.f32.mrb[80].mxu1  ;;  %v2869_v53 = vpop.f32.mrb[42].mxu0 }
 0xbab   :  { %v4125_v26 = vpop.f32.mrb[81].mxu1  ;;  %v4078_v48 = vpop.f32.mrb[43].mxu0 }
 0xbac   :  { %v3137_v18 = vpop.f32.mrb[82].mxu1 }
 0xbad   :  { %v4126_v20 = vpop.f32.mrb[83].mxu1 }
 0xbc0   :  { %v2945_v25 = vpop.f32.mrb[44].mxu0 }
 0xbc1   :  { %v2946_v49 = vadd.f32 %v2945_v25, %v2866_v13  ;;  %v4093_v28 = vpop.f32.mrb[45].mxu0 }
 0xbc2   :  { %v3324_v46 = vpop.f32.mrb[84].mxu1  ;;  %v2948_v56 = vpop.f32.mrb[46].mxu0 }
 0xbc3   :  { %v4157_v58 = vpop.f32.mrb[85].mxu1  ;;  %v4094_v51 = vpop.f32.mrb[47].mxu0 }
 0xbc4   :  { %v3327_v27 = vpop.f32.mrb[86].mxu1 }
 0xbc5   :  { %v4158_v31 = vpop.f32.mrb[87].mxu1 }
 0xbd8   :  { %v3039_v15 = vpop.f32.mrb[48].mxu0 }
 0xbd9   :  { %v3045_v52 = vadd.f32 %v3039_v15, %v2946_v49  ;;  %v4109_v55 = vpop.f32.mrb[49].mxu0 }
 0xbda   :  { %v3042_v0 = vpop.f32.mrb[50].mxu0 }
 0xbdb   :  { %v4110_v54 = vpop.f32.mrb[51].mxu0  ;;  %v3140_v29 = vadd.f32 %v3134_v14, %v3045_v52 }
 0xbf0   :  { %v3229_v59 = vpop.f32.mrb[52].mxu0 }
 0xbf1   :  { %v3235_v32 = vadd.f32 %v3229_v59, %v3140_v29  ;;  %v4141_v11 = vpop.f32.mrb[53].mxu0 }
 0xbf2   :  { %v3232_v21 = vpop.f32.mrb[54].mxu0 }
 0xbf3   :  { %v3330_v35 = vadd.f32 %v3324_v46, %v3235_v32  ;;  %v4142_v36 = vpop.f32.mrb[55].mxu0 }
 0xbf5   :  { %v3338_v37 = vadd.f32 %v3984_v17, %v3330_v35 }
 0xbf7   :  { %v3339_v38 = vmax.f32 %v3338_v37, 0.0 }
 0xbf9   :  { %v3340_v39 = vpack.c.bf16 %v3339_v38, %v3339_v38 }
 0xbfb   :  { %4176 = vmatmul.mubr.bf16.vlgmr.msra.gmra.mrb[56].mxu0 %v3340_v39 }
 0xcce   :  { %v3446_v43 = vpop.f32.mrb[56].mxu0 }
 0xccf   :  { %v3447_v44 = vadd.f32 %v3985_v42, %v3446_v43  ;;  %v4177_v45 = vpop.f32.mrb[57].mxu0 }
 0xcd0   :  { %v3449_v16 = vpop.f32.mrb[58].mxu0 }
 0xcd1   :  { %v3452_v34 = vmax.f32 %v3447_v44, 0.0  ;;  %v4178_v57 = vpop.f32.mrb[59].mxu0 }
 0xcd3   :  { %v3453_v30 = vpack.c.bf16 %v3452_v34, %v3452_v34 }
 0xcd5   :  { %4196 = vmatmul.mubr.bf16.vlgmr.msra.gmra.mrb[88].mxu1 %v3453_v30 }
 0xda8   :  { %v3559_v6 = vpop.f32.mrb[88].mxu1 }
 0xda9   :  { %v3560_v4 = vadd.f32 %v3994_v33, %v3559_v6  ;;  %v4197_v47 = vpop.f32.mrb[89].mxu1 }
 0xdaa   :  { %v3562_v19 = vpop.f32.mrb[90].mxu1 }
 0xdab   :  { %3565 = vst [vmem:[#allocation9] sm:$0x3] %v3560_v4  ;;  %v4198_v24 = vpop.f32.mrb[91].mxu1 }
 0xdac   :  { %4562 = shalt.err (!%p4559_p0)
}
 0xdad   :  { %s4563_s14 = scalar_lea.hbm %s5807_s15, 32 }
 0xdae   :  { %p4564_p1 = scmp.ne.s32.totalorder %s5807_s15, %s4563_s14  ;;  %p4567_p2 = scmp.lt.u32.totalorder %s4563_s14, %s5807_s15 }
 0xdb0   :  { %p4569_p3 = pnand %p4567_p2, %p4564_p1 }
 0xdb2   :  { %4572 = shalt.err (!%p4569_p3)
}
 0xdb3   :  { %3575 = dma.vmem_to_hbm [thread:$0]  %s3573_s26, 32, %s5807_s15, [#allocation5]  }
 0xdb4   :  { %4577 = dma.done.wait [#allocation5], 32  }
 0xdb5   :  { %4578 = vsyncadd [#allocation5], 4294967264 }
 0xdb6   :  { %3579 = vsyncpa [#allocation4], 1 }
 0xdb7   :  { %3580 = vsyncpa [#allocation7], 1 }
 0xdb8   :  { %3581 = vsyncpa [#allocation5], 1 }

</bundles_post_ra>
